<compile_context>
chip_gen: v7x
topology: tpu7x:2x2x1
jax: 0.10.0
libtpu: 0.0.40
codegen_flags: <defaults>
</compile_context>

<pallas_src>
import functools

import jax
import jax.numpy as jnp
from jax import lax
from jax.experimental import pallas as pl
from jax.experimental.pallas import tpu as pltpu


# ----------------------------- Pallas kernels -------------------------------

def _conv_mm_kernel(p_ref, w_ref, b_ref, o_ref, *, relu):
    """One (TM, K) tile: out = act(patches @ W + bias)."""
    y = jnp.dot(p_ref[...], w_ref[...], preferred_element_type=jnp.float32)
    y = y + b_ref[...]                     # (TM, Cout) + (1, Cout) broadcast
    if relu:
        y = jnp.maximum(y, 0.0)
    o_ref[...] = y.astype(o_ref.dtype)


def _conv_mm_res_kernel(p_ref, w_ref, b_ref, r_ref, o_ref):
    """One (TM, K) tile: out = relu(patches @ W + bias + residual)."""
    y = jnp.dot(p_ref[...], w_ref[...], preferred_element_type=jnp.float32)
    y = y + b_ref[...] + r_ref[...]
    o_ref[...] = jnp.maximum(y, 0.0).astype(o_ref.dtype)


def _head_kernel(f_ref, w_ref, b_ref, o_ref, *, n_batch, hw):
    """Global average pool over each image's HW rows, then linear layer."""
    f = f_ref[...]                                           # (N*HW, C)
    gaps = jnp.concatenate(
        [jnp.mean(f[i * hw:(i + 1) * hw, :], axis=0, keepdims=True)
         for i in range(n_batch)],
        axis=0)                                              # (N, C)
    y = jnp.dot(gaps, w_ref[...], preferred_element_type=jnp.float32)
    y = y + b_ref[...]
    o_ref[...] = y.astype(o_ref.dtype)


# ------------------------------- wrappers ------------------------------------

def _im2col(x_nhwc, stride):
    """3x3 / padding=1 patch extraction. Returns (N*Ho*Wo, 9*C), (N, Ho, Wo)."""
    N, H, W, C = x_nhwc.shape
    xp = jnp.pad(x_nhwc, ((0, 0), (1, 1), (1, 1), (0, 0)))
    Ho = (H - 1) // stride + 1
    Wo = (W - 1) // stride + 1
    cols = []
    for ky in range(3):
        for kx in range(3):
            cols.append(
                xp[:, ky:ky + (Ho - 1) * stride + 1:stride,
                      kx:kx + (Wo - 1) * stride + 1:stride, :])
    patches = jnp.concatenate(cols, axis=-1)                 # (N, Ho, Wo, 9*C)
    return patches.reshape(N * Ho * Wo, 9 * C), (N, Ho, Wo)


def _fold_bn(w_hwio, bn, eps=1e-5):
    """Fold inference-mode BatchNorm into matmul weights + per-channel bias."""
    gamma, beta, mean, var = bn
    scale = gamma / jnp.sqrt(var + eps)                      # (Cout,)
    kh, kw, cin, cout = w_hwio.shape
    w_mat = w_hwio.reshape(kh * kw * cin, cout) * scale[None, :]
    bias = (beta - mean * scale).reshape(1, cout)
    return w_mat, bias


def fused_conv_bn(x_nhwc, w_hwio, bn, stride, *, relu=True, residual=None):
    """3x3 conv (padding=1, no bias) + BN (+ residual) + ReLU as one Pallas call."""
    patches, (N, Ho, Wo) = _im2col(x_nhwc, stride)
    w_mat, bias = _fold_bn(w_hwio, bn)
    M, K = patches.shape
    Cout = w_mat.shape[1]

    # Zero-pad contraction dim to a multiple of 8 (numerically inert).
    K_pad = ((K + 7) // 8) * 8
    if K_pad != K:
        patches = jnp.pad(patches, ((0, 0), (0, K_pad - K)))
        w_mat = jnp.pad(w_mat, ((0, K_pad - K), (0, 0)))
        K = K_pad

    TM = min(M, 256)
    assert M % TM == 0 and TM % 8 == 0
    grid = (M // TM,)

    in_specs = [
        pl.BlockSpec((TM, K), lambda i: (i, 0)),     # activations: tiled over M
        pl.BlockSpec((K, Cout), lambda i: (0, 0)),   # weights: DMA'd once, VMEM-resident
        pl.BlockSpec((1, Cout), lambda i: (0, 0)),   # folded BN bias
    ]
    args = [patches, w_mat, bias]

    if residual is None:
        kernel = functools.partial(_conv_mm_kernel, relu=relu)
    else:
        in_specs.append(pl.BlockSpec((TM, Cout), lambda i: (i, 0)))
        args.append(residual.reshape(M, Cout))
        kernel = _conv_mm_res_kernel

    out = pl.pallas_call(
        kernel,
        out_shape=jax.ShapeDtypeStruct((M, Cout), jnp.float32),
        grid=grid,
        in_specs=in_specs,
        out_specs=pl.BlockSpec((TM, Cout), lambda i: (i, 0)),
        compiler_params=pltpu.CompilerParams(dimension_semantics=("parallel",)),
    )(*args)
    return out.reshape(N, Ho, Wo, Cout)


def _shortcut(x_nhwc, in_planes, planes, stride):
    """Option-A shortcut: spatial subsample + zero-pad channels (parameter-free)."""
    if stride == 1 and in_planes == planes:
        return x_nhwc
    sc = x_nhwc[:, ::stride, ::stride, :]
    pad = planes // 4
    return jnp.pad(sc, ((0, 0), (0, 0), (0, 0), (pad, pad)))


def basic_block(x_nhwc, bp, in_planes, planes, stride):
    out = fused_conv_bn(x_nhwc, bp["w1"], bp["bn1"], stride, relu=True)
    sc = _shortcut(x_nhwc, in_planes, planes, stride)
    out = fused_conv_bn(out, bp["w2"], bp["bn2"], 1, residual=sc)
    return out


def resnet_forward(x_nchw, params):
    """Forward pass matching ResNet(BasicBlock, num_blocks) in the PyTorch spec."""
    x = jnp.transpose(x_nchw, (0, 2, 3, 1))          # NCHW -> NHWC (channels on lanes)
    out = fused_conv_bn(x, params["stem_w"], params["stem_bn"], 1, relu=True)

    in_planes = 16
    for layer, planes, stride0 in zip(params["layers"], (16, 32, 64), (1, 2, 2)):
        for bi, bp in enumerate(layer):
            stride = stride0 if bi == 0 else 1
            out = basic_block(out, bp, in_planes, planes, stride)
            in_planes = planes

    N, H, W, C = out.shape
    num_classes = params["fc_w"].shape[1]
    feat2d = out.reshape(N * H * W, C)
    logits = pl.pallas_call(
        functools.partial(_head_kernel, n_batch=N, hw=H * W),
        out_shape=jax.ShapeDtypeStruct((N, num_classes), jnp.float32),
    )(feat2d, params["fc_w"], params["fc_b"])
    return logits


# -------------------------------- init ---------------------------------------

def init_params(key, num_blocks=(1, 1, 1), num_classes=10):
    """kaiming_normal_ (fan_in, gain=sqrt(2)) on conv/linear weights,
    BatchNorm at PyTorch defaults (gamma=1, beta=0, running 0/1),
    Linear bias ~ U(-1/sqrt(fan_in), 1/sqrt(fan_in))."""
    def kaiming_conv(k, cin, cout):
        std = jnp.sqrt(2.0 / (cin * 9))
        return jax.random.normal(k, (3, 3, cin, cout), jnp.float32) * std

    def bn_default(c):
        return (jnp.ones((c,), jnp.float32), jnp.zeros((c,), jnp.float32),
                jnp.zeros((c,), jnp.float32), jnp.ones((c,), jnp.float32))

    n_convs = 1 + 2 * sum(num_blocks)
    ki = iter(jax.random.split(key, n_convs + 2))

    params = {"stem_w": kaiming_conv(next(ki), 3, 16), "stem_bn": bn_default(16)}
    layers = []
    in_planes = 16
    for planes, nb in zip((16, 32, 64), num_blocks):
        layer = []
        for _ in range(nb):
            layer.append({
                "w1": kaiming_conv(next(ki), in_planes, planes),
                "bn1": bn_default(planes),
                "w2": kaiming_conv(next(ki), planes, planes),
                "bn2": bn_default(planes),
            })
            in_planes = planes
        layers.append(layer)
    params["layers"] = layers

    params["fc_w"] = (jax.random.normal(next(ki), (64, num_classes), jnp.float32)
                      * jnp.sqrt(2.0 / 64.0))
    bound = 1.0 / jnp.sqrt(64.0)
    params["fc_b"] = jax.random.uniform(next(ki), (1, num_classes), jnp.float32,
                                        minval=-bound, maxval=bound)
    return params


# --------------------------- pure-JAX reference -------------------------------

def _ref_conv_bn(x, w, bn, stride, relu=True, res=None, eps=1e-5):
    y = lax.conv_general_dilated(
        x, w, (stride, stride), ((1, 1), (1, 1)),
        dimension_numbers=("NHWC", "HWIO", "NHWC"),
        precision=lax.Precision.HIGHEST)
    gamma, beta, mean, var = bn
    scale = gamma / jnp.sqrt(var + eps)
    y = y * scale + (beta - mean * scale)
    if res is not None:
        y = y + res
    if relu:
        y = jnp.maximum(y, 0.0)
    return y


def ref_forward(x_nchw, params):
    x = jnp.transpose(x_nchw, (0, 2, 3, 1))
    out = _ref_conv_bn(x, params["stem_w"], params["stem_bn"], 1)
    in_planes = 16
    for layer, planes, stride0 in zip(params["layers"], (16, 32, 64), (1, 2, 2)):
        for bi, bp in enumerate(layer):
            stride = stride0 if bi == 0 else 1
            h = _ref_conv_bn(out, bp["w1"], bp["bn1"], stride)
            sc = _shortcut(out, in_planes, planes, stride)
            out = _ref_conv_bn(h, bp["w2"], bp["bn2"], 1, res=sc)
            in_planes = planes
    gap = jnp.mean(out, axis=(1, 2))
    return jnp.dot(gap, params["fc_w"],
                   precision=lax.Precision.HIGHEST) + params["fc_b"]


# ---------------------------------- main --------------------------------------

if __name__ == "__main__":
    key = jax.random.PRNGKey(0)
    kx, kp = jax.random.split(key)

    batch, in_ch, spatial = 2, 3, 16
    num_blocks = (1, 1, 1)                 # small ResNet (spec's num_blocks arg)
    num_classes = 10

    x = jax.random.normal(kx, (batch, in_ch, spatial, spatial), jnp.float32)
    params = init_params(kp, num_blocks=num_blocks, num_classes=num_classes)

    fwd = jax.jit(resnet_forward)
    logits = jax.block_until_ready(fwd(x, params))

    ref = jax.block_until_ready(ref_forward(x, params))
    assert logits.shape == (batch, num_classes)
    assert jnp.allclose(logits, ref, atol=2e-3, rtol=2e-3), \
        float(jnp.max(jnp.abs(logits - ref)))

    print("KERNEL_OK")
</pallas_src>

<mosaic_0001>
module attributes {stable_mosaic.version = 11 : i64} {
  func.func @_conv_mm_kernel(%arg0: i32, %arg1: memref<256x32xf32, #tpu.memory_space<vmem>>, %arg2: memref<32x16xf32, #tpu.memory_space<vmem>>, %arg3: memref<1x16xf32, #tpu.memory_space<vmem>>, %arg4: memref<256x16xf32, #tpu.memory_space<vmem>>) attributes {dimension_semantics = [#tpu.dimension_semantics<parallel>], iteration_bounds = array<i64: 2>, scalar_prefetch = 0 : i64, scratch_operands = 0 : i64, tpu.core_type = #tpu.core_type<tc>, window_params = [{transform_indices = @transform_0, window_bounds = array<i64: 256, 32>}, {pipeline_mode = #tpu.pipeline_mode<synchronous>, transform_indices = @transform_1, window_bounds = array<i64: 32, 16>}, {pipeline_mode = #tpu.pipeline_mode<synchronous>, transform_indices = @transform_2, window_bounds = array<i64: 1, 16>}, {transform_indices = @transform_3, window_bounds = array<i64: 256, 16>}]} {
    %c0 = arith.constant 0 : index
    %c0_0 = arith.constant 0 : index
    %0 = vector.load %arg1[%c0, %c0_0] : memref<256x32xf32, #tpu.memory_space<vmem>>, vector<256x32xf32>
    %c0_1 = arith.constant 0 : index
    %c0_2 = arith.constant 0 : index
    %1 = vector.load %arg2[%c0_1, %c0_2] : memref<32x16xf32, #tpu.memory_space<vmem>>, vector<32x16xf32>
    %cst = arith.constant dense<0.000000e+00> : vector<256x16xf32>
    %2 = tpu.matmul %0, %1, %cst {dimension_numbers = #tpu.dot_dimension_numbers<[1], [0], [0], [1], [0, 0, 1, 1], [], []>} : vector<256x32xf32>, vector<32x16xf32>, vector<256x16xf32> -> vector<256x16xf32>
    %c0_3 = arith.constant 0 : index
    %c0_4 = arith.constant 0 : index
    %3 = vector.load %arg3[%c0_3, %c0_4] : memref<1x16xf32, #tpu.memory_space<vmem>>, vector<1x16xf32>
    %4 = vector.broadcast %3 : vector<1x16xf32> to vector<256x16xf32>
    %5 = arith.addf %2, %4 : vector<256x16xf32>
    %cst_5 = arith.constant 0.000000e+00 : f32
    %6 = vector.broadcast %cst_5 : f32 to vector<256x16xf32>
    %7 = arith.maximumf %5, %6 : vector<256x16xf32>
    %c0_6 = arith.constant 0 : index
    %c0_7 = arith.constant 0 : index
    %8 = vector.load %arg4[%c0_6, %c0_7] : memref<256x16xf32, #tpu.memory_space<vmem>>, vector<256x16xf32>
    tpu.vector_store %arg4[%c0_6, %c0_7], %7 {strides = array<i32>} : memref<256x16xf32, #tpu.memory_space<vmem>>, vector<256x16xf32>,
    return
  }
  func.func @transform_0(%arg0: i32) -> (i32, i32) {
    %c0_i32 = arith.constant 0 : i32
    %c0_i32_0 = arith.constant 0 : i32
    return %arg0, %c0_i32 : i32, i32
  }
  func.func @transform_1(%arg0: i32) -> (i32, i32) {
    %c0_i32 = arith.constant 0 : i32
    %c0_i32_0 = arith.constant 0 : i32
    %c0_i32_1 = arith.constant 0 : i32
    return %c0_i32, %c0_i32_0 : i32, i32
  }
  func.func @transform_2(%arg0: i32) -> (i32, i32) {
    %c0_i32 = arith.constant 0 : i32
    %c0_i32_0 = arith.constant 0 : i32
    %c0_i32_1 = arith.constant 0 : i32
    return %c0_i32, %c0_i32_0 : i32, i32
  }
  func.func @transform_3(%arg0: i32) -> (i32, i32) {
    %c0_i32 = arith.constant 0 : i32
    %c0_i32_0 = arith.constant 0 : i32
    return %arg0, %c0_i32 : i32, i32
  }
}

module attributes {stable_mosaic.version = 11 : i64} {
  func.func @_conv_mm_kernel(%arg0: i32, %arg1: memref<256x144xf32, #tpu.memory_space<vmem>>, %arg2: memref<144x16xf32, #tpu.memory_space<vmem>>, %arg3: memref<1x16xf32, #tpu.memory_space<vmem>>, %arg4: memref<256x16xf32, #tpu.memory_space<vmem>>) attributes {dimension_semantics = [#tpu.dimension_semantics<parallel>], iteration_bounds = array<i64: 2>, scalar_prefetch = 0 : i64, scratch_operands = 0 : i64, tpu.core_type = #tpu.core_type<tc>, window_params = [{transform_indices = @transform_0, window_bounds = array<i64: 256, 144>}, {pipeline_mode = #tpu.pipeline_mode<synchronous>, transform_indices = @transform_1, window_bounds = array<i64: 144, 16>}, {pipeline_mode = #tpu.pipeline_mode<synchronous>, transform_indices = @transform_2, window_bounds = array<i64: 1, 16>}, {transform_indices = @transform_3, window_bounds = array<i64: 256, 16>}]} {
    %c0 = arith.constant 0 : index
    %c0_0 = arith.constant 0 : index
    %0 = vector.load %arg1[%c0, %c0_0] : memref<256x144xf32, #tpu.memory_space<vmem>>, vector<256x144xf32>
    %c0_1 = arith.constant 0 : index
    %c0_2 = arith.constant 0 : index
    %1 = vector.load %arg2[%c0_1, %c0_2] : memref<144x16xf32, #tpu.memory_space<vmem>>, vector<144x16xf32>
    %cst = arith.constant dense<0.000000e+00> : vector<256x16xf32>
    %2 = tpu.matmul %0, %1, %cst {dimension_numbers = #tpu.dot_dimension_numbers<[1], [0], [0], [1], [0, 0, 1, 1], [], []>} : vector<256x144xf32>, vector<144x16xf32>, vector<256x16xf32> -> vector<256x16xf32>
    %c0_3 = arith.constant 0 : index
    %c0_4 = arith.constant 0 : index
    %3 = vector.load %arg3[%c0_3, %c0_4] : memref<1x16xf32, #tpu.memory_space<vmem>>, vector<1x16xf32>
    %4 = vector.broadcast %3 : vector<1x16xf32> to vector<256x16xf32>
    %5 = arith.addf %2, %4 : vector<256x16xf32>
    %cst_5 = arith.constant 0.000000e+00 : f32
    %6 = vector.broadcast %cst_5 : f32 to vector<256x16xf32>
    %7 = arith.maximumf %5, %6 : vector<256x16xf32>
    %c0_6 = arith.constant 0 : index
    %c0_7 = arith.constant 0 : index
    %8 = vector.load %arg4[%c0_6, %c0_7] : memref<256x16xf32, #tpu.memory_space<vmem>>, vector<256x16xf32>
    tpu.vector_store %arg4[%c0_6, %c0_7], %7 {strides = array<i32>} : memref<256x16xf32, #tpu.memory_space<vmem>>, vector<256x16xf32>,
    return
  }
  func.func @transform_0(%arg0: i32) -> (i32, i32) {
    %c0_i32 = arith.constant 0 : i32
    %c0_i32_0 = arith.constant 0 : i32
    return %arg0, %c0_i32 : i32, i32
  }
  func.func @transform_1(%arg0: i32) -> (i32, i32) {
    %c0_i32 = arith.constant 0 : i32
    %c0_i32_0 = arith.constant 0 : i32
    %c0_i32_1 = arith.constant 0 : i32
    return %c0_i32, %c0_i32_0 : i32, i32
  }
  func.func @transform_2(%arg0: i32) -> (i32, i32) {
    %c0_i32 = arith.constant 0 : i32
    %c0_i32_0 = arith.constant 0 : i32
    %c0_i32_1 = arith.constant 0 : i32
    return %c0_i32, %c0_i32_0 : i32, i32
  }
  func.func @transform_3(%arg0: i32) -> (i32, i32) {
    %c0_i32 = arith.constant 0 : i32
    %c0_i32_0 = arith.constant 0 : i32
    return %arg0, %c0_i32 : i32, i32
  }
}

module attributes {stable_mosaic.version = 11 : i64} {
  func.func @_conv_mm_res_kernel(%arg0: i32, %arg1: memref<256x144xf32, #tpu.memory_space<vmem>>, %arg2: memref<144x16xf32, #tpu.memory_space<vmem>>, %arg3: memref<1x16xf32, #tpu.memory_space<vmem>>, %arg4: memref<256x16xf32, #tpu.memory_space<vmem>>, %arg5: memref<256x16xf32, #tpu.memory_space<vmem>>) attributes {dimension_semantics = [#tpu.dimension_semantics<parallel>], iteration_bounds = array<i64: 2>, scalar_prefetch = 0 : i64, scratch_operands = 0 : i64, tpu.core_type = #tpu.core_type<tc>, window_params = [{transform_indices = @transform_0, window_bounds = array<i64: 256, 144>}, {pipeline_mode = #tpu.pipeline_mode<synchronous>, transform_indices = @transform_1, window_bounds = array<i64: 144, 16>}, {pipeline_mode = #tpu.pipeline_mode<synchronous>, transform_indices = @transform_2, window_bounds = array<i64: 1, 16>}, {transform_indices = @transform_3, window_bounds = array<i64: 256, 16>}, {transform_indices = @transform_4, window_bounds = array<i64: 256, 16>}]} {
    %c0 = arith.constant 0 : index
    %c0_0 = arith.constant 0 : index
    %0 = vector.load %arg1[%c0, %c0_0] : memref<256x144xf32, #tpu.memory_space<vmem>>, vector<256x144xf32>
    %c0_1 = arith.constant 0 : index
    %c0_2 = arith.constant 0 : index
    %1 = vector.load %arg2[%c0_1, %c0_2] : memref<144x16xf32, #tpu.memory_space<vmem>>, vector<144x16xf32>
    %cst = arith.constant dense<0.000000e+00> : vector<256x16xf32>
    %2 = tpu.matmul %0, %1, %cst {dimension_numbers = #tpu.dot_dimension_numbers<[1], [0], [0], [1], [0, 0, 1, 1], [], []>} : vector<256x144xf32>, vector<144x16xf32>, vector<256x16xf32> -> vector<256x16xf32>
    %c0_3 = arith.constant 0 : index
    %c0_4 = arith.constant 0 : index
    %3 = vector.load %arg3[%c0_3, %c0_4] : memref<1x16xf32, #tpu.memory_space<vmem>>, vector<1x16xf32>
    %4 = vector.broadcast %3 : vector<1x16xf32> to vector<256x16xf32>
    %5 = arith.addf %2, %4 : vector<256x16xf32>
    %c0_5 = arith.constant 0 : index
    %c0_6 = arith.constant 0 : index
    %6 = vector.load %arg4[%c0_5, %c0_6] : memref<256x16xf32, #tpu.memory_space<vmem>>, vector<256x16xf32>
    %7 = arith.addf %5, %6 : vector<256x16xf32>
    %cst_7 = arith.constant 0.000000e+00 : f32
    %8 = vector.broadcast %cst_7 : f32 to vector<256x16xf32>
    %9 = arith.maximumf %7, %8 : vector<256x16xf32>
    %c0_8 = arith.constant 0 : index
    %c0_9 = arith.constant 0 : index
    %10 = vector.load %arg5[%c0_8, %c0_9] : memref<256x16xf32, #tpu.memory_space<vmem>>, vector<256x16xf32>
    tpu.vector_store %arg5[%c0_8, %c0_9], %9 {strides = array<i32>} : memref<256x16xf32, #tpu.memory_space<vmem>>, vector<256x16xf32>,
    return
  }
  func.func @transform_0(%arg0: i32) -> (i32, i32) {
    %c0_i32 = arith.constant 0 : i32
    %c0_i32_0 = arith.constant 0 : i32
    return %arg0, %c0_i32 : i32, i32
  }
  func.func @transform_1(%arg0: i32) -> (i32, i32) {
    %c0_i32 = arith.constant 0 : i32
    %c0_i32_0 = arith.constant 0 : i32
    %c0_i32_1 = arith.constant 0 : i32
    return %c0_i32, %c0_i32_0 : i32, i32
  }
  func.func @transform_2(%arg0: i32) -> (i32, i32) {
    %c0_i32 = arith.constant 0 : i32
    %c0_i32_0 = arith.constant 0 : i32
    %c0_i32_1 = arith.constant 0 : i32
    return %c0_i32, %c0_i32_0 : i32, i32
  }
  func.func @transform_3(%arg0: i32) -> (i32, i32) {
    %c0_i32 = arith.constant 0 : i32
    %c0_i32_0 = arith.constant 0 : i32
    return %arg0, %c0_i32 : i32, i32
  }
  func.func @transform_4(%arg0: i32) -> (i32, i32) {
    %c0_i32 = arith.constant 0 : i32
    %c0_i32_0 = arith.constant 0 : i32
    return %arg0, %c0_i32 : i32, i32
  }
}

module attributes {stable_mosaic.version = 11 : i64} {
  func.func @_conv_mm_kernel(%arg0: i32, %arg1: memref<128x144xf32, #tpu.memory_space<vmem>>, %arg2: memref<144x32xf32, #tpu.memory_space<vmem>>, %arg3: memref<1x32xf32, #tpu.memory_space<vmem>>, %arg4: memref<128x32xf32, #tpu.memory_space<vmem>>) attributes {dimension_semantics = [#tpu.dimension_semantics<parallel>], iteration_bounds = array<i64: 1>, scalar_prefetch = 0 : i64, scratch_operands = 0 : i64, tpu.core_type = #tpu.core_type<tc>, window_params = [{transform_indices = @transform_0, window_bounds = array<i64: 128, 144>}, {pipeline_mode = #tpu.pipeline_mode<synchronous>, transform_indices = @transform_1, window_bounds = array<i64: 144, 32>}, {pipeline_mode = #tpu.pipeline_mode<synchronous>, transform_indices = @transform_2, window_bounds = array<i64: 1, 32>}, {transform_indices = @transform_3, window_bounds = array<i64: 128, 32>}]} {
    %c0 = arith.constant 0 : index
    %c0_0 = arith.constant 0 : index
    %0 = vector.load %arg1[%c0, %c0_0] : memref<128x144xf32, #tpu.memory_space<vmem>>, vector<128x144xf32>
    %c0_1 = arith.constant 0 : index
    %c0_2 = arith.constant 0 : index
    %1 = vector.load %arg2[%c0_1, %c0_2] : memref<144x32xf32, #tpu.memory_space<vmem>>, vector<144x32xf32>
    %cst = arith.constant dense<0.000000e+00> : vector<128x32xf32>
    %2 = tpu.matmul %0, %1, %cst {dimension_numbers = #tpu.dot_dimension_numbers<[1], [0], [0], [1], [0, 0, 1, 1], [], []>} : vector<128x144xf32>, vector<144x32xf32>, vector<128x32xf32> -> vector<128x32xf32>
    %c0_3 = arith.constant 0 : index
    %c0_4 = arith.constant 0 : index
    %3 = vector.load %arg3[%c0_3, %c0_4] : memref<1x32xf32, #tpu.memory_space<vmem>>, vector<1x32xf32>
    %4 = vector.broadcast %3 : vector<1x32xf32> to vector<128x32xf32>
    %5 = arith.addf %2, %4 : vector<128x32xf32>
    %cst_5 = arith.constant 0.000000e+00 : f32
    %6 = vector.broadcast %cst_5 : f32 to vector<128x32xf32>
    %7 = arith.maximumf %5, %6 : vector<128x32xf32>
    %c0_6 = arith.constant 0 : index
    %c0_7 = arith.constant 0 : index
    %8 = vector.load %arg4[%c0_6, %c0_7] : memref<128x32xf32, #tpu.memory_space<vmem>>, vector<128x32xf32>
    tpu.vector_store %arg4[%c0_6, %c0_7], %7 {strides = array<i32>} : memref<128x32xf32, #tpu.memory_space<vmem>>, vector<128x32xf32>,
    return
  }
  func.func @transform_0(%arg0: i32) -> (i32, i32) {
    %c0_i32 = arith.constant 0 : i32
    %c0_i32_0 = arith.constant 0 : i32
    return %arg0, %c0_i32 : i32, i32
  }
  func.func @transform_1(%arg0: i32) -> (i32, i32) {
    %c0_i32 = arith.constant 0 : i32
    %c0_i32_0 = arith.constant 0 : i32
    %c0_i32_1 = arith.constant 0 : i32
    return %c0_i32, %c0_i32_0 : i32, i32
  }
  func.func @transform_2(%arg0: i32) -> (i32, i32) {
    %c0_i32 = arith.constant 0 : i32
    %c0_i32_0 = arith.constant 0 : i32
    %c0_i32_1 = arith.constant 0 : i32
    return %c0_i32, %c0_i32_0 : i32, i32
  }
  func.func @transform_3(%arg0: i32) -> (i32, i32) {
    %c0_i32 = arith.constant 0 : i32
    %c0_i32_0 = arith.constant 0 : i32
    return %arg0, %c0_i32 : i32, i32
  }
}

module attributes {stable_mosaic.version = 11 : i64} {
  func.func @_conv_mm_res_kernel(%arg0: i32, %arg1: memref<128x288xf32, #tpu.memory_space<vmem>>, %arg2: memref<288x32xf32, #tpu.memory_space<vmem>>, %arg3: memref<1x32xf32, #tpu.memory_space<vmem>>, %arg4: memref<128x32xf32, #tpu.memory_space<vmem>>, %arg5: memref<128x32xf32, #tpu.memory_space<vmem>>) attributes {dimension_semantics = [#tpu.dimension_semantics<parallel>], iteration_bounds = array<i64: 1>, scalar_prefetch = 0 : i64, scratch_operands = 0 : i64, tpu.core_type = #tpu.core_type<tc>, window_params = [{transform_indices = @transform_0, window_bounds = array<i64: 128, 288>}, {pipeline_mode = #tpu.pipeline_mode<synchronous>, transform_indices = @transform_1, window_bounds = array<i64: 288, 32>}, {pipeline_mode = #tpu.pipeline_mode<synchronous>, transform_indices = @transform_2, window_bounds = array<i64: 1, 32>}, {transform_indices = @transform_3, window_bounds = array<i64: 128, 32>}, {transform_indices = @transform_4, window_bounds = array<i64: 128, 32>}]} {
    %c0 = arith.constant 0 : index
    %c0_0 = arith.constant 0 : index
    %0 = vector.load %arg1[%c0, %c0_0] : memref<128x288xf32, #tpu.memory_space<vmem>>, vector<128x288xf32>
    %c0_1 = arith.constant 0 : index
    %c0_2 = arith.constant 0 : index
    %1 = vector.load %arg2[%c0_1, %c0_2] : memref<288x32xf32, #tpu.memory_space<vmem>>, vector<288x32xf32>
    %cst = arith.constant dense<0.000000e+00> : vector<128x32xf32>
    %2 = tpu.matmul %0, %1, %cst {dimension_numbers = #tpu.dot_dimension_numbers<[1], [0], [0], [1], [0, 0, 1, 1], [], []>} : vector<128x288xf32>, vector<288x32xf32>, vector<128x32xf32> -> vector<128x32xf32>
    %c0_3 = arith.constant 0 : index
    %c0_4 = arith.constant 0 : index
    %3 = vector.load %arg3[%c0_3, %c0_4] : memref<1x32xf32, #tpu.memory_space<vmem>>, vector<1x32xf32>
    %4 = vector.broadcast %3 : vector<1x32xf32> to vector<128x32xf32>
    %5 = arith.addf %2, %4 : vector<128x32xf32>
    %c0_5 = arith.constant 0 : index
    %c0_6 = arith.constant 0 : index
    %6 = vector.load %arg4[%c0_5, %c0_6] : memref<128x32xf32, #tpu.memory_space<vmem>>, vector<128x32xf32>
    %7 = arith.addf %5, %6 : vector<128x32xf32>
    %cst_7 = arith.constant 0.000000e+00 : f32
    %8 = vector.broadcast %cst_7 : f32 to vector<128x32xf32>
    %9 = arith.maximumf %7, %8 : vector<128x32xf32>
    %c0_8 = arith.constant 0 : index
    %c0_9 = arith.constant 0 : index
    %10 = vector.load %arg5[%c0_8, %c0_9] : memref<128x32xf32, #tpu.memory_space<vmem>>, vector<128x32xf32>
    tpu.vector_store %arg5[%c0_8, %c0_9], %9 {strides = array<i32>} : memref<128x32xf32, #tpu.memory_space<vmem>>, vector<128x32xf32>,
    return
  }
  func.func @transform_0(%arg0: i32) -> (i32, i32) {
    %c0_i32 = arith.constant 0 : i32
    %c0_i32_0 = arith.constant 0 : i32
    return %arg0, %c0_i32 : i32, i32
  }
  func.func @transform_1(%arg0: i32) -> (i32, i32) {
    %c0_i32 = arith.constant 0 : i32
    %c0_i32_0 = arith.constant 0 : i32
    %c0_i32_1 = arith.constant 0 : i32
    return %c0_i32, %c0_i32_0 : i32, i32
  }
  func.func @transform_2(%arg0: i32) -> (i32, i32) {
    %c0_i32 = arith.constant 0 : i32
    %c0_i32_0 = arith.constant 0 : i32
    %c0_i32_1 = arith.constant 0 : i32
    return %c0_i32, %c0_i32_0 : i32, i32
  }
  func.func @transform_3(%arg0: i32) -> (i32, i32) {
    %c0_i32 = arith.constant 0 : i32
    %c0_i32_0 = arith.constant 0 : i32
    return %arg0, %c0_i32 : i32, i32
  }
  func.func @transform_4(%arg0: i32) -> (i32, i32) {
    %c0_i32 = arith.constant 0 : i32
    %c0_i32_0 = arith.constant 0 : i32
    return %arg0, %c0_i32 : i32, i32
  }
}

module attributes {stable_mosaic.version = 11 : i64} {
  func.func @_conv_mm_kernel(%arg0: i32, %arg1: memref<32x288xf32, #tpu.memory_space<vmem>>, %arg2: memref<288x64xf32, #tpu.memory_space<vmem>>, %arg3: memref<1x64xf32, #tpu.memory_space<vmem>>, %arg4: memref<32x64xf32, #tpu.memory_space<vmem>>) attributes {dimension_semantics = [#tpu.dimension_semantics<parallel>], iteration_bounds = array<i64: 1>, scalar_prefetch = 0 : i64, scratch_operands = 0 : i64, tpu.core_type = #tpu.core_type<tc>, window_params = [{transform_indices = @transform_0, window_bounds = array<i64: 32, 288>}, {pipeline_mode = #tpu.pipeline_mode<synchronous>, transform_indices = @transform_1, window_bounds = array<i64: 288, 64>}, {pipeline_mode = #tpu.pipeline_mode<synchronous>, transform_indices = @transform_2, window_bounds = array<i64: 1, 64>}, {transform_indices = @transform_3, window_bounds = array<i64: 32, 64>}]} {
    %c0 = arith.constant 0 : index
    %c0_0 = arith.constant 0 : index
    %0 = vector.load %arg1[%c0, %c0_0] : memref<32x288xf32, #tpu.memory_space<vmem>>, vector<32x288xf32>
    %c0_1 = arith.constant 0 : index
    %c0_2 = arith.constant 0 : index
    %1 = vector.load %arg2[%c0_1, %c0_2] : memref<288x64xf32, #tpu.memory_space<vmem>>, vector<288x64xf32>
    %cst = arith.constant dense<0.000000e+00> : vector<32x64xf32>
    %2 = tpu.matmul %0, %1, %cst {dimension_numbers = #tpu.dot_dimension_numbers<[1], [0], [0], [1], [0, 0, 1, 1], [], []>} : vector<32x288xf32>, vector<288x64xf32>, vector<32x64xf32> -> vector<32x64xf32>
    %c0_3 = arith.constant 0 : index
    %c0_4 = arith.constant 0 : index
    %3 = vector.load %arg3[%c0_3, %c0_4] : memref<1x64xf32, #tpu.memory_space<vmem>>, vector<1x64xf32>
    %4 = vector.broadcast %3 : vector<1x64xf32> to vector<32x64xf32>
    %5 = arith.addf %2, %4 : vector<32x64xf32>
    %cst_5 = arith.constant 0.000000e+00 : f32
    %6 = vector.broadcast %cst_5 : f32 to vector<32x64xf32>
    %7 = arith.maximumf %5, %6 : vector<32x64xf32>
    %c0_6 = arith.constant 0 : index
    %c0_7 = arith.constant 0 : index
    %8 = vector.load %arg4[%c0_6, %c0_7] : memref<32x64xf32, #tpu.memory_space<vmem>>, vector<32x64xf32>
    tpu.vector_store %arg4[%c0_6, %c0_7], %7 {strides = array<i32>} : memref<32x64xf32, #tpu.memory_space<vmem>>, vector<32x64xf32>,
    return
  }
  func.func @transform_0(%arg0: i32) -> (i32, i32) {
    %c0_i32 = arith.constant 0 : i32
    %c0_i32_0 = arith.constant 0 : i32
    return %arg0, %c0_i32 : i32, i32
  }
  func.func @transform_1(%arg0: i32) -> (i32, i32) {
    %c0_i32 = arith.constant 0 : i32
    %c0_i32_0 = arith.constant 0 : i32
    %c0_i32_1 = arith.constant 0 : i32
    return %c0_i32, %c0_i32_0 : i32, i32
  }
  func.func @transform_2(%arg0: i32) -> (i32, i32) {
    %c0_i32 = arith.constant 0 : i32
    %c0_i32_0 = arith.constant 0 : i32
    %c0_i32_1 = arith.constant 0 : i32
    return %c0_i32, %c0_i32_0 : i32, i32
  }
  func.func @transform_3(%arg0: i32) -> (i32, i32) {
    %c0_i32 = arith.constant 0 : i32
    %c0_i32_0 = arith.constant 0 : i32
    return %arg0, %c0_i32 : i32, i32
  }
}

module attributes {stable_mosaic.version = 11 : i64} {
  func.func @_conv_mm_res_kernel(%arg0: i32, %arg1: memref<32x576xf32, #tpu.memory_space<vmem>>, %arg2: memref<576x64xf32, #tpu.memory_space<vmem>>, %arg3: memref<1x64xf32, #tpu.memory_space<vmem>>, %arg4: memref<32x64xf32, #tpu.memory_space<vmem>>, %arg5: memref<32x64xf32, #tpu.memory_space<vmem>>) attributes {dimension_semantics = [#tpu.dimension_semantics<parallel>], iteration_bounds = array<i64: 1>, scalar_prefetch = 0 : i64, scratch_operands = 0 : i64, tpu.core_type = #tpu.core_type<tc>, window_params = [{transform_indices = @transform_0, window_bounds = array<i64: 32, 576>}, {pipeline_mode = #tpu.pipeline_mode<synchronous>, transform_indices = @transform_1, window_bounds = array<i64: 576, 64>}, {pipeline_mode = #tpu.pipeline_mode<synchronous>, transform_indices = @transform_2, window_bounds = array<i64: 1, 64>}, {transform_indices = @transform_3, window_bounds = array<i64: 32, 64>}, {transform_indices = @transform_4, window_bounds = array<i64: 32, 64>}]} {
    %c0 = arith.constant 0 : index
    %c0_0 = arith.constant 0 : index
    %0 = vector.load %arg1[%c0, %c0_0] : memref<32x576xf32, #tpu.memory_space<vmem>>, vector<32x576xf32>
    %c0_1 = arith.constant 0 : index
    %c0_2 = arith.constant 0 : index
    %1 = vector.load %arg2[%c0_1, %c0_2] : memref<576x64xf32, #tpu.memory_space<vmem>>, vector<576x64xf32>
    %cst = arith.constant dense<0.000000e+00> : vector<32x64xf32>
    %2 = tpu.matmul %0, %1, %cst {dimension_numbers = #tpu.dot_dimension_numbers<[1], [0], [0], [1], [0, 0, 1, 1], [], []>} : vector<32x576xf32>, vector<576x64xf32>, vector<32x64xf32> -> vector<32x64xf32>
    %c0_3 = arith.constant 0 : index
    %c0_4 = arith.constant 0 : index
    %3 = vector.load %arg3[%c0_3, %c0_4] : memref<1x64xf32, #tpu.memory_space<vmem>>, vector<1x64xf32>
    %4 = vector.broadcast %3 : vector<1x64xf32> to vector<32x64xf32>
    %5 = arith.addf %2, %4 : vector<32x64xf32>
    %c0_5 = arith.constant 0 : index
    %c0_6 = arith.constant 0 : index
    %6 = vector.load %arg4[%c0_5, %c0_6] : memref<32x64xf32, #tpu.memory_space<vmem>>, vector<32x64xf32>
    %7 = arith.addf %5, %6 : vector<32x64xf32>
    %cst_7 = arith.constant 0.000000e+00 : f32
    %8 = vector.broadcast %cst_7 : f32 to vector<32x64xf32>
    %9 = arith.maximumf %7, %8 : vector<32x64xf32>
    %c0_8 = arith.constant 0 : index
    %c0_9 = arith.constant 0 : index
    %10 = vector.load %arg5[%c0_8, %c0_9] : memref<32x64xf32, #tpu.memory_space<vmem>>, vector<32x64xf32>
    tpu.vector_store %arg5[%c0_8, %c0_9], %9 {strides = array<i32>} : memref<32x64xf32, #tpu.memory_space<vmem>>, vector<32x64xf32>,
    return
  }
  func.func @transform_0(%arg0: i32) -> (i32, i32) {
    %c0_i32 = arith.constant 0 : i32
    %c0_i32_0 = arith.constant 0 : i32
    return %arg0, %c0_i32 : i32, i32
  }
  func.func @transform_1(%arg0: i32) -> (i32, i32) {
    %c0_i32 = arith.constant 0 : i32
    %c0_i32_0 = arith.constant 0 : i32
    %c0_i32_1 = arith.constant 0 : i32
    return %c0_i32, %c0_i32_0 : i32, i32
  }
  func.func @transform_2(%arg0: i32) -> (i32, i32) {
    %c0_i32 = arith.constant 0 : i32
    %c0_i32_0 = arith.constant 0 : i32
    %c0_i32_1 = arith.constant 0 : i32
    return %c0_i32, %c0_i32_0 : i32, i32
  }
  func.func @transform_3(%arg0: i32) -> (i32, i32) {
    %c0_i32 = arith.constant 0 : i32
    %c0_i32_0 = arith.constant 0 : i32
    return %arg0, %c0_i32 : i32, i32
  }
  func.func @transform_4(%arg0: i32) -> (i32, i32) {
    %c0_i32 = arith.constant 0 : i32
    %c0_i32_0 = arith.constant 0 : i32
    return %arg0, %c0_i32 : i32, i32
  }
}

module attributes {stable_mosaic.version = 11 : i64} {
  func.func @_head_kernel(%arg0: memref<32x64xf32, #tpu.memory_space<vmem>>, %arg1: memref<64x10xf32, #tpu.memory_space<vmem>>, %arg2: memref<1x10xf32, #tpu.memory_space<vmem>>, %arg3: memref<2x10xf32, #tpu.memory_space<vmem>>) attributes {dimension_semantics = [], scalar_prefetch = 0 : i64, scratch_operands = 0 : i64, tpu.core_type = #tpu.core_type<tc>} {
    %c0 = arith.constant 0 : index
    %c0_0 = arith.constant 0 : index
    %0 = vector.load %arg0[%c0, %c0_0] : memref<32x64xf32, #tpu.memory_space<vmem>>, vector<32x64xf32>
    %1 = vector.extract_strided_slice %0 {offsets = [0, 0], sizes = [16, 64], strides = [1, 1]} : vector<32x64xf32> to vector<16x64xf32>
    %cst = arith.constant dense<0.000000e+00> : vector<64xf32>
    %2 = vector.multi_reduction <add>, %1, %cst [0] : vector<16x64xf32> to vector<64xf32>
    %3 = vector.shape_cast %2 : vector<64xf32> to vector<1x64xf32>
    %cst_1 = arith.constant 1.600000e+01 : f32
    %4 = vector.broadcast %cst_1 : f32 to vector<1x64xf32>
    %5 = arith.divf %3, %4 : vector<1x64xf32>
    %6 = vector.extract_strided_slice %0 {offsets = [16, 0], sizes = [16, 64], strides = [1, 1]} : vector<32x64xf32> to vector<16x64xf32>
    %cst_2 = arith.constant dense<0.000000e+00> : vector<64xf32>
    %7 = vector.multi_reduction <add>, %6, %cst_2 [0] : vector<16x64xf32> to vector<64xf32>
    %8 = vector.shape_cast %7 : vector<64xf32> to vector<1x64xf32>
    %cst_3 = arith.constant 1.600000e+01 : f32
    %9 = vector.broadcast %cst_3 : f32 to vector<1x64xf32>
    %10 = arith.divf %8, %9 : vector<1x64xf32>
    %11 = tpu.concatenate %5, %10 in 0 : vector<1x64xf32>, vector<1x64xf32> -> vector<2x64xf32>
    %c0_4 = arith.constant 0 : index
    %c0_5 = arith.constant 0 : index
    %12 = vector.load %arg1[%c0_4, %c0_5] : memref<64x10xf32, #tpu.memory_space<vmem>>, vector<64x10xf32>
    %cst_6 = arith.constant dense<0.000000e+00> : vector<2x10xf32>
    %13 = tpu.matmul %11, %12, %cst_6 {dimension_numbers = #tpu.dot_dimension_numbers<[1], [0], [0], [1], [0, 0, 1, 1], [], []>} : vector<2x64xf32>, vector<64x10xf32>, vector<2x10xf32> -> vector<2x10xf32>
    %c0_7 = arith.constant 0 : index
    %c0_8 = arith.constant 0 : index
    %14 = vector.load %arg2[%c0_7, %c0_8] : memref<1x10xf32, #tpu.memory_space<vmem>>, vector<1x10xf32>
    %15 = vector.broadcast %14 : vector<1x10xf32> to vector<2x10xf32>
    %16 = arith.addf %13, %15 : vector<2x10xf32>
    %c0_9 = arith.constant 0 : index
    %c0_10 = arith.constant 0 : index
    %17 = vector.load %arg3[%c0_9, %c0_10] : memref<2x10xf32, #tpu.memory_space<vmem>>, vector<2x10xf32>
    tpu.vector_store %arg3[%c0_9, %c0_10], %16 {strides = array<i32>} : memref<2x10xf32, #tpu.memory_space<vmem>>, vector<2x10xf32>,
    return
  }
}

</mosaic_0001>

<bundles_post_ra>
// kernel: resnet_forward.8
= control target key start
LH: loop header
LB: loop body
LE: loop exit
PB: predicated region body
PF: predicated region fallthrough
CT: control target
= control target key end

     0   :  { %s844_s12 = smov 0   ;;  %s1049_s0 = inlined_call_operand.vmem [shape: f32[512,32], index: 0, kind: input, shape index: {}]   ;;  %s1050_s1 = inlined_call_operand.vmem [shape: f32[32,16], index: 1, kind: input, shape index: {}]   ;;  %s1051_s2 = inlined_call_operand.vmem [shape: f32[1,16], index: 2, kind: input, shape index: {}]   ;;  %s1052_s3 = inlined_call_operand.vmem [shape: f32[512,16], index: 3, kind: output, shape index: {}]  }
   0x1 LB: > { %s660_s13 = sadd.s32 4294967295, %s822_s12   ;;  %p664_p0 = scmp.ge.s32.totalorder %s822_s12, 1  ;;  %s822_s12 = sphi %s844_s12, %s13_s12  }
   0x2   : > { %p138_p1 = scmp.lt.s32.totalorder %s822_s12, 3 }
   0x4   : > { %p139_p2 = pnand %p664_p0, %p138_p1 }
   0x5   : > { %v206_v0 = vld [vmem:[%s1050_s1] sm:$0xff] (!%p139_p2)  ;;  %v207_v1 = vld [vmem:[%s1050_s1 + $0x8] sm:$0xff] (!%p139_p2)  ;;  %v208_v2 = vld [vmem:[%s1050_s1 + $0x10] sm:$0xff] (!%p139_p2)  ;;  %s665_s20 = sshll.u32 (!%p139_p2), %s660_s13, 5  ;;  %vm217_vm0 = vcmask (!%p139_p2), 261120   ;;  %vm571_vm1 = vcmask (!%p139_p2), 130048  }
   0x6   : > { %142 = sbr.rel (%p139_p2) target bundleno = 265 (0x109), region = 32  ;;  %v796_v3 = vpack.c.bf16 (!%p139_p2), %v207_v1, %v206_v0  ;;  %v209_v4 = vld [vmem:[%s1050_s1 + $0x18] sm:$0xff] (!%p139_p2)  ;;  %p163_p3 = scmp.lt.s32.totalorder (!%p139_p2), %s665_s20, 63  ;;  %v941_v38 = vld [vmem:[%s1051_s2] ss:$0 sm:$0xff] (!%p139_p2) }
   0x7   : > { %v800_v5 = vpack.c.bf16 (!%p139_p2), %v209_v4, %v208_v2 }
   0x8   : > { %797 = vmatprep.subr.bf16.mxu0 (!%p139_p2), %v796_v3  ;;  %804 = vmatprep.subr.bf16.mxu1 (!%p139_p2), %v796_v3 }
   0x9   : > { %799 = vmatpush3.bf16.msra.mxu0 (!%p139_p2), %v796_v3  ;;  %806 = vmatpush3.bf16.msra.mxu1 (!%p139_p2), %v796_v3 }
   0xa   : > { %801 = vmatprep.subr.bf16.mxu0 (!%p139_p2), %v800_v5  ;;  %805 = vmatprep.subr.bf16.mxu1 (!%p139_p2), %v800_v5 }
   0xd   : > { %s1054_s20 = smov (!%p163_p3, %s665_s20), 63  ;;  %803 = vmatpush3.bf16.msra.mxu0 %v800_v5  ;;  %807 = vmatpush3.bf16.msra.mxu1 %v800_v5 }
   0xe   : > { %s666_s23 = sshll.u32 %s1054_s20, 3 }
   0xf   : > { %s872_s26 = scalar_lea.vmem %s1049_s0, %s666_s23  ;;  %s950_s4 = scalar_lea.vmem %s1052_s3, %s666_s23 }
  0x10   : > { %v174_v6 = vld [vmem:[%s872_s26] sm:$0xff]  ;;  %v175_v8 = vld [vmem:[%s872_s26 + $0x8] sm:$0xff]  ;;  %v176_v10 = vld [vmem:[%s872_s26 + $0x10] sm:$0xff] }
  0x11   : > { %v190_v7 = vld [vmem:[%s872_s26 + $0x80] sm:$0xff]  ;;  %v191_v9 = vld [vmem:[%s872_s26 + $0x88] sm:$0xff]  ;;  %748 = vmatprep.mubr.msk.f32.mxu0 %vm217_vm0, %v174_v6  ;;  %v192_v11 = vld [vmem:[%s872_s26 + $0x90] sm:$0xff] }
  0x12   : > { %772 = vmatprep.mubr.msk.f32.mxu1 %vm217_vm0, %v190_v7  ;;  %749 = vmatmul.mubr.msk.f32.vlgmr.msra.gmra.mrb[0].mxu0 %vm217_vm0, %v175_v8  ;;  %v177_v12 = vld [vmem:[%s872_s26 + $0x18] sm:$0xff]  ;;  %v178_v14 = vld [vmem:[%s872_s26 + $0x20] sm:$0xff]  ;;  %v179_v16 = vld [vmem:[%s872_s26 + $0x28] sm:$0xff] }
  0x13   : > { %773 = vmatmul.mubr.msk.f32.vlgmr.msra.gmra.mrb[0].mxu1 %vm217_vm0, %v191_v9  ;;  %751 = vmatprep.mubr.msk.f32.mxu0 %vm217_vm0, %v176_v10  ;;  %v193_v13 = vld [vmem:[%s872_s26 + $0x98] sm:$0xff]  ;;  %v194_v15 = vld [vmem:[%s872_s26 + $0xa0] sm:$0xff]  ;;  %v195_v17 = vld [vmem:[%s872_s26 + $0xa8] sm:$0xff] }
  0x14   : > { %775 = vmatprep.mubr.msk.f32.mxu1 %vm217_vm0, %v192_v11  ;;  %v180_v18 = vld [vmem:[%s872_s26 + $0x30] sm:$0xff]  ;;  %v181_v20 = vld [vmem:[%s872_s26 + $0x38] sm:$0xff]  ;;  %v182_v22 = vld [vmem:[%s872_s26 + $0x40] sm:$0xff] }
  0x15   : > { %v196_v19 = vld [vmem:[%s872_s26 + $0xb0] sm:$0xff]  ;;  %v197_v21 = vld [vmem:[%s872_s26 + $0xb8] sm:$0xff]  ;;  %v198_v23 = vld [vmem:[%s872_s26 + $0xc0] sm:$0xff] }
  0x16   : > { %752 = vmatmul.mubr.msk.f32.gmra.mrb[2].mxu0 %vm217_vm0, %v177_v12  ;;  %v183_v24 = vld [vmem:[%s872_s26 + $0x48] sm:$0xff]  ;;  %v184_v26 = vld [vmem:[%s872_s26 + $0x50] sm:$0xff]  ;;  %v185_v28 = vld [vmem:[%s872_s26 + $0x58] sm:$0xff] }
  0x17   : > { %776 = vmatmul.mubr.msk.f32.gmra.mrb[2].mxu1 %vm217_vm0, %v193_v13  ;;  %754 = vmatprep.mubr.msk.f32.mxu0 %vm217_vm0, %v178_v14  ;;  %v199_v25 = vld [vmem:[%s872_s26 + $0xc8] sm:$0xff]  ;;  %v200_v27 = vld [vmem:[%s872_s26 + $0xd0] sm:$0xff]  ;;  %v201_v29 = vld [vmem:[%s872_s26 + $0xd8] sm:$0xff] }
  0x18   : > { %778 = vmatprep.mubr.msk.f32.mxu1 %vm217_vm0, %v194_v15  ;;  %v186_v30 = vld [vmem:[%s872_s26 + $0x60] sm:$0xff]  ;;  %v187_v32 = vld [vmem:[%s872_s26 + $0x68] sm:$0xff]  ;;  %v188_v34 = vld [vmem:[%s872_s26 + $0x70] sm:$0xff] }
  0x19   : > { %v202_v31 = vld [vmem:[%s872_s26 + $0xe0] sm:$0xff]  ;;  %v203_v33 = vld [vmem:[%s872_s26 + $0xe8] sm:$0xff]  ;;  %v204_v35 = vld [vmem:[%s872_s26 + $0xf0] sm:$0xff] }
  0x1a   : > { %755 = vmatmul.mubr.msk.f32.gmra.mrb[4].mxu0 %vm217_vm0, %v179_v16  ;;  %v189_v36 = vld [vmem:[%s872_s26 + $0x78] sm:$0xff] }
  0x1b   : > { %779 = vmatmul.mubr.msk.f32.gmra.mrb[4].mxu1 %vm217_vm0, %v195_v17  ;;  %757 = vmatprep.mubr.msk.f32.mxu0 %vm217_vm0, %v180_v18  ;;  %v205_v37 = vld [vmem:[%s872_s26 + $0xf8] sm:$0xff] }
  0x1c   : > { %781 = vmatprep.mubr.msk.f32.mxu1 %vm217_vm0, %v196_v19 }
  0x1e   : > { %758 = vmatmul.mubr.msk.f32.gmra.mrb[6].mxu0 %vm217_vm0, %v181_v20 }
  0x1f   : > { %782 = vmatmul.mubr.msk.f32.gmra.mrb[6].mxu1 %vm217_vm0, %v197_v21  ;;  %760 = vmatprep.mubr.msk.f32.mxu0 %vm217_vm0, %v182_v22 }
  0x20   : > { %784 = vmatprep.mubr.msk.f32.mxu1 %vm217_vm0, %v198_v23 }
  0x22   : > { %761 = vmatmul.mubr.msk.f32.gmra.mrb[8].mxu0 %vm217_vm0, %v183_v24 }
  0x23   : > { %785 = vmatmul.mubr.msk.f32.gmra.mrb[8].mxu1 %vm217_vm0, %v199_v25  ;;  %763 = vmatprep.mubr.msk.f32.mxu0 %vm217_vm0, %v184_v26 }
  0x24   : > { %787 = vmatprep.mubr.msk.f32.mxu1 %vm217_vm0, %v200_v27 }
  0x26   : > { %764 = vmatmul.mubr.msk.f32.gmra.mrb[10].mxu0 %vm217_vm0, %v185_v28 }
  0x27   : > { %788 = vmatmul.mubr.msk.f32.gmra.mrb[10].mxu1 %vm217_vm0, %v201_v29  ;;  %766 = vmatprep.mubr.msk.f32.mxu0 %vm217_vm0, %v186_v30 }
  0x28   : > { %790 = vmatprep.mubr.msk.f32.mxu1 %vm217_vm0, %v202_v31 }
  0x2a   : > { %767 = vmatmul.mubr.msk.f32.gmra.mrb[12].mxu0 %vm217_vm0, %v187_v32 }
  0x2b   : > { %791 = vmatmul.mubr.msk.f32.gmra.mrb[12].mxu1 %vm217_vm0, %v203_v33  ;;  %769 = vmatprep.mubr.msk.f32.mxu0 %vm217_vm0, %v188_v34 }
  0x2c   : > { %793 = vmatprep.mubr.msk.f32.mxu1 %vm217_vm0, %v204_v35 }
  0x2e   : > { %770 = vmatmul.mubr.msk.f32.gmra.mrb[14].mxu0 %vm217_vm0, %v189_v36 }
  0x2f   : > { %794 = vmatmul.mubr.msk.f32.gmra.mrb[14].mxu1 %vm217_vm0, %v205_v37 }
  0xe5   : > { %v750_v39 = vpop.f32.mrb[0].mxu0 }
  0xe6   : > { %v774_v40 = vpop.f32.mrb[0].mxu1  ;;  %v386_v41 = vadd.f32 %v750_v39, %v941_v38  ;;  %v380_v43 = vpop.f32.mrb[1].mxu0 }
  0xe7   : > { %v466_v42 = vadd.f32 %v774_v40, %v941_v38  ;;  %v460_v44 = vpop.f32.mrb[1].mxu1  ;;  %v381_v45 = vadd.f32 %v941_v38, %v380_v43 }
  0xe8   : > { %v461_v46 = vadd.f32 %v941_v38, %v460_v44  ;;  %v540_v47 = vmax.f32 %v386_v41, 0.0 }
  0xe9   : > { %v556_v48 = vmax.f32 %v466_v42, 0.0  ;;  %v539_v49 = vmax.f32 %v381_v45, 0.0  ;;  %v753_v51 = vpop.f32.mrb[2].mxu0 }
  0xea   : > { %v555_v50 = vmax.f32 %v461_v46, 0.0  ;;  %v777_v52 = vpop.f32.mrb[2].mxu1  ;;  %573 = vst.msk [vmem:[%s950_s4 + $0x8] sm:$0xff] %vm571_vm1, %v540_v47  ;;  %v396_v53 = vadd.f32 %v753_v51, %v941_v38  ;;  %v390_v55 = vpop.f32.mrb[3].mxu0 }
  0xeb   : > { %589 = vst.msk [vmem:[%s950_s4 + $0x88] sm:$0xff] %vm571_vm1, %v556_v48  ;;  %v476_v54 = vadd.f32 %v777_v52, %v941_v38  ;;  %v470_v56 = vpop.f32.mrb[3].mxu1  ;;  %572 = vst.msk [vmem:[%s950_s4] sm:$0xff] %vm571_vm1, %v539_v49  ;;  %v391_v57 = vadd.f32 %v941_v38, %v390_v55 }
  0xec   : > { %588 = vst.msk [vmem:[%s950_s4 + $0x80] sm:$0xff] %vm571_vm1, %v555_v50  ;;  %v471_v58 = vadd.f32 %v941_v38, %v470_v56  ;;  %v542_v59 = vmax.f32 %v396_v53, 0.0 }
  0xed   : > { %v558_v60 = vmax.f32 %v476_v54, 0.0  ;;  %v541_v61 = vmax.f32 %v391_v57, 0.0  ;;  %v756_v63 = vpop.f32.mrb[4].mxu0 }
  0xee   : > { %v557_v62 = vmax.f32 %v471_v58, 0.0  ;;  %v780_v0 = vpop.f32.mrb[4].mxu1  ;;  %575 = vst.msk [vmem:[%s950_s4 + $0x18] sm:$0xff] %vm571_vm1, %v542_v59  ;;  %v406_v1 = vadd.f32 %v756_v63, %v941_v38  ;;  %v400_v3 = vpop.f32.mrb[5].mxu0 }
  0xef   : > { %591 = vst.msk [vmem:[%s950_s4 + $0x98] sm:$0xff] %vm571_vm1, %v558_v60  ;;  %v486_v2 = vadd.f32 %v780_v0, %v941_v38  ;;  %v480_v4 = vpop.f32.mrb[5].mxu1  ;;  %574 = vst.msk [vmem:[%s950_s4 + $0x10] sm:$0xff] %vm571_vm1, %v541_v61  ;;  %v401_v5 = vadd.f32 %v941_v38, %v400_v3 }
  0xf0   : > { %590 = vst.msk [vmem:[%s950_s4 + $0x90] sm:$0xff] %vm571_vm1, %v557_v62  ;;  %v481_v6 = vadd.f32 %v941_v38, %v480_v4  ;;  %v544_v7 = vmax.f32 %v406_v1, 0.0 }
  0xf1   : > { %v560_v8 = vmax.f32 %v486_v2, 0.0  ;;  %v543_v9 = vmax.f32 %v401_v5, 0.0  ;;  %v759_v11 = vpop.f32.mrb[6].mxu0 }
  0xf2   : > { %v559_v10 = vmax.f32 %v481_v6, 0.0  ;;  %v783_v12 = vpop.f32.mrb[6].mxu1  ;;  %577 = vst.msk [vmem:[%s950_s4 + $0x28] sm:$0xff] %vm571_vm1, %v544_v7  ;;  %v416_v13 = vadd.f32 %v759_v11, %v941_v38  ;;  %v410_v15 = vpop.f32.mrb[7].mxu0 }
  0xf3   : > { %593 = vst.msk [vmem:[%s950_s4 + $0xa8] sm:$0xff] %vm571_vm1, %v560_v8  ;;  %v496_v14 = vadd.f32 %v783_v12, %v941_v38  ;;  %v490_v16 = vpop.f32.mrb[7].mxu1  ;;  %576 = vst.msk [vmem:[%s950_s4 + $0x20] sm:$0xff] %vm571_vm1, %v543_v9  ;;  %v411_v17 = vadd.f32 %v941_v38, %v410_v15 }
  0xf4   : > { %592 = vst.msk [vmem:[%s950_s4 + $0xa0] sm:$0xff] %vm571_vm1, %v559_v10  ;;  %v491_v18 = vadd.f32 %v941_v38, %v490_v16  ;;  %v546_v19 = vmax.f32 %v416_v13, 0.0 }
  0xf5   : > { %v562_v20 = vmax.f32 %v496_v14, 0.0  ;;  %v545_v21 = vmax.f32 %v411_v17, 0.0  ;;  %v762_v23 = vpop.f32.mrb[8].mxu0 }
  0xf6   : > { %v561_v22 = vmax.f32 %v491_v18, 0.0  ;;  %v786_v24 = vpop.f32.mrb[8].mxu1  ;;  %579 = vst.msk [vmem:[%s950_s4 + $0x38] sm:$0xff] %vm571_vm1, %v546_v19  ;;  %v426_v25 = vadd.f32 %v762_v23, %v941_v38  ;;  %v420_v27 = vpop.f32.mrb[9].mxu0 }
  0xf7   : > { %595 = vst.msk [vmem:[%s950_s4 + $0xb8] sm:$0xff] %vm571_vm1, %v562_v20  ;;  %v506_v26 = vadd.f32 %v786_v24, %v941_v38  ;;  %v500_v28 = vpop.f32.mrb[9].mxu1  ;;  %578 = vst.msk [vmem:[%s950_s4 + $0x30] sm:$0xff] %vm571_vm1, %v545_v21  ;;  %v421_v29 = vadd.f32 %v941_v38, %v420_v27 }
  0xf8   : > { %594 = vst.msk [vmem:[%s950_s4 + $0xb0] sm:$0xff] %vm571_vm1, %v561_v22  ;;  %v501_v30 = vadd.f32 %v941_v38, %v500_v28  ;;  %v548_v31 = vmax.f32 %v426_v25, 0.0 }
  0xf9   : > { %v564_v32 = vmax.f32 %v506_v26, 0.0  ;;  %v547_v33 = vmax.f32 %v421_v29, 0.0  ;;  %v765_v35 = vpop.f32.mrb[10].mxu0 }
  0xfa   : > { %v563_v34 = vmax.f32 %v501_v30, 0.0  ;;  %v789_v36 = vpop.f32.mrb[10].mxu1  ;;  %581 = vst.msk [vmem:[%s950_s4 + $0x48] sm:$0xff] %vm571_vm1, %v548_v31  ;;  %v436_v37 = vadd.f32 %v765_v35, %v941_v38  ;;  %v430_v40 = vpop.f32.mrb[11].mxu0 }
  0xfb   : > { %597 = vst.msk [vmem:[%s950_s4 + $0xc8] sm:$0xff] %vm571_vm1, %v564_v32  ;;  %v516_v39 = vadd.f32 %v789_v36, %v941_v38  ;;  %v510_v41 = vpop.f32.mrb[11].mxu1  ;;  %580 = vst.msk [vmem:[%s950_s4 + $0x40] sm:$0xff] %vm571_vm1, %v547_v33  ;;  %v431_v42 = vadd.f32 %v941_v38, %v430_v40 }
  0xfc   : > { %596 = vst.msk [vmem:[%s950_s4 + $0xc0] sm:$0xff] %vm571_vm1, %v563_v34  ;;  %v511_v43 = vadd.f32 %v941_v38, %v510_v41  ;;  %v550_v44 = vmax.f32 %v436_v37, 0.0 }
  0xfd   : > { %v566_v45 = vmax.f32 %v516_v39, 0.0  ;;  %v549_v46 = vmax.f32 %v431_v42, 0.0  ;;  %v768_v48 = vpop.f32.mrb[12].mxu0 }
  0xfe   : > { %v565_v47 = vmax.f32 %v511_v43, 0.0  ;;  %v792_v49 = vpop.f32.mrb[12].mxu1  ;;  %583 = vst.msk [vmem:[%s950_s4 + $0x58] sm:$0xff] %vm571_vm1, %v550_v44  ;;  %v446_v50 = vadd.f32 %v768_v48, %v941_v38  ;;  %v440_v52 = vpop.f32.mrb[13].mxu0 }
  0xff   : > { %599 = vst.msk [vmem:[%s950_s4 + $0xd8] sm:$0xff] %vm571_vm1, %v566_v45  ;;  %v526_v51 = vadd.f32 %v792_v49, %v941_v38  ;;  %v520_v53 = vpop.f32.mrb[13].mxu1  ;;  %582 = vst.msk [vmem:[%s950_s4 + $0x50] sm:$0xff] %vm571_vm1, %v549_v46  ;;  %v441_v54 = vadd.f32 %v941_v38, %v440_v52 }
 0x100   : > { %598 = vst.msk [vmem:[%s950_s4 + $0xd0] sm:$0xff] %vm571_vm1, %v565_v47  ;;  %v521_v55 = vadd.f32 %v941_v38, %v520_v53  ;;  %v552_v56 = vmax.f32 %v446_v50, 0.0 }
 0x101   : > { %v568_v57 = vmax.f32 %v526_v51, 0.0  ;;  %v551_v58 = vmax.f32 %v441_v54, 0.0  ;;  %v771_v60 = vpop.f32.mrb[14].mxu0 }
 0x102   : > { %v567_v59 = vmax.f32 %v521_v55, 0.0  ;;  %v795_v61 = vpop.f32.mrb[14].mxu1  ;;  %585 = vst.msk [vmem:[%s950_s4 + $0x68] sm:$0xff] %vm571_vm1, %v552_v56  ;;  %v456_v62 = vadd.f32 %v771_v60, %v941_v38  ;;  %v450_v0 = vpop.f32.mrb[15].mxu0 }
 0x103   : > { %601 = vst.msk [vmem:[%s950_s4 + $0xe8] sm:$0xff] %vm571_vm1, %v568_v57  ;;  %v536_v63 = vadd.f32 %v795_v61, %v941_v38  ;;  %v530_v1 = vpop.f32.mrb[15].mxu1  ;;  %584 = vst.msk [vmem:[%s950_s4 + $0x60] sm:$0xff] %vm571_vm1, %v551_v58  ;;  %v451_v2 = vadd.f32 %v941_v38, %v450_v0 }
 0x104   : > { %600 = vst.msk [vmem:[%s950_s4 + $0xe0] sm:$0xff] %vm571_vm1, %v567_v59  ;;  %v531_v3 = vadd.f32 %v941_v38, %v530_v1  ;;  %v554_v4 = vmax.f32 %v456_v62, 0.0 }
 0x105   : > { %v570_v5 = vmax.f32 %v536_v63, 0.0  ;;  %v553_v6 = vmax.f32 %v451_v2, 0.0 }
 0x106   : > { %v569_v7 = vmax.f32 %v531_v3, 0.0  ;;  %587 = vst.msk [vmem:[%s950_s4 + $0x78] sm:$0xff] %vm571_vm1, %v554_v4 }
 0x107   : > { %603 = vst.msk [vmem:[%s950_s4 + $0xf8] sm:$0xff] %vm571_vm1, %v570_v5  ;;  %586 = vst.msk [vmem:[%s950_s4 + $0x70] sm:$0xff] %vm571_vm1, %v553_v6 }
 0x108   : > { %602 = vst.msk [vmem:[%s950_s4 + $0xf0] sm:$0xff] %vm571_vm1, %v569_v7 }
 0x109 PF: > { %s13_s12 = sadd.s32 1, %s822_s12  }
 0x10a   : > { %p10_p4 = scmp.ge.s32.totalorder %s13_s12, 4  }
 0x10c   :  { %12 = sbr.rel (!%p10_p4) target bundleno = 1 (0x1), region = 62 }

// kernel: resnet_forward.9
= control target key start
LH: loop header
LB: loop body
LE: loop exit
PB: predicated region body
PF: predicated region fallthrough
CT: control target
= control target key end

     0   :  { %s837_s12 = smov 0   ;;  %s1131_s0 = inlined_call_operand.vmem [shape: f32[512,144], index: 0, kind: input, shape index: {}]   ;;  %s1132_s1 = inlined_call_operand.vmem [shape: f32[144,16], index: 1, kind: input, shape index: {}]   ;;  %s1133_s2 = inlined_call_operand.vmem [shape: f32[1,16], index: 2, kind: input, shape index: {}]   ;;  %s1134_s3 = inlined_call_operand.vmem [shape: f32[512,16], index: 3, kind: output, shape index: {}]  }
   0x1 LB: > { %s708_s13 = sadd.s32 4294967295, %s814_s12   ;;  %p712_p0 = scmp.ge.s32.totalorder %s814_s12, 1  ;;  %s814_s12 = sphi %s837_s12, %s13_s12  }
   0x2   : > { %p139_p1 = scmp.lt.s32.totalorder %s814_s12, 3 }
   0x4   : > { %p140_p2 = pnand %p712_p0, %p139_p1 }
   0x5   : > { %v241_v0 = vld [vmem:[%s1132_s1] sm:$0xff] (!%p140_p2)  ;;  %v242_v1 = vld [vmem:[%s1132_s1 + $0x8] sm:$0xff] (!%p140_p2)  ;;  %v243_v2 = vld [vmem:[%s1132_s1 + $0x10] sm:$0xff] (!%p140_p2)  ;;  %s713_s20 = sshll.u32 (!%p140_p2), %s708_s13, 5  ;;  %v816_v3 = vmov (!%p140_p2), 0.0|0.0   ;;  %vm266_vm0 = vcmask (!%p140_p2), 130048  }
   0x6   : > { %143 = sbr.rel (%p140_p2) target bundleno = 320 (0x140), region = 32  ;;  %754 = vmatprep.subr.bf16.mxu0 (!%p140_p2), %v816_v3  ;;  %781 = vmatprep.subr.bf16.mxu1 (!%p140_p2), %v816_v3  ;;  %v755_v4 = vpack.c.bf16 (!%p140_p2), %v242_v1, %v241_v0  ;;  %v244_v5 = vld [vmem:[%s1132_s1 + $0x18] sm:$0xff] (!%p140_p2)  ;;  %p165_p3 = scmp.lt.s32.totalorder (!%p140_p2), %s713_s20, 63  ;;  %v245_v7 = vld [vmem:[%s1132_s1 + $0x20] sm:$0xff] (!%p140_p2)  ;;  %v246_v8 = vld [vmem:[%s1132_s1 + $0x28] sm:$0xff] (!%p140_p2) }
   0x7   : > { %v758_v6 = vpack.c.bf16 (!%p140_p2), %v244_v5, %v243_v2  ;;  %v761_v9 = vpack.c.bf16 (!%p140_p2), %v246_v8, %v245_v7  ;;  %v247_v12 = vld [vmem:[%s1132_s1 + $0x30] sm:$0xff] (!%p140_p2)  ;;  %v248_v13 = vld [vmem:[%s1132_s1 + $0x38] sm:$0xff] (!%p140_p2)  ;;  %v249_v15 = vld [vmem:[%s1132_s1 + $0x40] sm:$0xff] (!%p140_p2) }
   0x8   : > { %756 = vmatpush1.bf16.msra.mxu0 (!%p140_p2), %v755_v4  ;;  %790 = vmatpush1.bf16.msra.mxu1 (!%p140_p2), %v755_v4  ;;  %v764_v14 = vpack.c.bf16 (!%p140_p2), %v248_v13, %v247_v12  ;;  %v250_v16 = vld [vmem:[%s1132_s1 + $0x48] sm:$0xff] (!%p140_p2)  ;;  %v251_v18 = vld [vmem:[%s1132_s1 + $0x50] sm:$0xff] (!%p140_p2)  ;;  %v252_v19 = vld [vmem:[%s1132_s1 + $0x58] sm:$0xff] (!%p140_p2) }
   0x9   : > { %757 = vmatprep.subr.bf16.mxu0 (!%p140_p2), %v816_v3  ;;  %782 = vmatprep.subr.bf16.mxu1 (!%p140_p2), %v816_v3  ;;  %v767_v17 = vpack.c.bf16 (!%p140_p2), %v250_v16, %v249_v15  ;;  %v770_v20 = vpack.c.bf16 (!%p140_p2), %v252_v19, %v251_v18  ;;  %v253_v21 = vld [vmem:[%s1132_s1 + $0x60] sm:$0xff] (!%p140_p2)  ;;  %v254_v22 = vld [vmem:[%s1132_s1 + $0x68] sm:$0xff] (!%p140_p2)  ;;  %v255_v24 = vld [vmem:[%s1132_s1 + $0x70] sm:$0xff] (!%p140_p2) }
   0xa   : > { %v773_v23 = vpack.c.bf16 (!%p140_p2), %v254_v22, %v253_v21  ;;  %v256_v25 = vld [vmem:[%s1132_s1 + $0x78] sm:$0xff] (!%p140_p2)  ;;  %v257_v27 = vld [vmem:[%s1132_s1 + $0x80] sm:$0xff] (!%p140_p2)  ;;  %v258_v28 = vld [vmem:[%s1132_s1 + $0x88] sm:$0xff] (!%p140_p2) }
   0xb   : > { %v776_v26 = vpack.c.bf16 (!%p140_p2), %v256_v25, %v255_v24  ;;  %v779_v29 = vpack.c.bf16 (!%p140_p2), %v258_v28, %v257_v27  ;;  %v1024_v28 = vld [vmem:[%s1133_s2] ss:$0 sm:$0xff] (!%p140_p2) }
   0xc   : > { %759 = vmatpush1.bf16.msra.mxu0 (!%p140_p2), %v758_v6  ;;  %791 = vmatpush1.bf16.msra.mxu1 (!%p140_p2), %v758_v6 }
   0xd   : > { %s1136_s20 = smov (!%p165_p3, %s713_s20), 63  ;;  %760 = vmatprep.subr.bf16.mxu0 %v816_v3  ;;  %783 = vmatprep.subr.bf16.mxu1 %v816_v3 }
   0xe   : > { %s753_s27 = sshll.u32 %s1136_s20, 4  ;;  %s717_s6 = sshll.u32 %s1136_s20, 3 }
   0xf   : > { %s873_s30 = scalar_lea.vmem %s1131_s0, %s753_s27 }
  0x10   : > { %v178_v10 = vld [vmem:[%s873_s30 + $0x8] sm:$0xff]  ;;  %762 = vmatpush1.bf16.msra.mxu0 %v761_v9  ;;  %792 = vmatpush1.bf16.msra.mxu1 %v761_v9  ;;  %v177_v30 = vld [vmem:[%s873_s30] sm:$0xff]  ;;  %v180_v32 = vld [vmem:[%s873_s30 + $0x18] sm:$0xff] }
  0x11   : > { %v210_v11 = vld [vmem:[%s873_s30 + $0x108] sm:$0xff]  ;;  %719 = vmatprep.mubr.msk.f32.mxu0 %vm266_vm0, %v178_v10  ;;  %763 = vmatprep.subr.bf16.mxu0 %v816_v3  ;;  %v209_v31 = vld [vmem:[%s873_s30 + $0x100] sm:$0xff]  ;;  %v212_v33 = vld [vmem:[%s873_s30 + $0x118] sm:$0xff] }
  0x12   : > { %735 = vmatprep.mubr.msk.f32.mxu1 %vm266_vm0, %v210_v11  ;;  %784 = vmatprep.subr.bf16.mxu1 %v816_v3  ;;  %v179_v34 = vld [vmem:[%s873_s30 + $0x10] sm:$0xff]  ;;  %v182_v36 = vld [vmem:[%s873_s30 + $0x28] sm:$0xff]  ;;  %v181_v38 = vld [vmem:[%s873_s30 + $0x20] sm:$0xff] }
  0x13   : > { %v211_v35 = vld [vmem:[%s873_s30 + $0x110] sm:$0xff]  ;;  %v214_v37 = vld [vmem:[%s873_s30 + $0x128] sm:$0xff]  ;;  %v213_v39 = vld [vmem:[%s873_s30 + $0x120] sm:$0xff] }
  0x14   : > { %765 = vmatpush1.bf16.msra.mxu0 %v764_v14  ;;  %793 = vmatpush1.bf16.msra.mxu1 %v764_v14  ;;  %v184_v40 = vld [vmem:[%s873_s30 + $0x38] sm:$0xff]  ;;  %v183_v42 = vld [vmem:[%s873_s30 + $0x30] sm:$0xff]  ;;  %v186_v44 = vld [vmem:[%s873_s30 + $0x48] sm:$0xff] }
  0x15   : > { %766 = vmatprep.subr.bf16.mxu0 %v816_v3  ;;  %785 = vmatprep.subr.bf16.mxu1 %v816_v3  ;;  %v216_v41 = vld [vmem:[%s873_s30 + $0x138] sm:$0xff]  ;;  %v215_v43 = vld [vmem:[%s873_s30 + $0x130] sm:$0xff]  ;;  %v218_v45 = vld [vmem:[%s873_s30 + $0x148] sm:$0xff] }
  0x16   : > { %v185_v46 = vld [vmem:[%s873_s30 + $0x40] sm:$0xff]  ;;  %v188_v48 = vld [vmem:[%s873_s30 + $0x58] sm:$0xff]  ;;  %v187_v50 = vld [vmem:[%s873_s30 + $0x50] sm:$0xff] }
  0x17   : > { %v217_v47 = vld [vmem:[%s873_s30 + $0x140] sm:$0xff]  ;;  %v220_v49 = vld [vmem:[%s873_s30 + $0x158] sm:$0xff]  ;;  %v219_v51 = vld [vmem:[%s873_s30 + $0x150] sm:$0xff] }
  0x18   : > { %768 = vmatpush1.bf16.msra.mxu0 %v767_v17  ;;  %794 = vmatpush1.bf16.msra.mxu1 %v767_v17  ;;  %v190_v52 = vld [vmem:[%s873_s30 + $0x68] sm:$0xff]  ;;  %v189_v54 = vld [vmem:[%s873_s30 + $0x60] sm:$0xff]  ;;  %v192_v56 = vld [vmem:[%s873_s30 + $0x78] sm:$0xff] }
  0x19   : > { %769 = vmatprep.subr.bf16.mxu0 %v816_v3  ;;  %786 = vmatprep.subr.bf16.mxu1 %v816_v3  ;;  %v222_v53 = vld [vmem:[%s873_s30 + $0x168] sm:$0xff]  ;;  %v221_v55 = vld [vmem:[%s873_s30 + $0x160] sm:$0xff]  ;;  %v224_v57 = vld [vmem:[%s873_s30 + $0x178] sm:$0xff] }
  0x1a   : > { %v191_v58 = vld [vmem:[%s873_s30 + $0x70] sm:$0xff]  ;;  %v194_v60 = vld [vmem:[%s873_s30 + $0x88] sm:$0xff]  ;;  %v193_v62 = vld [vmem:[%s873_s30 + $0x80] sm:$0xff] }
  0x1b   : > { %v223_v59 = vld [vmem:[%s873_s30 + $0x170] sm:$0xff]  ;;  %v226_v61 = vld [vmem:[%s873_s30 + $0x188] sm:$0xff]  ;;  %v225_v63 = vld [vmem:[%s873_s30 + $0x180] sm:$0xff] }
  0x1c   : > { %771 = vmatpush1.bf16.msra.mxu0 %v770_v20  ;;  %795 = vmatpush1.bf16.msra.mxu1 %v770_v20  ;;  %v196_v0 = vld [vmem:[%s873_s30 + $0x98] sm:$0xff]  ;;  %v195_v2 = vld [vmem:[%s873_s30 + $0x90] sm:$0xff]  ;;  %v198_v4 = vld [vmem:[%s873_s30 + $0xa8] sm:$0xff] }
  0x1d   : > { %772 = vmatprep.subr.bf16.mxu0 %v816_v3  ;;  %787 = vmatprep.subr.bf16.mxu1 %v816_v3  ;;  %v228_v1 = vld [vmem:[%s873_s30 + $0x198] sm:$0xff]  ;;  %v230_v5 = vld [vmem:[%s873_s30 + $0x1a8] sm:$0xff]  ;;  %v197_v6 = vld [vmem:[%s873_s30 + $0xa0] sm:$0xff] }
  0x1e   : > { %v229_v7 = vld [vmem:[%s873_s30 + $0x1a0] sm:$0xff]  ;;  %v200_v8 = vld [vmem:[%s873_s30 + $0xb8] sm:$0xff]  ;;  %v199_v10 = vld [vmem:[%s873_s30 + $0xb0] sm:$0xff] }
  0x1f   : > { %v232_v9 = vld [vmem:[%s873_s30 + $0x1b8] sm:$0xff]  ;;  %v231_v11 = vld [vmem:[%s873_s30 + $0x1b0] sm:$0xff]  ;;  %v202_v12 = vld [vmem:[%s873_s30 + $0xc8] sm:$0xff] }
  0x20   : > { %774 = vmatpush1.bf16.msra.mxu0 %v773_v23  ;;  %796 = vmatpush1.bf16.msra.mxu1 %v773_v23  ;;  %v234_v13 = vld [vmem:[%s873_s30 + $0x1c8] sm:$0xff]  ;;  %v201_v14 = vld [vmem:[%s873_s30 + $0xc0] sm:$0xff]  ;;  %v204_v16 = vld [vmem:[%s873_s30 + $0xd8] sm:$0xff] }
  0x21   : > { %775 = vmatprep.subr.bf16.mxu0 %v816_v3  ;;  %788 = vmatprep.subr.bf16.mxu1 %v816_v3  ;;  %v233_v15 = vld [vmem:[%s873_s30 + $0x1c0] sm:$0xff]  ;;  %v236_v17 = vld [vmem:[%s873_s30 + $0x1d8] sm:$0xff]  ;;  %v203_v18 = vld [vmem:[%s873_s30 + $0xd0] sm:$0xff] }
  0x22   : > { %v235_v19 = vld [vmem:[%s873_s30 + $0x1d0] sm:$0xff]  ;;  %v206_v20 = vld [vmem:[%s873_s30 + $0xe8] sm:$0xff]  ;;  %v205_v22 = vld [vmem:[%s873_s30 + $0xe0] sm:$0xff] }
  0x23   : > { %v238_v21 = vld [vmem:[%s873_s30 + $0x1e8] sm:$0xff]  ;;  %v237_v23 = vld [vmem:[%s873_s30 + $0x1e0] sm:$0xff]  ;;  %v208_v24 = vld [vmem:[%s873_s30 + $0xf8] sm:$0xff] }
  0x24   : > { %777 = vmatpush1.bf16.msra.mxu0 %v776_v26  ;;  %797 = vmatpush1.bf16.msra.mxu1 %v776_v26  ;;  %v240_v25 = vld [vmem:[%s873_s30 + $0x1f8] sm:$0xff]  ;;  %v207_v26 = vld [vmem:[%s873_s30 + $0xf0] sm:$0xff] }
  0x25   : > { %778 = vmatprep.subr.bf16.mxu0 %v816_v3  ;;  %789 = vmatprep.subr.bf16.mxu1 %v816_v3  ;;  %v227_v3 = vld [vmem:[%s873_s30 + $0x190] sm:$0xff] }
  0x26   : > { %v239_v27 = vld [vmem:[%s873_s30 + $0x1f0] sm:$0xff]  ;;  %s1032_s30 = scalar_lea.vmem %s1134_s3, %s717_s6 }
  0x28   : > { %780 = vmatpush1.bf16.msra.mxu0 %v779_v29  ;;  %798 = vmatpush1.bf16.msra.mxu1 %v779_v29 }
  0x2b   : > { %428 = vmatmul.mubr.f32.vlgmr.msra.gmra.mrb[0].mxu0 %v177_v30  ;;  %508 = vmatmul.mubr.f32.vlgmr.msra.gmra.mrb[0].mxu1 %v209_v31 }
  0x2c   : > { %720 = vmatprep.mubr.msk.f32.mxu0 %vm266_vm0, %v180_v32  ;;  %736 = vmatprep.mubr.msk.f32.mxu1 %vm266_vm0, %v212_v33 }
  0x2f   : > { %433 = vmatmul.mubr.f32.gmra.mrb[2].mxu0 %v179_v34  ;;  %513 = vmatmul.mubr.f32.gmra.mrb[2].mxu1 %v211_v35 }
  0x30   : > { %721 = vmatprep.mubr.msk.f32.mxu0 %vm266_vm0, %v182_v36  ;;  %737 = vmatprep.mubr.msk.f32.mxu1 %vm266_vm0, %v214_v37 }
  0x33   : > { %438 = vmatmul.mubr.f32.gmra.mrb[4].mxu0 %v181_v38  ;;  %518 = vmatmul.mubr.f32.gmra.mrb[4].mxu1 %v213_v39 }
  0x34   : > { %722 = vmatprep.mubr.msk.f32.mxu0 %vm266_vm0, %v184_v40  ;;  %738 = vmatprep.mubr.msk.f32.mxu1 %vm266_vm0, %v216_v41 }
  0x37   : > { %443 = vmatmul.mubr.f32.gmra.mrb[6].mxu0 %v183_v42  ;;  %523 = vmatmul.mubr.f32.gmra.mrb[6].mxu1 %v215_v43 }
  0x38   : > { %723 = vmatprep.mubr.msk.f32.mxu0 %vm266_vm0, %v186_v44  ;;  %739 = vmatprep.mubr.msk.f32.mxu1 %vm266_vm0, %v218_v45 }
  0x3b   : > { %448 = vmatmul.mubr.f32.gmra.mrb[8].mxu0 %v185_v46  ;;  %528 = vmatmul.mubr.f32.gmra.mrb[8].mxu1 %v217_v47 }
  0x3c   : > { %724 = vmatprep.mubr.msk.f32.mxu0 %vm266_vm0, %v188_v48  ;;  %740 = vmatprep.mubr.msk.f32.mxu1 %vm266_vm0, %v220_v49 }
  0x3f   : > { %453 = vmatmul.mubr.f32.gmra.mrb[10].mxu0 %v187_v50  ;;  %533 = vmatmul.mubr.f32.gmra.mrb[10].mxu1 %v219_v51 }
  0x40   : > { %725 = vmatprep.mubr.msk.f32.mxu0 %vm266_vm0, %v190_v52  ;;  %741 = vmatprep.mubr.msk.f32.mxu1 %vm266_vm0, %v222_v53 }
  0x43   : > { %458 = vmatmul.mubr.f32.gmra.mrb[12].mxu0 %v189_v54  ;;  %538 = vmatmul.mubr.f32.gmra.mrb[12].mxu1 %v221_v55 }
  0x44   : > { %726 = vmatprep.mubr.msk.f32.mxu0 %vm266_vm0, %v192_v56  ;;  %742 = vmatprep.mubr.msk.f32.mxu1 %vm266_vm0, %v224_v57 }
  0x47   : > { %463 = vmatmul.mubr.f32.gmra.mrb[14].mxu0 %v191_v58  ;;  %543 = vmatmul.mubr.f32.gmra.mrb[14].mxu1 %v223_v59 }
  0x48   : > { %727 = vmatprep.mubr.msk.f32.mxu0 %vm266_vm0, %v194_v60  ;;  %743 = vmatprep.mubr.msk.f32.mxu1 %vm266_vm0, %v226_v61 }
  0x4b   : > { %468 = vmatmul.mubr.f32.gmra.mrb[16].mxu0 %v193_v62  ;;  %548 = vmatmul.mubr.f32.gmra.mrb[16].mxu1 %v225_v63 }
  0x4c   : > { %728 = vmatprep.mubr.msk.f32.mxu0 %vm266_vm0, %v196_v0  ;;  %744 = vmatprep.mubr.msk.f32.mxu1 %vm266_vm0, %v228_v1 }
  0x4f   : > { %473 = vmatmul.mubr.f32.gmra.mrb[18].mxu0 %v195_v2  ;;  %553 = vmatmul.mubr.f32.gmra.mrb[18].mxu1 %v227_v3 }
  0x50   : > { %729 = vmatprep.mubr.msk.f32.mxu0 %vm266_vm0, %v198_v4  ;;  %745 = vmatprep.mubr.msk.f32.mxu1 %vm266_vm0, %v230_v5 }
  0x53   : > { %478 = vmatmul.mubr.f32.gmra.mrb[20].mxu0 %v197_v6  ;;  %558 = vmatmul.mubr.f32.gmra.mrb[20].mxu1 %v229_v7 }
  0x54   : > { %730 = vmatprep.mubr.msk.f32.mxu0 %vm266_vm0, %v200_v8  ;;  %746 = vmatprep.mubr.msk.f32.mxu1 %vm266_vm0, %v232_v9 }
  0x57   : > { %483 = vmatmul.mubr.f32.gmra.mrb[22].mxu0 %v199_v10  ;;  %563 = vmatmul.mubr.f32.gmra.mrb[22].mxu1 %v231_v11 }
  0x58   : > { %731 = vmatprep.mubr.msk.f32.mxu0 %vm266_vm0, %v202_v12  ;;  %747 = vmatprep.mubr.msk.f32.mxu1 %vm266_vm0, %v234_v13 }
  0x5b   : > { %488 = vmatmul.mubr.f32.gmra.mrb[24].mxu0 %v201_v14  ;;  %568 = vmatmul.mubr.f32.gmra.mrb[24].mxu1 %v233_v15 }
  0x5c   : > { %732 = vmatprep.mubr.msk.f32.mxu0 %vm266_vm0, %v204_v16  ;;  %748 = vmatprep.mubr.msk.f32.mxu1 %vm266_vm0, %v236_v17 }
  0x5f   : > { %493 = vmatmul.mubr.f32.gmra.mrb[26].mxu0 %v203_v18  ;;  %573 = vmatmul.mubr.f32.gmra.mrb[26].mxu1 %v235_v19 }
  0x60   : > { %733 = vmatprep.mubr.msk.f32.mxu0 %vm266_vm0, %v206_v20  ;;  %749 = vmatprep.mubr.msk.f32.mxu1 %vm266_vm0, %v238_v21 }
  0x63   : > { %498 = vmatmul.mubr.f32.gmra.mrb[28].mxu0 %v205_v22  ;;  %578 = vmatmul.mubr.f32.gmra.mrb[28].mxu1 %v237_v23 }
  0x64   : > { %734 = vmatprep.mubr.msk.f32.mxu0 %vm266_vm0, %v208_v24  ;;  %750 = vmatprep.mubr.msk.f32.mxu1 %vm266_vm0, %v240_v25 }
  0x67   : > { %503 = vmatmul.mubr.f32.gmra.mrb[30].mxu0 %v207_v26  ;;  %583 = vmatmul.mubr.f32.gmra.mrb[30].mxu1 %v239_v27 }
  0xfe   : > { %v429_v29 = vpop.f32.mrb[0].mxu0  ;;  %v509_v30 = vpop.f32.mrb[0].mxu1 }
  0xff   : > { %v430_v31 = vadd.f32 %v1024_v28, %v429_v29  ;;  %v510_v32 = vadd.f32 %v1024_v28, %v509_v30  ;;  %v431_v33 = vpop.f32.mrb[1].mxu0  ;;  %v511_v34 = vpop.f32.mrb[1].mxu1 }
 0x101   : > { %v588_v35 = vmax.f32 %v430_v31, 0.0  ;;  %v604_v36 = vmax.f32 %v510_v32, 0.0 }
 0x102   : > { %v434_v37 = vpop.f32.mrb[2].mxu0  ;;  %v514_v38 = vpop.f32.mrb[2].mxu1 }
 0x103   : > { %620 = vst.msk [vmem:[%s1032_s30] sm:$0xff] %vm266_vm0, %v588_v35  ;;  %636 = vst.msk [vmem:[%s1032_s30 + $0x80] sm:$0xff] %vm266_vm0, %v604_v36  ;;  %v435_v39 = vadd.f32 %v1024_v28, %v434_v37  ;;  %v515_v40 = vadd.f32 %v1024_v28, %v514_v38  ;;  %v436_v41 = vpop.f32.mrb[3].mxu0  ;;  %v516_v42 = vpop.f32.mrb[3].mxu1 }
 0x105   : > { %v589_v43 = vmax.f32 %v435_v39, 0.0  ;;  %v605_v44 = vmax.f32 %v515_v40, 0.0 }
 0x106   : > { %v439_v45 = vpop.f32.mrb[4].mxu0  ;;  %v519_v46 = vpop.f32.mrb[4].mxu1 }
 0x107   : > { %621 = vst.msk [vmem:[%s1032_s30 + $0x8] sm:$0xff] %vm266_vm0, %v589_v43  ;;  %637 = vst.msk [vmem:[%s1032_s30 + $0x88] sm:$0xff] %vm266_vm0, %v605_v44  ;;  %v440_v47 = vadd.f32 %v1024_v28, %v439_v45  ;;  %v520_v48 = vadd.f32 %v1024_v28, %v519_v46  ;;  %v441_v49 = vpop.f32.mrb[5].mxu0  ;;  %v521_v50 = vpop.f32.mrb[5].mxu1 }
 0x109   : > { %v590_v51 = vmax.f32 %v440_v47, 0.0  ;;  %v606_v52 = vmax.f32 %v520_v48, 0.0 }
 0x10a   : > { %v444_v53 = vpop.f32.mrb[6].mxu0  ;;  %v524_v54 = vpop.f32.mrb[6].mxu1 }
 0x10b   : > { %622 = vst.msk [vmem:[%s1032_s30 + $0x10] sm:$0xff] %vm266_vm0, %v590_v51  ;;  %638 = vst.msk [vmem:[%s1032_s30 + $0x90] sm:$0xff] %vm266_vm0, %v606_v52  ;;  %v445_v55 = vadd.f32 %v1024_v28, %v444_v53  ;;  %v525_v56 = vadd.f32 %v1024_v28, %v524_v54  ;;  %v446_v57 = vpop.f32.mrb[7].mxu0  ;;  %v526_v58 = vpop.f32.mrb[7].mxu1 }
 0x10d   : > { %v591_v59 = vmax.f32 %v445_v55, 0.0  ;;  %v607_v60 = vmax.f32 %v525_v56, 0.0 }
 0x10e   : > { %v449_v61 = vpop.f32.mrb[8].mxu0  ;;  %v529_v62 = vpop.f32.mrb[8].mxu1 }
 0x10f   : > { %623 = vst.msk [vmem:[%s1032_s30 + $0x18] sm:$0xff] %vm266_vm0, %v591_v59  ;;  %639 = vst.msk [vmem:[%s1032_s30 + $0x98] sm:$0xff] %vm266_vm0, %v607_v60  ;;  %v450_v63 = vadd.f32 %v1024_v28, %v449_v61  ;;  %v530_v0 = vadd.f32 %v1024_v28, %v529_v62  ;;  %v451_v1 = vpop.f32.mrb[9].mxu0  ;;  %v531_v2 = vpop.f32.mrb[9].mxu1 }
 0x111   : > { %v592_v3 = vmax.f32 %v450_v63, 0.0  ;;  %v608_v4 = vmax.f32 %v530_v0, 0.0 }
 0x112   : > { %v454_v5 = vpop.f32.mrb[10].mxu0  ;;  %v534_v6 = vpop.f32.mrb[10].mxu1 }
 0x113   : > { %624 = vst.msk [vmem:[%s1032_s30 + $0x20] sm:$0xff] %vm266_vm0, %v592_v3  ;;  %640 = vst.msk [vmem:[%s1032_s30 + $0xa0] sm:$0xff] %vm266_vm0, %v608_v4  ;;  %v455_v7 = vadd.f32 %v1024_v28, %v454_v5  ;;  %v535_v8 = vadd.f32 %v1024_v28, %v534_v6  ;;  %v456_v9 = vpop.f32.mrb[11].mxu0  ;;  %v536_v10 = vpop.f32.mrb[11].mxu1 }
 0x115   : > { %v593_v11 = vmax.f32 %v455_v7, 0.0  ;;  %v609_v12 = vmax.f32 %v535_v8, 0.0 }
 0x116   : > { %v459_v13 = vpop.f32.mrb[12].mxu0  ;;  %v539_v14 = vpop.f32.mrb[12].mxu1 }
 0x117   : > { %625 = vst.msk [vmem:[%s1032_s30 + $0x28] sm:$0xff] %vm266_vm0, %v593_v11  ;;  %641 = vst.msk [vmem:[%s1032_s30 + $0xa8] sm:$0xff] %vm266_vm0, %v609_v12  ;;  %v460_v15 = vadd.f32 %v1024_v28, %v459_v13  ;;  %v540_v16 = vadd.f32 %v1024_v28, %v539_v14  ;;  %v461_v17 = vpop.f32.mrb[13].mxu0  ;;  %v541_v18 = vpop.f32.mrb[13].mxu1 }
 0x119   : > { %v594_v19 = vmax.f32 %v460_v15, 0.0  ;;  %v610_v20 = vmax.f32 %v540_v16, 0.0 }
 0x11a   : > { %v464_v21 = vpop.f32.mrb[14].mxu0  ;;  %v544_v22 = vpop.f32.mrb[14].mxu1 }
 0x11b   : > { %626 = vst.msk [vmem:[%s1032_s30 + $0x30] sm:$0xff] %vm266_vm0, %v594_v19  ;;  %642 = vst.msk [vmem:[%s1032_s30 + $0xb0] sm:$0xff] %vm266_vm0, %v610_v20  ;;  %v465_v23 = vadd.f32 %v1024_v28, %v464_v21  ;;  %v545_v24 = vadd.f32 %v1024_v28, %v544_v22  ;;  %v466_v25 = vpop.f32.mrb[15].mxu0  ;;  %v546_v26 = vpop.f32.mrb[15].mxu1 }
 0x11d   : > { %v595_v27 = vmax.f32 %v465_v23, 0.0  ;;  %v611_v29 = vmax.f32 %v545_v24, 0.0 }
 0x11e   : > { %v469_v30 = vpop.f32.mrb[16].mxu0  ;;  %v549_v31 = vpop.f32.mrb[16].mxu1 }
 0x11f   : > { %627 = vst.msk [vmem:[%s1032_s30 + $0x38] sm:$0xff] %vm266_vm0, %v595_v27  ;;  %643 = vst.msk [vmem:[%s1032_s30 + $0xb8] sm:$0xff] %vm266_vm0, %v611_v29  ;;  %v470_v32 = vadd.f32 %v1024_v28, %v469_v30  ;;  %v550_v33 = vadd.f32 %v1024_v28, %v549_v31  ;;  %v471_v34 = vpop.f32.mrb[17].mxu0  ;;  %v551_v35 = vpop.f32.mrb[17].mxu1 }
 0x121   : > { %v596_v36 = vmax.f32 %v470_v32, 0.0  ;;  %v612_v37 = vmax.f32 %v550_v33, 0.0 }
 0x122   : > { %v474_v38 = vpop.f32.mrb[18].mxu0  ;;  %v554_v39 = vpop.f32.mrb[18].mxu1 }
 0x123   : > { %628 = vst.msk [vmem:[%s1032_s30 + $0x40] sm:$0xff] %vm266_vm0, %v596_v36  ;;  %644 = vst.msk [vmem:[%s1032_s30 + $0xc0] sm:$0xff] %vm266_vm0, %v612_v37  ;;  %v475_v40 = vadd.f32 %v1024_v28, %v474_v38  ;;  %v555_v41 = vadd.f32 %v1024_v28, %v554_v39  ;;  %v476_v42 = vpop.f32.mrb[19].mxu0  ;;  %v556_v43 = vpop.f32.mrb[19].mxu1 }
 0x125   : > { %v597_v44 = vmax.f32 %v475_v40, 0.0  ;;  %v613_v45 = vmax.f32 %v555_v41, 0.0 }
 0x126   : > { %v479_v46 = vpop.f32.mrb[20].mxu0  ;;  %v559_v47 = vpop.f32.mrb[20].mxu1 }
 0x127   : > { %629 = vst.msk [vmem:[%s1032_s30 + $0x48] sm:$0xff] %vm266_vm0, %v597_v44  ;;  %645 = vst.msk [vmem:[%s1032_s30 + $0xc8] sm:$0xff] %vm266_vm0, %v613_v45  ;;  %v480_v48 = vadd.f32 %v1024_v28, %v479_v46  ;;  %v560_v49 = vadd.f32 %v1024_v28, %v559_v47  ;;  %v481_v50 = vpop.f32.mrb[21].mxu0  ;;  %v561_v51 = vpop.f32.mrb[21].mxu1 }
 0x129   : > { %v598_v52 = vmax.f32 %v480_v48, 0.0  ;;  %v614_v53 = vmax.f32 %v560_v49, 0.0 }
 0x12a   : > { %v484_v54 = vpop.f32.mrb[22].mxu0  ;;  %v564_v55 = vpop.f32.mrb[22].mxu1 }
 0x12b   : > { %630 = vst.msk [vmem:[%s1032_s30 + $0x50] sm:$0xff] %vm266_vm0, %v598_v52  ;;  %646 = vst.msk [vmem:[%s1032_s30 + $0xd0] sm:$0xff] %vm266_vm0, %v614_v53  ;;  %v485_v56 = vadd.f32 %v1024_v28, %v484_v54  ;;  %v565_v57 = vadd.f32 %v1024_v28, %v564_v55  ;;  %v486_v58 = vpop.f32.mrb[23].mxu0  ;;  %v566_v59 = vpop.f32.mrb[23].mxu1 }
 0x12d   : > { %v599_v60 = vmax.f32 %v485_v56, 0.0  ;;  %v615_v61 = vmax.f32 %v565_v57, 0.0 }
 0x12e   : > { %v489_v62 = vpop.f32.mrb[24].mxu0  ;;  %v569_v63 = vpop.f32.mrb[24].mxu1 }
 0x12f   : > { %631 = vst.msk [vmem:[%s1032_s30 + $0x58] sm:$0xff] %vm266_vm0, %v599_v60  ;;  %647 = vst.msk [vmem:[%s1032_s30 + $0xd8] sm:$0xff] %vm266_vm0, %v615_v61  ;;  %v490_v0 = vadd.f32 %v1024_v28, %v489_v62  ;;  %v570_v1 = vadd.f32 %v1024_v28, %v569_v63  ;;  %v491_v2 = vpop.f32.mrb[25].mxu0  ;;  %v571_v3 = vpop.f32.mrb[25].mxu1 }
 0x131   : > { %v600_v4 = vmax.f32 %v490_v0, 0.0  ;;  %v616_v5 = vmax.f32 %v570_v1, 0.0 }
 0x132   : > { %v494_v6 = vpop.f32.mrb[26].mxu0  ;;  %v574_v7 = vpop.f32.mrb[26].mxu1 }
 0x133   : > { %632 = vst.msk [vmem:[%s1032_s30 + $0x60] sm:$0xff] %vm266_vm0, %v600_v4  ;;  %648 = vst.msk [vmem:[%s1032_s30 + $0xe0] sm:$0xff] %vm266_vm0, %v616_v5  ;;  %v495_v8 = vadd.f32 %v1024_v28, %v494_v6  ;;  %v575_v9 = vadd.f32 %v1024_v28, %v574_v7  ;;  %v496_v10 = vpop.f32.mrb[27].mxu0  ;;  %v576_v11 = vpop.f32.mrb[27].mxu1 }
 0x135   : > { %v601_v12 = vmax.f32 %v495_v8, 0.0  ;;  %v617_v13 = vmax.f32 %v575_v9, 0.0 }
 0x136   : > { %v499_v14 = vpop.f32.mrb[28].mxu0  ;;  %v579_v15 = vpop.f32.mrb[28].mxu1 }
 0x137   : > { %633 = vst.msk [vmem:[%s1032_s30 + $0x68] sm:$0xff] %vm266_vm0, %v601_v12  ;;  %649 = vst.msk [vmem:[%s1032_s30 + $0xe8] sm:$0xff] %vm266_vm0, %v617_v13  ;;  %v500_v16 = vadd.f32 %v1024_v28, %v499_v14  ;;  %v580_v17 = vadd.f32 %v1024_v28, %v579_v15  ;;  %v501_v18 = vpop.f32.mrb[29].mxu0  ;;  %v581_v19 = vpop.f32.mrb[29].mxu1 }
 0x139   : > { %v602_v20 = vmax.f32 %v500_v16, 0.0  ;;  %v618_v21 = vmax.f32 %v580_v17, 0.0 }
 0x13a   : > { %v504_v22 = vpop.f32.mrb[30].mxu0  ;;  %v584_v23 = vpop.f32.mrb[30].mxu1 }
 0x13b   : > { %634 = vst.msk [vmem:[%s1032_s30 + $0x70] sm:$0xff] %vm266_vm0, %v602_v20  ;;  %650 = vst.msk [vmem:[%s1032_s30 + $0xf0] sm:$0xff] %vm266_vm0, %v618_v21  ;;  %v505_v24 = vadd.f32 %v1024_v28, %v504_v22  ;;  %v585_v25 = vadd.f32 %v1024_v28, %v584_v23  ;;  %v506_v26 = vpop.f32.mrb[31].mxu0  ;;  %v586_v27 = vpop.f32.mrb[31].mxu1 }
 0x13d   : > { %v603_v29 = vmax.f32 %v505_v24, 0.0  ;;  %v619_v30 = vmax.f32 %v585_v25, 0.0 }
 0x13f   : > { %635 = vst.msk [vmem:[%s1032_s30 + $0x78] sm:$0xff] %vm266_vm0, %v603_v29  ;;  %651 = vst.msk [vmem:[%s1032_s30 + $0xf8] sm:$0xff] %vm266_vm0, %v619_v30 }
 0x140 PF: > { %s13_s12 = sadd.s32 1, %s814_s12  }
 0x141   : > { %p10_p4 = scmp.ge.s32.totalorder %s13_s12, 4  }
 0x143   :  { %12 = sbr.rel (!%p10_p4) target bundleno = 1 (0x1), region = 62 }

// kernel: resnet_forward.10
= control target key start
LH: loop header
LB: loop body
LE: loop exit
PB: predicated region body
PF: predicated region fallthrough
CT: control target
= control target key end

     0   :  { %s969_s15 = smov 0   ;;  %s1300_s0 = inlined_call_operand.vmem [shape: f32[512,144], index: 0, kind: input, shape index: {}]   ;;  %s1301_s1 = inlined_call_operand.vmem [shape: f32[144,16], index: 1, kind: input, shape index: {}]   ;;  %s1302_s2 = inlined_call_operand.vmem [shape: f32[1,16], index: 2, kind: input, shape index: {}]   ;;  %s1303_s3 = inlined_call_operand.vmem [shape: f32[512,16], index: 3, kind: input, shape index: {}]   ;;  %s1304_s4 = inlined_call_operand.vmem [shape: f32[512,16], index: 4, kind: output, shape index: {}]  }
   0x1 LB: > { %s833_s16 = sadd.s32 4294967295, %s941_s15   ;;  %p837_p0 = scmp.ge.s32.totalorder %s941_s15, 1  ;;  %s941_s15 = sphi %s969_s15, %s14_s15  }
   0x2   : > { %p175_p1 = scmp.lt.s32.totalorder %s941_s15, 3 }
   0x4   : > { %p176_p2 = pnand %p837_p0, %p175_p1 }
   0x5   : > { %v290_v0 = vld [vmem:[%s1301_s1] sm:$0xff] (!%p176_p2)  ;;  %v291_v1 = vld [vmem:[%s1301_s1 + $0x8] sm:$0xff] (!%p176_p2)  ;;  %v292_v2 = vld [vmem:[%s1301_s1 + $0x10] sm:$0xff] (!%p176_p2)  ;;  %s838_s23 = sshll.u32 (!%p176_p2), %s833_s16, 5  ;;  %v943_v3 = vmov (!%p176_p2), 0.0|0.0   ;;  %vm315_vm0 = vcmask (!%p176_p2), 130048  }
   0x6   : > { %179 = sbr.rel (%p176_p2) target bundleno = 322 (0x142), region = 36  ;;  %881 = vmatprep.subr.bf16.mxu0 (!%p176_p2), %v943_v3  ;;  %908 = vmatprep.subr.bf16.mxu1 (!%p176_p2), %v943_v3  ;;  %v882_v4 = vpack.c.bf16 (!%p176_p2), %v291_v1, %v290_v0  ;;  %v293_v5 = vld [vmem:[%s1301_s1 + $0x18] sm:$0xff] (!%p176_p2)  ;;  %p208_p3 = scmp.lt.s32.totalorder (!%p176_p2), %s838_s23, 63  ;;  %v294_v7 = vld [vmem:[%s1301_s1 + $0x20] sm:$0xff] (!%p176_p2)  ;;  %v295_v8 = vld [vmem:[%s1301_s1 + $0x28] sm:$0xff] (!%p176_p2) }
   0x7   : > { %v885_v6 = vpack.c.bf16 (!%p176_p2), %v293_v5, %v292_v2  ;;  %v888_v9 = vpack.c.bf16 (!%p176_p2), %v295_v8, %v294_v7  ;;  %v296_v12 = vld [vmem:[%s1301_s1 + $0x30] sm:$0xff] (!%p176_p2)  ;;  %v297_v13 = vld [vmem:[%s1301_s1 + $0x38] sm:$0xff] (!%p176_p2)  ;;  %v298_v15 = vld [vmem:[%s1301_s1 + $0x40] sm:$0xff] (!%p176_p2) }
   0x8   : > { %883 = vmatpush1.bf16.msra.mxu0 (!%p176_p2), %v882_v4  ;;  %917 = vmatpush1.bf16.msra.mxu1 (!%p176_p2), %v882_v4  ;;  %v891_v14 = vpack.c.bf16 (!%p176_p2), %v297_v13, %v296_v12  ;;  %v299_v16 = vld [vmem:[%s1301_s1 + $0x48] sm:$0xff] (!%p176_p2)  ;;  %v300_v18 = vld [vmem:[%s1301_s1 + $0x50] sm:$0xff] (!%p176_p2)  ;;  %v301_v19 = vld [vmem:[%s1301_s1 + $0x58] sm:$0xff] (!%p176_p2) }
   0x9   : > { %884 = vmatprep.subr.bf16.mxu0 (!%p176_p2), %v943_v3  ;;  %909 = vmatprep.subr.bf16.mxu1 (!%p176_p2), %v943_v3  ;;  %v894_v17 = vpack.c.bf16 (!%p176_p2), %v299_v16, %v298_v15  ;;  %v897_v20 = vpack.c.bf16 (!%p176_p2), %v301_v19, %v300_v18  ;;  %v302_v21 = vld [vmem:[%s1301_s1 + $0x60] sm:$0xff] (!%p176_p2)  ;;  %v303_v22 = vld [vmem:[%s1301_s1 + $0x68] sm:$0xff] (!%p176_p2)  ;;  %v304_v24 = vld [vmem:[%s1301_s1 + $0x70] sm:$0xff] (!%p176_p2) }
   0xa   : > { %v900_v23 = vpack.c.bf16 (!%p176_p2), %v303_v22, %v302_v21  ;;  %v305_v25 = vld [vmem:[%s1301_s1 + $0x78] sm:$0xff] (!%p176_p2)  ;;  %v306_v27 = vld [vmem:[%s1301_s1 + $0x80] sm:$0xff] (!%p176_p2)  ;;  %v307_v28 = vld [vmem:[%s1301_s1 + $0x88] sm:$0xff] (!%p176_p2) }
   0xb   : > { %v903_v26 = vpack.c.bf16 (!%p176_p2), %v305_v25, %v304_v24  ;;  %v906_v29 = vpack.c.bf16 (!%p176_p2), %v307_v28, %v306_v27  ;;  %v1162_v28 = vld [vmem:[%s1302_s2] ss:$0 sm:$0xff] (!%p176_p2) }
   0xc   : > { %886 = vmatpush1.bf16.msra.mxu0 (!%p176_p2), %v885_v6  ;;  %918 = vmatpush1.bf16.msra.mxu1 (!%p176_p2), %v885_v6 }
   0xd   : > { %s1306_s23 = smov (!%p208_p3, %s838_s23), 63  ;;  %887 = vmatprep.subr.bf16.mxu0 %v943_v3  ;;  %910 = vmatprep.subr.bf16.mxu1 %v943_v3 }
   0xe   : > { %s880_s30 = sshll.u32 %s1306_s23, 4  ;;  %s842_s9 = sshll.u32 %s1306_s23, 3 }
   0xf   : > { %s1005_s7 = scalar_lea.vmem %s1300_s0, %s880_s30  ;;  %s1157_s12 = scalar_lea.vmem %s1303_s3, %s842_s9 }
  0x10   : > { %v227_v10 = vld [vmem:[%s1005_s7 + $0x8] sm:$0xff]  ;;  %889 = vmatpush1.bf16.msra.mxu0 %v888_v9  ;;  %919 = vmatpush1.bf16.msra.mxu1 %v888_v9  ;;  %v226_v30 = vld [vmem:[%s1005_s7] sm:$0xff]  ;;  %v229_v32 = vld [vmem:[%s1005_s7 + $0x18] sm:$0xff]  ;;  %s1171_s16 = scalar_lea.vmem %s1304_s4, %s842_s9 }
  0x11   : > { %v259_v11 = vld [vmem:[%s1005_s7 + $0x108] sm:$0xff]  ;;  %846 = vmatprep.mubr.msk.f32.mxu0 %vm315_vm0, %v227_v10  ;;  %890 = vmatprep.subr.bf16.mxu0 %v943_v3  ;;  %v258_v31 = vld [vmem:[%s1005_s7 + $0x100] sm:$0xff]  ;;  %v261_v33 = vld [vmem:[%s1005_s7 + $0x118] sm:$0xff] }
  0x12   : > { %862 = vmatprep.mubr.msk.f32.mxu1 %vm315_vm0, %v259_v11  ;;  %911 = vmatprep.subr.bf16.mxu1 %v943_v3  ;;  %v228_v34 = vld [vmem:[%s1005_s7 + $0x10] sm:$0xff]  ;;  %v231_v36 = vld [vmem:[%s1005_s7 + $0x28] sm:$0xff]  ;;  %v230_v38 = vld [vmem:[%s1005_s7 + $0x20] sm:$0xff] }
  0x13   : > { %v260_v35 = vld [vmem:[%s1005_s7 + $0x110] sm:$0xff]  ;;  %v263_v37 = vld [vmem:[%s1005_s7 + $0x128] sm:$0xff]  ;;  %v262_v39 = vld [vmem:[%s1005_s7 + $0x120] sm:$0xff] }
  0x14   : > { %892 = vmatpush1.bf16.msra.mxu0 %v891_v14  ;;  %920 = vmatpush1.bf16.msra.mxu1 %v891_v14  ;;  %v233_v40 = vld [vmem:[%s1005_s7 + $0x38] sm:$0xff]  ;;  %v232_v42 = vld [vmem:[%s1005_s7 + $0x30] sm:$0xff]  ;;  %v235_v44 = vld [vmem:[%s1005_s7 + $0x48] sm:$0xff] }
  0x15   : > { %893 = vmatprep.subr.bf16.mxu0 %v943_v3  ;;  %912 = vmatprep.subr.bf16.mxu1 %v943_v3  ;;  %v265_v41 = vld [vmem:[%s1005_s7 + $0x138] sm:$0xff]  ;;  %v264_v43 = vld [vmem:[%s1005_s7 + $0x130] sm:$0xff]  ;;  %v267_v45 = vld [vmem:[%s1005_s7 + $0x148] sm:$0xff] }
  0x16   : > { %v234_v46 = vld [vmem:[%s1005_s7 + $0x40] sm:$0xff]  ;;  %v237_v48 = vld [vmem:[%s1005_s7 + $0x58] sm:$0xff]  ;;  %v236_v50 = vld [vmem:[%s1005_s7 + $0x50] sm:$0xff] }
  0x17   : > { %v266_v47 = vld [vmem:[%s1005_s7 + $0x140] sm:$0xff]  ;;  %v269_v49 = vld [vmem:[%s1005_s7 + $0x158] sm:$0xff]  ;;  %v268_v51 = vld [vmem:[%s1005_s7 + $0x150] sm:$0xff] }
  0x18   : > { %895 = vmatpush1.bf16.msra.mxu0 %v894_v17  ;;  %921 = vmatpush1.bf16.msra.mxu1 %v894_v17  ;;  %v239_v52 = vld [vmem:[%s1005_s7 + $0x68] sm:$0xff]  ;;  %v238_v54 = vld [vmem:[%s1005_s7 + $0x60] sm:$0xff]  ;;  %v241_v56 = vld [vmem:[%s1005_s7 + $0x78] sm:$0xff] }
  0x19   : > { %896 = vmatprep.subr.bf16.mxu0 %v943_v3  ;;  %913 = vmatprep.subr.bf16.mxu1 %v943_v3  ;;  %v271_v53 = vld [vmem:[%s1005_s7 + $0x168] sm:$0xff]  ;;  %v270_v55 = vld [vmem:[%s1005_s7 + $0x160] sm:$0xff]  ;;  %v273_v57 = vld [vmem:[%s1005_s7 + $0x178] sm:$0xff] }
  0x1a   : > { %v240_v58 = vld [vmem:[%s1005_s7 + $0x70] sm:$0xff]  ;;  %v243_v60 = vld [vmem:[%s1005_s7 + $0x88] sm:$0xff]  ;;  %v242_v62 = vld [vmem:[%s1005_s7 + $0x80] sm:$0xff] }
  0x1b   : > { %v272_v59 = vld [vmem:[%s1005_s7 + $0x170] sm:$0xff]  ;;  %v275_v61 = vld [vmem:[%s1005_s7 + $0x188] sm:$0xff]  ;;  %v274_v63 = vld [vmem:[%s1005_s7 + $0x180] sm:$0xff] }
  0x1c   : > { %898 = vmatpush1.bf16.msra.mxu0 %v897_v20  ;;  %922 = vmatpush1.bf16.msra.mxu1 %v897_v20  ;;  %v245_v0 = vld [vmem:[%s1005_s7 + $0x98] sm:$0xff]  ;;  %v244_v2 = vld [vmem:[%s1005_s7 + $0x90] sm:$0xff]  ;;  %v247_v4 = vld [vmem:[%s1005_s7 + $0xa8] sm:$0xff] }
  0x1d   : > { %899 = vmatprep.subr.bf16.mxu0 %v943_v3  ;;  %914 = vmatprep.subr.bf16.mxu1 %v943_v3  ;;  %v277_v1 = vld [vmem:[%s1005_s7 + $0x198] sm:$0xff]  ;;  %v279_v5 = vld [vmem:[%s1005_s7 + $0x1a8] sm:$0xff]  ;;  %v246_v6 = vld [vmem:[%s1005_s7 + $0xa0] sm:$0xff] }
  0x1e   : > { %v278_v7 = vld [vmem:[%s1005_s7 + $0x1a0] sm:$0xff]  ;;  %v249_v8 = vld [vmem:[%s1005_s7 + $0xb8] sm:$0xff]  ;;  %v248_v10 = vld [vmem:[%s1005_s7 + $0xb0] sm:$0xff] }
  0x1f   : > { %v281_v9 = vld [vmem:[%s1005_s7 + $0x1b8] sm:$0xff]  ;;  %v280_v11 = vld [vmem:[%s1005_s7 + $0x1b0] sm:$0xff]  ;;  %v251_v12 = vld [vmem:[%s1005_s7 + $0xc8] sm:$0xff] }
  0x20   : > { %901 = vmatpush1.bf16.msra.mxu0 %v900_v23  ;;  %923 = vmatpush1.bf16.msra.mxu1 %v900_v23  ;;  %v283_v13 = vld [vmem:[%s1005_s7 + $0x1c8] sm:$0xff]  ;;  %v250_v14 = vld [vmem:[%s1005_s7 + $0xc0] sm:$0xff]  ;;  %v253_v16 = vld [vmem:[%s1005_s7 + $0xd8] sm:$0xff] }
  0x21   : > { %902 = vmatprep.subr.bf16.mxu0 %v943_v3  ;;  %915 = vmatprep.subr.bf16.mxu1 %v943_v3  ;;  %v282_v15 = vld [vmem:[%s1005_s7 + $0x1c0] sm:$0xff]  ;;  %v285_v17 = vld [vmem:[%s1005_s7 + $0x1d8] sm:$0xff]  ;;  %v252_v18 = vld [vmem:[%s1005_s7 + $0xd0] sm:$0xff] }
  0x22   : > { %v284_v19 = vld [vmem:[%s1005_s7 + $0x1d0] sm:$0xff]  ;;  %v255_v20 = vld [vmem:[%s1005_s7 + $0xe8] sm:$0xff]  ;;  %v254_v22 = vld [vmem:[%s1005_s7 + $0xe0] sm:$0xff] }
  0x23   : > { %v287_v21 = vld [vmem:[%s1005_s7 + $0x1e8] sm:$0xff]  ;;  %v286_v23 = vld [vmem:[%s1005_s7 + $0x1e0] sm:$0xff]  ;;  %v257_v24 = vld [vmem:[%s1005_s7 + $0xf8] sm:$0xff] }
  0x24   : > { %904 = vmatpush1.bf16.msra.mxu0 %v903_v26  ;;  %924 = vmatpush1.bf16.msra.mxu1 %v903_v26  ;;  %v289_v25 = vld [vmem:[%s1005_s7 + $0x1f8] sm:$0xff]  ;;  %v256_v26 = vld [vmem:[%s1005_s7 + $0xf0] sm:$0xff] }
  0x25   : > { %905 = vmatprep.subr.bf16.mxu0 %v943_v3  ;;  %916 = vmatprep.subr.bf16.mxu1 %v943_v3  ;;  %v276_v3 = vld [vmem:[%s1005_s7 + $0x190] sm:$0xff] }
  0x26   : > { %v288_v27 = vld [vmem:[%s1005_s7 + $0x1f0] sm:$0xff] }
  0x28   : > { %907 = vmatpush1.bf16.msra.mxu0 %v906_v29  ;;  %925 = vmatpush1.bf16.msra.mxu1 %v906_v29 }
  0x2b   : > { %477 = vmatmul.mubr.f32.vlgmr.msra.gmra.mrb[0].mxu0 %v226_v30  ;;  %557 = vmatmul.mubr.f32.vlgmr.msra.gmra.mrb[0].mxu1 %v258_v31  ;;  %v637_v30 = vld [vmem:[%s1157_s12] sm:$0xff] }
  0x2c   : > { %847 = vmatprep.mubr.msk.f32.mxu0 %vm315_vm0, %v229_v32  ;;  %863 = vmatprep.mubr.msk.f32.mxu1 %vm315_vm0, %v261_v33  ;;  %v653_v32 = vld [vmem:[%s1157_s12 + $0x80] sm:$0xff] }
  0x2f   : > { %482 = vmatmul.mubr.f32.gmra.mrb[2].mxu0 %v228_v34  ;;  %562 = vmatmul.mubr.f32.gmra.mrb[2].mxu1 %v260_v35 }
  0x30   : > { %848 = vmatprep.mubr.msk.f32.mxu0 %vm315_vm0, %v231_v36  ;;  %864 = vmatprep.mubr.msk.f32.mxu1 %vm315_vm0, %v263_v37 }
  0x33   : > { %487 = vmatmul.mubr.f32.gmra.mrb[4].mxu0 %v230_v38  ;;  %567 = vmatmul.mubr.f32.gmra.mrb[4].mxu1 %v262_v39 }
  0x34   : > { %849 = vmatprep.mubr.msk.f32.mxu0 %vm315_vm0, %v233_v40  ;;  %865 = vmatprep.mubr.msk.f32.mxu1 %vm315_vm0, %v265_v41  ;;  %v638_v40 = vld [vmem:[%s1157_s12 + $0x8] sm:$0xff] }
  0x37   : > { %492 = vmatmul.mubr.f32.gmra.mrb[6].mxu0 %v232_v42  ;;  %572 = vmatmul.mubr.f32.gmra.mrb[6].mxu1 %v264_v43  ;;  %v654_v42 = vld [vmem:[%s1157_s12 + $0x88] sm:$0xff] }
  0x38   : > { %850 = vmatprep.mubr.msk.f32.mxu0 %vm315_vm0, %v235_v44  ;;  %866 = vmatprep.mubr.msk.f32.mxu1 %vm315_vm0, %v267_v45 }
  0x3b   : > { %497 = vmatmul.mubr.f32.gmra.mrb[8].mxu0 %v234_v46  ;;  %577 = vmatmul.mubr.f32.gmra.mrb[8].mxu1 %v266_v47 }
  0x3c   : > { %851 = vmatprep.mubr.msk.f32.mxu0 %vm315_vm0, %v237_v48  ;;  %867 = vmatprep.mubr.msk.f32.mxu1 %vm315_vm0, %v269_v49 }
  0x3f   : > { %502 = vmatmul.mubr.f32.gmra.mrb[10].mxu0 %v236_v50  ;;  %582 = vmatmul.mubr.f32.gmra.mrb[10].mxu1 %v268_v51 }
  0x40   : > { %852 = vmatprep.mubr.msk.f32.mxu0 %vm315_vm0, %v239_v52  ;;  %868 = vmatprep.mubr.msk.f32.mxu1 %vm315_vm0, %v271_v53  ;;  %v639_v52 = vld [vmem:[%s1157_s12 + $0x10] sm:$0xff] }
  0x43   : > { %507 = vmatmul.mubr.f32.gmra.mrb[12].mxu0 %v238_v54  ;;  %587 = vmatmul.mubr.f32.gmra.mrb[12].mxu1 %v270_v55  ;;  %v655_v54 = vld [vmem:[%s1157_s12 + $0x90] sm:$0xff] }
  0x44   : > { %853 = vmatprep.mubr.msk.f32.mxu0 %vm315_vm0, %v241_v56  ;;  %869 = vmatprep.mubr.msk.f32.mxu1 %vm315_vm0, %v273_v57 }
  0x47   : > { %512 = vmatmul.mubr.f32.gmra.mrb[14].mxu0 %v240_v58  ;;  %592 = vmatmul.mubr.f32.gmra.mrb[14].mxu1 %v272_v59 }
  0x48   : > { %854 = vmatprep.mubr.msk.f32.mxu0 %vm315_vm0, %v243_v60  ;;  %870 = vmatprep.mubr.msk.f32.mxu1 %vm315_vm0, %v275_v61 }
  0x4b   : > { %517 = vmatmul.mubr.f32.gmra.mrb[16].mxu0 %v242_v62  ;;  %597 = vmatmul.mubr.f32.gmra.mrb[16].mxu1 %v274_v63 }
  0x4c   : > { %855 = vmatprep.mubr.msk.f32.mxu0 %vm315_vm0, %v245_v0  ;;  %871 = vmatprep.mubr.msk.f32.mxu1 %vm315_vm0, %v277_v1  ;;  %v640_v0 = vld [vmem:[%s1157_s12 + $0x18] sm:$0xff] }
  0x4f   : > { %522 = vmatmul.mubr.f32.gmra.mrb[18].mxu0 %v244_v2  ;;  %602 = vmatmul.mubr.f32.gmra.mrb[18].mxu1 %v276_v3  ;;  %v656_v2 = vld [vmem:[%s1157_s12 + $0x98] sm:$0xff] }
  0x50   : > { %856 = vmatprep.mubr.msk.f32.mxu0 %vm315_vm0, %v247_v4  ;;  %872 = vmatprep.mubr.msk.f32.mxu1 %vm315_vm0, %v279_v5 }
  0x53   : > { %527 = vmatmul.mubr.f32.gmra.mrb[20].mxu0 %v246_v6  ;;  %607 = vmatmul.mubr.f32.gmra.mrb[20].mxu1 %v278_v7 }
  0x54   : > { %857 = vmatprep.mubr.msk.f32.mxu0 %vm315_vm0, %v249_v8  ;;  %873 = vmatprep.mubr.msk.f32.mxu1 %vm315_vm0, %v281_v9 }
  0x57   : > { %532 = vmatmul.mubr.f32.gmra.mrb[22].mxu0 %v248_v10  ;;  %612 = vmatmul.mubr.f32.gmra.mrb[22].mxu1 %v280_v11 }
  0x58   : > { %858 = vmatprep.mubr.msk.f32.mxu0 %vm315_vm0, %v251_v12  ;;  %874 = vmatprep.mubr.msk.f32.mxu1 %vm315_vm0, %v283_v13  ;;  %v641_v12 = vld [vmem:[%s1157_s12 + $0x20] sm:$0xff] }
  0x5b   : > { %537 = vmatmul.mubr.f32.gmra.mrb[24].mxu0 %v250_v14  ;;  %617 = vmatmul.mubr.f32.gmra.mrb[24].mxu1 %v282_v15  ;;  %v657_v14 = vld [vmem:[%s1157_s12 + $0xa0] sm:$0xff] }
  0x5c   : > { %859 = vmatprep.mubr.msk.f32.mxu0 %vm315_vm0, %v253_v16  ;;  %875 = vmatprep.mubr.msk.f32.mxu1 %vm315_vm0, %v285_v17 }
  0x5f   : > { %542 = vmatmul.mubr.f32.gmra.mrb[26].mxu0 %v252_v18  ;;  %622 = vmatmul.mubr.f32.gmra.mrb[26].mxu1 %v284_v19 }
  0x60   : > { %860 = vmatprep.mubr.msk.f32.mxu0 %vm315_vm0, %v255_v20  ;;  %876 = vmatprep.mubr.msk.f32.mxu1 %vm315_vm0, %v287_v21 }
  0x63   : > { %547 = vmatmul.mubr.f32.gmra.mrb[28].mxu0 %v254_v22  ;;  %627 = vmatmul.mubr.f32.gmra.mrb[28].mxu1 %v286_v23 }
  0x64   : > { %861 = vmatprep.mubr.msk.f32.mxu0 %vm315_vm0, %v257_v24  ;;  %877 = vmatprep.mubr.msk.f32.mxu1 %vm315_vm0, %v289_v25  ;;  %v642_v24 = vld [vmem:[%s1157_s12 + $0x28] sm:$0xff] }
  0x67   : > { %552 = vmatmul.mubr.f32.gmra.mrb[30].mxu0 %v256_v26  ;;  %632 = vmatmul.mubr.f32.gmra.mrb[30].mxu1 %v288_v27  ;;  %v658_v26 = vld [vmem:[%s1157_s12 + $0xa8] sm:$0xff] }
  0xfe   : > { %v478_v29 = vpop.f32.mrb[0].mxu0  ;;  %v558_v31 = vpop.f32.mrb[0].mxu1 }
  0xff   : > { %v479_v33 = vadd.f32 %v1162_v28, %v478_v29  ;;  %v559_v34 = vadd.f32 %v1162_v28, %v558_v31  ;;  %v480_v35 = vpop.f32.mrb[1].mxu0  ;;  %v560_v36 = vpop.f32.mrb[1].mxu1 }
 0x101   : > { %v669_v37 = vadd.f32 %v637_v30, %v479_v33  ;;  %v685_v38 = vadd.f32 %v653_v32, %v559_v34 }
 0x102   : > { %v483_v39 = vpop.f32.mrb[2].mxu0  ;;  %v563_v41 = vpop.f32.mrb[2].mxu1 }
 0x103   : > { %v701_v43 = vmax.f32 %v669_v37, 0.0  ;;  %v717_v44 = vmax.f32 %v685_v38, 0.0  ;;  %v484_v45 = vadd.f32 %v1162_v28, %v483_v39  ;;  %v564_v46 = vadd.f32 %v1162_v28, %v563_v41  ;;  %v485_v47 = vpop.f32.mrb[3].mxu0  ;;  %v565_v48 = vpop.f32.mrb[3].mxu1  ;;  %v643_v37 = vld [vmem:[%s1157_s12 + $0x30] sm:$0xff] }
 0x104   : > { %v659_v39 = vld [vmem:[%s1157_s12 + $0xb0] sm:$0xff] }
 0x105   : > { %733 = vst.msk [vmem:[%s1171_s16] sm:$0xff] %vm315_vm0, %v701_v43  ;;  %749 = vst.msk [vmem:[%s1171_s16 + $0x80] sm:$0xff] %vm315_vm0, %v717_v44  ;;  %v670_v49 = vadd.f32 %v638_v40, %v484_v45  ;;  %v686_v50 = vadd.f32 %v654_v42, %v564_v46 }
 0x106   : > { %v488_v51 = vpop.f32.mrb[4].mxu0  ;;  %v568_v53 = vpop.f32.mrb[4].mxu1 }
 0x107   : > { %v702_v55 = vmax.f32 %v670_v49, 0.0  ;;  %v718_v56 = vmax.f32 %v686_v50, 0.0  ;;  %v489_v57 = vadd.f32 %v1162_v28, %v488_v51  ;;  %v569_v58 = vadd.f32 %v1162_v28, %v568_v53  ;;  %v490_v59 = vpop.f32.mrb[5].mxu0  ;;  %v570_v60 = vpop.f32.mrb[5].mxu1  ;;  %v644_v49 = vld [vmem:[%s1157_s12 + $0x38] sm:$0xff] }
 0x108   : > { %v660_v51 = vld [vmem:[%s1157_s12 + $0xb8] sm:$0xff] }
 0x109   : > { %734 = vst.msk [vmem:[%s1171_s16 + $0x8] sm:$0xff] %vm315_vm0, %v702_v55  ;;  %750 = vst.msk [vmem:[%s1171_s16 + $0x88] sm:$0xff] %vm315_vm0, %v718_v56  ;;  %v671_v61 = vadd.f32 %v639_v52, %v489_v57  ;;  %v687_v62 = vadd.f32 %v655_v54, %v569_v58 }
 0x10a   : > { %v493_v63 = vpop.f32.mrb[6].mxu0  ;;  %v573_v1 = vpop.f32.mrb[6].mxu1 }
 0x10b   : > { %v703_v3 = vmax.f32 %v671_v61, 0.0  ;;  %v719_v4 = vmax.f32 %v687_v62, 0.0  ;;  %v494_v5 = vadd.f32 %v1162_v28, %v493_v63  ;;  %v574_v6 = vadd.f32 %v1162_v28, %v573_v1  ;;  %v495_v7 = vpop.f32.mrb[7].mxu0  ;;  %v575_v8 = vpop.f32.mrb[7].mxu1  ;;  %v645_v61 = vld [vmem:[%s1157_s12 + $0x40] sm:$0xff] }
 0x10c   : > { %v661_v63 = vld [vmem:[%s1157_s12 + $0xc0] sm:$0xff] }
 0x10d   : > { %735 = vst.msk [vmem:[%s1171_s16 + $0x10] sm:$0xff] %vm315_vm0, %v703_v3  ;;  %751 = vst.msk [vmem:[%s1171_s16 + $0x90] sm:$0xff] %vm315_vm0, %v719_v4  ;;  %v672_v9 = vadd.f32 %v640_v0, %v494_v5  ;;  %v688_v10 = vadd.f32 %v656_v2, %v574_v6 }
 0x10e   : > { %v498_v11 = vpop.f32.mrb[8].mxu0  ;;  %v578_v13 = vpop.f32.mrb[8].mxu1 }
 0x10f   : > { %v704_v15 = vmax.f32 %v672_v9, 0.0  ;;  %v720_v16 = vmax.f32 %v688_v10, 0.0  ;;  %v499_v17 = vadd.f32 %v1162_v28, %v498_v11  ;;  %v579_v18 = vadd.f32 %v1162_v28, %v578_v13  ;;  %v500_v19 = vpop.f32.mrb[9].mxu0  ;;  %v580_v20 = vpop.f32.mrb[9].mxu1  ;;  %v646_v9 = vld [vmem:[%s1157_s12 + $0x48] sm:$0xff] }
 0x110   : > { %v662_v11 = vld [vmem:[%s1157_s12 + $0xc8] sm:$0xff] }
 0x111   : > { %736 = vst.msk [vmem:[%s1171_s16 + $0x18] sm:$0xff] %vm315_vm0, %v704_v15  ;;  %752 = vst.msk [vmem:[%s1171_s16 + $0x98] sm:$0xff] %vm315_vm0, %v720_v16  ;;  %v673_v21 = vadd.f32 %v641_v12, %v499_v17  ;;  %v689_v22 = vadd.f32 %v657_v14, %v579_v18 }
 0x112   : > { %v503_v23 = vpop.f32.mrb[10].mxu0  ;;  %v583_v25 = vpop.f32.mrb[10].mxu1 }
 0x113   : > { %v705_v27 = vmax.f32 %v673_v21, 0.0  ;;  %v721_v29 = vmax.f32 %v689_v22, 0.0  ;;  %v504_v30 = vadd.f32 %v1162_v28, %v503_v23  ;;  %v584_v31 = vadd.f32 %v1162_v28, %v583_v25  ;;  %v505_v32 = vpop.f32.mrb[11].mxu0  ;;  %v585_v33 = vpop.f32.mrb[11].mxu1  ;;  %v647_v21 = vld [vmem:[%s1157_s12 + $0x50] sm:$0xff] }
 0x114   : > { %v663_v23 = vld [vmem:[%s1157_s12 + $0xd0] sm:$0xff] }
 0x115   : > { %737 = vst.msk [vmem:[%s1171_s16 + $0x20] sm:$0xff] %vm315_vm0, %v705_v27  ;;  %753 = vst.msk [vmem:[%s1171_s16 + $0xa0] sm:$0xff] %vm315_vm0, %v721_v29  ;;  %v674_v34 = vadd.f32 %v642_v24, %v504_v30  ;;  %v690_v35 = vadd.f32 %v658_v26, %v584_v31 }
 0x116   : > { %v508_v36 = vpop.f32.mrb[12].mxu0  ;;  %v588_v38 = vpop.f32.mrb[12].mxu1 }
 0x117   : > { %v706_v40 = vmax.f32 %v674_v34, 0.0  ;;  %v722_v41 = vmax.f32 %v690_v35, 0.0  ;;  %v509_v42 = vadd.f32 %v1162_v28, %v508_v36  ;;  %v589_v43 = vadd.f32 %v1162_v28, %v588_v38  ;;  %v510_v44 = vpop.f32.mrb[13].mxu0  ;;  %v590_v45 = vpop.f32.mrb[13].mxu1  ;;  %v648_v34 = vld [vmem:[%s1157_s12 + $0x58] sm:$0xff] }
 0x118   : > { %v664_v36 = vld [vmem:[%s1157_s12 + $0xd8] sm:$0xff] }
 0x119   : > { %738 = vst.msk [vmem:[%s1171_s16 + $0x28] sm:$0xff] %vm315_vm0, %v706_v40  ;;  %754 = vst.msk [vmem:[%s1171_s16 + $0xa8] sm:$0xff] %vm315_vm0, %v722_v41  ;;  %v675_v46 = vadd.f32 %v643_v37, %v509_v42  ;;  %v691_v47 = vadd.f32 %v659_v39, %v589_v43 }
 0x11a   : > { %v513_v48 = vpop.f32.mrb[14].mxu0  ;;  %v593_v50 = vpop.f32.mrb[14].mxu1 }
 0x11b   : > { %v707_v52 = vmax.f32 %v675_v46, 0.0  ;;  %v723_v53 = vmax.f32 %v691_v47, 0.0  ;;  %v514_v54 = vadd.f32 %v1162_v28, %v513_v48  ;;  %v594_v55 = vadd.f32 %v1162_v28, %v593_v50  ;;  %v515_v56 = vpop.f32.mrb[15].mxu0  ;;  %v595_v57 = vpop.f32.mrb[15].mxu1  ;;  %v649_v46 = vld [vmem:[%s1157_s12 + $0x60] sm:$0xff] }
 0x11c   : > { %v665_v48 = vld [vmem:[%s1157_s12 + $0xe0] sm:$0xff] }
 0x11d   : > { %739 = vst.msk [vmem:[%s1171_s16 + $0x30] sm:$0xff] %vm315_vm0, %v707_v52  ;;  %755 = vst.msk [vmem:[%s1171_s16 + $0xb0] sm:$0xff] %vm315_vm0, %v723_v53  ;;  %v676_v58 = vadd.f32 %v644_v49, %v514_v54  ;;  %v692_v59 = vadd.f32 %v660_v51, %v594_v55 }
 0x11e   : > { %v518_v60 = vpop.f32.mrb[16].mxu0  ;;  %v598_v62 = vpop.f32.mrb[16].mxu1 }
 0x11f   : > { %v708_v0 = vmax.f32 %v676_v58, 0.0  ;;  %v724_v1 = vmax.f32 %v692_v59, 0.0  ;;  %v519_v2 = vadd.f32 %v1162_v28, %v518_v60  ;;  %v599_v3 = vadd.f32 %v1162_v28, %v598_v62  ;;  %v520_v4 = vpop.f32.mrb[17].mxu0  ;;  %v600_v5 = vpop.f32.mrb[17].mxu1  ;;  %v650_v58 = vld [vmem:[%s1157_s12 + $0x68] sm:$0xff] }
 0x120   : > { %v666_v60 = vld [vmem:[%s1157_s12 + $0xe8] sm:$0xff] }
 0x121   : > { %740 = vst.msk [vmem:[%s1171_s16 + $0x38] sm:$0xff] %vm315_vm0, %v708_v0  ;;  %756 = vst.msk [vmem:[%s1171_s16 + $0xb8] sm:$0xff] %vm315_vm0, %v724_v1  ;;  %v677_v6 = vadd.f32 %v645_v61, %v519_v2  ;;  %v693_v7 = vadd.f32 %v661_v63, %v599_v3 }
 0x122   : > { %v523_v8 = vpop.f32.mrb[18].mxu0  ;;  %v603_v10 = vpop.f32.mrb[18].mxu1 }
 0x123   : > { %v709_v12 = vmax.f32 %v677_v6, 0.0  ;;  %v725_v13 = vmax.f32 %v693_v7, 0.0  ;;  %v524_v14 = vadd.f32 %v1162_v28, %v523_v8  ;;  %v604_v15 = vadd.f32 %v1162_v28, %v603_v10  ;;  %v525_v16 = vpop.f32.mrb[19].mxu0  ;;  %v605_v17 = vpop.f32.mrb[19].mxu1  ;;  %v651_v6 = vld [vmem:[%s1157_s12 + $0x70] sm:$0xff] }
 0x124   : > { %v667_v8 = vld [vmem:[%s1157_s12 + $0xf0] sm:$0xff] }
 0x125   : > { %741 = vst.msk [vmem:[%s1171_s16 + $0x40] sm:$0xff] %vm315_vm0, %v709_v12  ;;  %757 = vst.msk [vmem:[%s1171_s16 + $0xc0] sm:$0xff] %vm315_vm0, %v725_v13  ;;  %v678_v18 = vadd.f32 %v646_v9, %v524_v14  ;;  %v694_v19 = vadd.f32 %v662_v11, %v604_v15 }
 0x126   : > { %v528_v20 = vpop.f32.mrb[20].mxu0  ;;  %v608_v22 = vpop.f32.mrb[20].mxu1 }
 0x127   : > { %v710_v24 = vmax.f32 %v678_v18, 0.0  ;;  %v726_v25 = vmax.f32 %v694_v19, 0.0  ;;  %v529_v26 = vadd.f32 %v1162_v28, %v528_v20  ;;  %v609_v27 = vadd.f32 %v1162_v28, %v608_v22  ;;  %v530_v29 = vpop.f32.mrb[21].mxu0  ;;  %v610_v30 = vpop.f32.mrb[21].mxu1  ;;  %v652_v18 = vld [vmem:[%s1157_s12 + $0x78] sm:$0xff] }
 0x128   : > { %v668_v20 = vld [vmem:[%s1157_s12 + $0xf8] sm:$0xff] }
 0x129   : > { %742 = vst.msk [vmem:[%s1171_s16 + $0x48] sm:$0xff] %vm315_vm0, %v710_v24  ;;  %758 = vst.msk [vmem:[%s1171_s16 + $0xc8] sm:$0xff] %vm315_vm0, %v726_v25  ;;  %v679_v31 = vadd.f32 %v647_v21, %v529_v26  ;;  %v695_v32 = vadd.f32 %v663_v23, %v609_v27 }
 0x12a   : > { %v533_v33 = vpop.f32.mrb[22].mxu0  ;;  %v613_v35 = vpop.f32.mrb[22].mxu1 }
 0x12b   : > { %v711_v37 = vmax.f32 %v679_v31, 0.0  ;;  %v727_v38 = vmax.f32 %v695_v32, 0.0  ;;  %v534_v39 = vadd.f32 %v1162_v28, %v533_v33  ;;  %v614_v40 = vadd.f32 %v1162_v28, %v613_v35  ;;  %v535_v41 = vpop.f32.mrb[23].mxu0  ;;  %v615_v42 = vpop.f32.mrb[23].mxu1 }
 0x12d   : > { %743 = vst.msk [vmem:[%s1171_s16 + $0x50] sm:$0xff] %vm315_vm0, %v711_v37  ;;  %759 = vst.msk [vmem:[%s1171_s16 + $0xd0] sm:$0xff] %vm315_vm0, %v727_v38  ;;  %v680_v43 = vadd.f32 %v648_v34, %v534_v39  ;;  %v696_v44 = vadd.f32 %v664_v36, %v614_v40 }
 0x12e   : > { %v538_v45 = vpop.f32.mrb[24].mxu0  ;;  %v618_v47 = vpop.f32.mrb[24].mxu1 }
 0x12f   : > { %v712_v49 = vmax.f32 %v680_v43, 0.0  ;;  %v728_v50 = vmax.f32 %v696_v44, 0.0  ;;  %v539_v51 = vadd.f32 %v1162_v28, %v538_v45  ;;  %v619_v52 = vadd.f32 %v1162_v28, %v618_v47  ;;  %v540_v53 = vpop.f32.mrb[25].mxu0  ;;  %v620_v54 = vpop.f32.mrb[25].mxu1 }
 0x131   : > { %744 = vst.msk [vmem:[%s1171_s16 + $0x58] sm:$0xff] %vm315_vm0, %v712_v49  ;;  %760 = vst.msk [vmem:[%s1171_s16 + $0xd8] sm:$0xff] %vm315_vm0, %v728_v50  ;;  %v681_v55 = vadd.f32 %v649_v46, %v539_v51  ;;  %v697_v56 = vadd.f32 %v665_v48, %v619_v52 }
 0x132   : > { %v543_v57 = vpop.f32.mrb[26].mxu0  ;;  %v623_v59 = vpop.f32.mrb[26].mxu1 }
 0x133   : > { %v713_v61 = vmax.f32 %v681_v55, 0.0  ;;  %v729_v62 = vmax.f32 %v697_v56, 0.0  ;;  %v544_v63 = vadd.f32 %v1162_v28, %v543_v57  ;;  %v624_v0 = vadd.f32 %v1162_v28, %v623_v59  ;;  %v545_v1 = vpop.f32.mrb[27].mxu0  ;;  %v625_v2 = vpop.f32.mrb[27].mxu1 }
 0x135   : > { %745 = vst.msk [vmem:[%s1171_s16 + $0x60] sm:$0xff] %vm315_vm0, %v713_v61  ;;  %761 = vst.msk [vmem:[%s1171_s16 + $0xe0] sm:$0xff] %vm315_vm0, %v729_v62  ;;  %v682_v3 = vadd.f32 %v650_v58, %v544_v63  ;;  %v698_v4 = vadd.f32 %v666_v60, %v624_v0 }
 0x136   : > { %v548_v5 = vpop.f32.mrb[28].mxu0  ;;  %v628_v7 = vpop.f32.mrb[28].mxu1 }
 0x137   : > { %v714_v9 = vmax.f32 %v682_v3, 0.0  ;;  %v730_v10 = vmax.f32 %v698_v4, 0.0  ;;  %v549_v11 = vadd.f32 %v1162_v28, %v548_v5  ;;  %v629_v12 = vadd.f32 %v1162_v28, %v628_v7  ;;  %v550_v13 = vpop.f32.mrb[29].mxu0  ;;  %v630_v14 = vpop.f32.mrb[29].mxu1 }
 0x139   : > { %746 = vst.msk [vmem:[%s1171_s16 + $0x68] sm:$0xff] %vm315_vm0, %v714_v9  ;;  %762 = vst.msk [vmem:[%s1171_s16 + $0xe8] sm:$0xff] %vm315_vm0, %v730_v10  ;;  %v683_v15 = vadd.f32 %v651_v6, %v549_v11  ;;  %v699_v16 = vadd.f32 %v667_v8, %v629_v12 }
 0x13a   : > { %v553_v17 = vpop.f32.mrb[30].mxu0  ;;  %v633_v19 = vpop.f32.mrb[30].mxu1 }
 0x13b   : > { %v715_v21 = vmax.f32 %v683_v15, 0.0  ;;  %v731_v22 = vmax.f32 %v699_v16, 0.0  ;;  %v554_v23 = vadd.f32 %v1162_v28, %v553_v17  ;;  %v634_v24 = vadd.f32 %v1162_v28, %v633_v19  ;;  %v555_v25 = vpop.f32.mrb[31].mxu0  ;;  %v635_v26 = vpop.f32.mrb[31].mxu1 }
 0x13d   : > { %747 = vst.msk [vmem:[%s1171_s16 + $0x70] sm:$0xff] %vm315_vm0, %v715_v21  ;;  %763 = vst.msk [vmem:[%s1171_s16 + $0xf0] sm:$0xff] %vm315_vm0, %v731_v22  ;;  %v684_v27 = vadd.f32 %v652_v18, %v554_v23  ;;  %v700_v29 = vadd.f32 %v668_v20, %v634_v24 }
 0x13f   : > { %v716_v30 = vmax.f32 %v684_v27, 0.0  ;;  %v732_v31 = vmax.f32 %v700_v29, 0.0 }
 0x141   : > { %748 = vst.msk [vmem:[%s1171_s16 + $0x78] sm:$0xff] %vm315_vm0, %v716_v30  ;;  %764 = vst.msk [vmem:[%s1171_s16 + $0xf8] sm:$0xff] %vm315_vm0, %v732_v31 }
 0x142 PF: > { %s14_s15 = sadd.s32 1, %s941_s15  }
 0x143   : > { %p11_p4 = scmp.ge.s32.totalorder %s14_s15, 4  }
 0x145   :  { %13 = sbr.rel (!%p11_p4) target bundleno = 1 (0x1), region = 69 }

// kernel: resnet_forward.11
= control target key start
LH: loop header
LB: loop body
LE: loop exit
PB: predicated region body
PF: predicated region fallthrough
CT: control target
= control target key end

     0   :  { %v365_v0 = vmov 0.0|0.0   ;;  %vm71_vm0 = vcmask 130048   ;;  %vm281_vm1 = vcmask 261120   ;;  %s655_s1 = inlined_call_operand.vmem [shape: f32[144,32], index: 1, kind: input, shape index: {}]   ;;  %s656_s0 = inlined_call_operand.vmem [shape: f32[128,144], index: 0, kind: input, shape index: {}]   ;;  %s657_s2 = inlined_call_operand.vmem [shape: f32[1,32], index: 2, kind: input, shape index: {}]   ;;  %s658_s3 = inlined_call_operand.vmem [shape: f32[128,32], index: 3, kind: output, shape index: {}]  }
   0x1   :  { %319 = vmatprep.subr.bf16.mxu0 %v365_v0  ;;  %346 = vmatprep.subr.bf16.mxu1 %v365_v0  ;;  %v46_v1 = vld [vmem:[%s655_s1] sm:$0xff]  ;;  %v47_v2 = vld [vmem:[%s655_s1 + $0x8] sm:$0xff]  ;;  %v48_v3 = vld [vmem:[%s655_s1 + $0x10] sm:$0xff] }
   0x2   :  { %v320_v4 = vpack.c.bf16 %v47_v2, %v46_v1  ;;  %v49_v5 = vld [vmem:[%s655_s1 + $0x18] sm:$0xff]  ;;  %v50_v7 = vld [vmem:[%s655_s1 + $0x20] sm:$0xff]  ;;  %v51_v8 = vld [vmem:[%s655_s1 + $0x28] sm:$0xff] }
   0x3   :  { %v323_v6 = vpack.c.bf16 %v49_v5, %v48_v3  ;;  %v15_v9 = vld [vmem:[%s656_s0 + $0x8] sm:$0xff]  ;;  %v326_v11 = vpack.c.bf16 %v51_v8, %v50_v7  ;;  %v52_v12 = vld [vmem:[%s655_s1 + $0x30] sm:$0xff]  ;;  %v53_v13 = vld [vmem:[%s655_s1 + $0x38] sm:$0xff] }
   0x4   :  { %321 = vmatpush1.bf16.msra.mxu0 %v320_v4  ;;  %355 = vmatpush1.bf16.msra.mxu1 %v320_v4  ;;  %v31_v10 = vld [vmem:[%s656_s0 + $0x88] sm:$0xff]  ;;  %v329_v14 = vpack.c.bf16 %v53_v13, %v52_v12  ;;  %v54_v15 = vld [vmem:[%s655_s1 + $0x40] sm:$0xff]  ;;  %v56_v18 = vld [vmem:[%s655_s1 + $0x50] sm:$0xff] }
   0x5   :  { %322 = vmatprep.subr.bf16.mxu0 %v365_v0  ;;  %347 = vmatprep.subr.bf16.mxu1 %v365_v0  ;;  %v55_v16 = vld [vmem:[%s655_s1 + $0x48] sm:$0xff]  ;;  %v57_v19 = vld [vmem:[%s655_s1 + $0x58] sm:$0xff]  ;;  %v58_v21 = vld [vmem:[%s655_s1 + $0x60] sm:$0xff] }
   0x6   :  { %303 = vmatprep.mubr.msk.f32.mxu0 %vm71_vm0, %v15_v9  ;;  %311 = vmatprep.mubr.msk.f32.mxu1 %vm71_vm0, %v31_v10  ;;  %v332_v17 = vpack.c.bf16 %v55_v16, %v54_v15  ;;  %v335_v20 = vpack.c.bf16 %v57_v19, %v56_v18  ;;  %v59_v22 = vld [vmem:[%s655_s1 + $0x68] sm:$0xff]  ;;  %v60_v24 = vld [vmem:[%s655_s1 + $0x70] sm:$0xff]  ;;  %v61_v25 = vld [vmem:[%s655_s1 + $0x78] sm:$0xff] }
   0x7   :  { %v338_v23 = vpack.c.bf16 %v59_v22, %v58_v21  ;;  %v341_v26 = vpack.c.bf16 %v61_v25, %v60_v24  ;;  %v62_v27 = vld [vmem:[%s655_s1 + $0x80] sm:$0xff]  ;;  %v63_v28 = vld [vmem:[%s655_s1 + $0x88] sm:$0xff]  ;;  %v17_v32 = vld [vmem:[%s656_s0 + $0x18] sm:$0xff] }
   0x8   :  { %324 = vmatpush1.bf16.msra.mxu0 %v323_v6  ;;  %356 = vmatpush1.bf16.msra.mxu1 %v323_v6  ;;  %v344_v29 = vpack.c.bf16 %v63_v28, %v62_v27  ;;  %v14_v30 = vld [vmem:[%s656_s0] sm:$0xff]  ;;  %v33_v33 = vld [vmem:[%s656_s0 + $0x98] sm:$0xff]  ;;  %v16_v34 = vld [vmem:[%s656_s0 + $0x10] sm:$0xff] }
   0x9   :  { %325 = vmatprep.subr.bf16.mxu0 %v365_v0  ;;  %348 = vmatprep.subr.bf16.mxu1 %v365_v0  ;;  %v30_v31 = vld [vmem:[%s656_s0 + $0x80] sm:$0xff]  ;;  %v32_v35 = vld [vmem:[%s656_s0 + $0x90] sm:$0xff]  ;;  %v19_v36 = vld [vmem:[%s656_s0 + $0x28] sm:$0xff] }
   0xa   :  { %v35_v37 = vld [vmem:[%s656_s0 + $0xa8] sm:$0xff]  ;;  %v18_v38 = vld [vmem:[%s656_s0 + $0x20] sm:$0xff]  ;;  %v21_v40 = vld [vmem:[%s656_s0 + $0x38] sm:$0xff] }
   0xb   :  { %v34_v39 = vld [vmem:[%s656_s0 + $0xa0] sm:$0xff]  ;;  %v37_v41 = vld [vmem:[%s656_s0 + $0xb8] sm:$0xff]  ;;  %v20_v42 = vld [vmem:[%s656_s0 + $0x30] sm:$0xff] }
   0xc   :  { %327 = vmatpush1.bf16.msra.mxu0 %v326_v11  ;;  %357 = vmatpush1.bf16.msra.mxu1 %v326_v11  ;;  %v36_v43 = vld [vmem:[%s656_s0 + $0xb0] sm:$0xff]  ;;  %v23_v44 = vld [vmem:[%s656_s0 + $0x48] sm:$0xff]  ;;  %v22_v46 = vld [vmem:[%s656_s0 + $0x40] sm:$0xff] }
   0xd   :  { %328 = vmatprep.subr.bf16.mxu0 %v365_v0  ;;  %349 = vmatprep.subr.bf16.mxu1 %v365_v0  ;;  %v39_v45 = vld [vmem:[%s656_s0 + $0xc8] sm:$0xff]  ;;  %v38_v47 = vld [vmem:[%s656_s0 + $0xc0] sm:$0xff]  ;;  %v25_v48 = vld [vmem:[%s656_s0 + $0x58] sm:$0xff] }
   0xe   :  { %v41_v49 = vld [vmem:[%s656_s0 + $0xd8] sm:$0xff]  ;;  %v24_v50 = vld [vmem:[%s656_s0 + $0x50] sm:$0xff]  ;;  %v27_v52 = vld [vmem:[%s656_s0 + $0x68] sm:$0xff] }
   0xf   :  { %v40_v51 = vld [vmem:[%s656_s0 + $0xd0] sm:$0xff]  ;;  %v43_v53 = vld [vmem:[%s656_s0 + $0xe8] sm:$0xff]  ;;  %v26_v54 = vld [vmem:[%s656_s0 + $0x60] sm:$0xff] }
  0x10   :  { %330 = vmatpush1.bf16.msra.mxu0 %v329_v14  ;;  %358 = vmatpush1.bf16.msra.mxu1 %v329_v14  ;;  %v42_v55 = vld [vmem:[%s656_s0 + $0xe0] sm:$0xff]  ;;  %v29_v56 = vld [vmem:[%s656_s0 + $0x78] sm:$0xff]  ;;  %v28_v58 = vld [vmem:[%s656_s0 + $0x70] sm:$0xff] }
  0x11   :  { %331 = vmatprep.subr.bf16.mxu0 %v365_v0  ;;  %350 = vmatprep.subr.bf16.mxu1 %v365_v0  ;;  %v45_v57 = vld [vmem:[%s656_s0 + $0xf8] sm:$0xff]  ;;  %v44_v59 = vld [vmem:[%s656_s0 + $0xf0] sm:$0xff]  ;;  %v573_v60 = vld [vmem:[%s657_s2] ss:$0 sm:$0xff] }
  0x14   :  { %333 = vmatpush1.bf16.msra.mxu0 %v332_v17  ;;  %359 = vmatpush1.bf16.msra.mxu1 %v332_v17 }
  0x15   :  { %334 = vmatprep.subr.bf16.mxu0 %v365_v0  ;;  %351 = vmatprep.subr.bf16.mxu1 %v365_v0 }
  0x18   :  { %336 = vmatpush1.bf16.msra.mxu0 %v335_v20  ;;  %360 = vmatpush1.bf16.msra.mxu1 %v335_v20 }
  0x19   :  { %337 = vmatprep.subr.bf16.mxu0 %v365_v0  ;;  %352 = vmatprep.subr.bf16.mxu1 %v365_v0 }
  0x1c   :  { %339 = vmatpush1.bf16.msra.mxu0 %v338_v23  ;;  %361 = vmatpush1.bf16.msra.mxu1 %v338_v23 }
  0x1d   :  { %340 = vmatprep.subr.bf16.mxu0 %v365_v0  ;;  %353 = vmatprep.subr.bf16.mxu1 %v365_v0 }
  0x20   :  { %342 = vmatpush1.bf16.msra.mxu0 %v341_v26  ;;  %362 = vmatpush1.bf16.msra.mxu1 %v341_v26 }
  0x21   :  { %343 = vmatprep.subr.bf16.mxu0 %v365_v0  ;;  %354 = vmatprep.subr.bf16.mxu1 %v365_v0 }
  0x24   :  { %345 = vmatpush1.bf16.msra.mxu0 %v344_v29  ;;  %363 = vmatpush1.bf16.msra.mxu1 %v344_v29 }
  0x27   :  { %185 = vmatmul.mubr.f32.vlgmr.msra.gmra.mrb[0].mxu0 %v14_v30  ;;  %225 = vmatmul.mubr.f32.vlgmr.msra.gmra.mrb[0].mxu1 %v30_v31 }
  0x28   :  { %304 = vmatprep.mubr.msk.f32.mxu0 %vm71_vm0, %v17_v32  ;;  %312 = vmatprep.mubr.msk.f32.mxu1 %vm71_vm0, %v33_v33 }
  0x2b   :  { %190 = vmatmul.mubr.f32.gmra.mrb[2].mxu0 %v16_v34  ;;  %230 = vmatmul.mubr.f32.gmra.mrb[2].mxu1 %v32_v35 }
  0x2c   :  { %305 = vmatprep.mubr.msk.f32.mxu0 %vm71_vm0, %v19_v36  ;;  %313 = vmatprep.mubr.msk.f32.mxu1 %vm71_vm0, %v35_v37 }
  0x2f   :  { %195 = vmatmul.mubr.f32.gmra.mrb[4].mxu0 %v18_v38  ;;  %235 = vmatmul.mubr.f32.gmra.mrb[4].mxu1 %v34_v39 }
  0x30   :  { %306 = vmatprep.mubr.msk.f32.mxu0 %vm71_vm0, %v21_v40  ;;  %314 = vmatprep.mubr.msk.f32.mxu1 %vm71_vm0, %v37_v41 }
  0x33   :  { %200 = vmatmul.mubr.f32.gmra.mrb[6].mxu0 %v20_v42  ;;  %240 = vmatmul.mubr.f32.gmra.mrb[6].mxu1 %v36_v43 }
  0x34   :  { %307 = vmatprep.mubr.msk.f32.mxu0 %vm71_vm0, %v23_v44  ;;  %315 = vmatprep.mubr.msk.f32.mxu1 %vm71_vm0, %v39_v45 }
  0x37   :  { %205 = vmatmul.mubr.f32.gmra.mrb[8].mxu0 %v22_v46  ;;  %245 = vmatmul.mubr.f32.gmra.mrb[8].mxu1 %v38_v47 }
  0x38   :  { %308 = vmatprep.mubr.msk.f32.mxu0 %vm71_vm0, %v25_v48  ;;  %316 = vmatprep.mubr.msk.f32.mxu1 %vm71_vm0, %v41_v49 }
  0x3b   :  { %210 = vmatmul.mubr.f32.gmra.mrb[10].mxu0 %v24_v50  ;;  %250 = vmatmul.mubr.f32.gmra.mrb[10].mxu1 %v40_v51 }
  0x3c   :  { %309 = vmatprep.mubr.msk.f32.mxu0 %vm71_vm0, %v27_v52  ;;  %317 = vmatprep.mubr.msk.f32.mxu1 %vm71_vm0, %v43_v53 }
  0x3f   :  { %215 = vmatmul.mubr.f32.gmra.mrb[12].mxu0 %v26_v54  ;;  %255 = vmatmul.mubr.f32.gmra.mrb[12].mxu1 %v42_v55 }
  0x40   :  { %310 = vmatprep.mubr.msk.f32.mxu0 %vm71_vm0, %v29_v56  ;;  %318 = vmatprep.mubr.msk.f32.mxu1 %vm71_vm0, %v45_v57 }
  0x43   :  { %220 = vmatmul.mubr.f32.gmra.mrb[14].mxu0 %v28_v58  ;;  %260 = vmatmul.mubr.f32.gmra.mrb[14].mxu1 %v44_v59 }
  0xfa   :  { %v186_v61 = vpop.f32.mrb[0].mxu0  ;;  %v226_v62 = vpop.f32.mrb[0].mxu1 }
  0xfb   :  { %v187_v63 = vadd.f32 %v573_v60, %v186_v61  ;;  %v227_v0 = vadd.f32 %v573_v60, %v226_v62  ;;  %v188_v1 = vpop.f32.mrb[1].mxu0  ;;  %v228_v2 = vpop.f32.mrb[1].mxu1 }
  0xfd   :  { %v265_v3 = vmax.f32 %v187_v63, 0.0  ;;  %v273_v4 = vmax.f32 %v227_v0, 0.0 }
  0xfe   :  { %v191_v5 = vpop.f32.mrb[2].mxu0  ;;  %v231_v6 = vpop.f32.mrb[2].mxu1 }
  0xff   :  { %282 = vst.msk [vmem:[%s658_s3] sm:$0xff] %vm281_vm1, %v265_v3  ;;  %290 = vst.msk [vmem:[%s658_s3 + $0x40] sm:$0xff] %vm281_vm1, %v273_v4  ;;  %v192_v7 = vadd.f32 %v573_v60, %v191_v5  ;;  %v232_v8 = vadd.f32 %v573_v60, %v231_v6  ;;  %v193_v9 = vpop.f32.mrb[3].mxu0  ;;  %v233_v10 = vpop.f32.mrb[3].mxu1 }
 0x101   :  { %v266_v11 = vmax.f32 %v192_v7, 0.0  ;;  %v274_v12 = vmax.f32 %v232_v8, 0.0 }
 0x102   :  { %v196_v13 = vpop.f32.mrb[4].mxu0  ;;  %v236_v14 = vpop.f32.mrb[4].mxu1 }
 0x103   :  { %283 = vst.msk [vmem:[%s658_s3 + $0x8] sm:$0xff] %vm281_vm1, %v266_v11  ;;  %291 = vst.msk [vmem:[%s658_s3 + $0x48] sm:$0xff] %vm281_vm1, %v274_v12  ;;  %v197_v15 = vadd.f32 %v573_v60, %v196_v13  ;;  %v237_v16 = vadd.f32 %v573_v60, %v236_v14  ;;  %v198_v17 = vpop.f32.mrb[5].mxu0  ;;  %v238_v18 = vpop.f32.mrb[5].mxu1 }
 0x105   :  { %v267_v19 = vmax.f32 %v197_v15, 0.0  ;;  %v275_v20 = vmax.f32 %v237_v16, 0.0 }
 0x106   :  { %v201_v21 = vpop.f32.mrb[6].mxu0  ;;  %v241_v22 = vpop.f32.mrb[6].mxu1 }
 0x107   :  { %284 = vst.msk [vmem:[%s658_s3 + $0x10] sm:$0xff] %vm281_vm1, %v267_v19  ;;  %292 = vst.msk [vmem:[%s658_s3 + $0x50] sm:$0xff] %vm281_vm1, %v275_v20  ;;  %v202_v23 = vadd.f32 %v573_v60, %v201_v21  ;;  %v242_v24 = vadd.f32 %v573_v60, %v241_v22  ;;  %v203_v25 = vpop.f32.mrb[7].mxu0  ;;  %v243_v26 = vpop.f32.mrb[7].mxu1 }
 0x109   :  { %v268_v27 = vmax.f32 %v202_v23, 0.0  ;;  %v276_v28 = vmax.f32 %v242_v24, 0.0 }
 0x10a   :  { %v206_v29 = vpop.f32.mrb[8].mxu0  ;;  %v246_v30 = vpop.f32.mrb[8].mxu1 }
 0x10b   :  { %285 = vst.msk [vmem:[%s658_s3 + $0x18] sm:$0xff] %vm281_vm1, %v268_v27  ;;  %293 = vst.msk [vmem:[%s658_s3 + $0x58] sm:$0xff] %vm281_vm1, %v276_v28  ;;  %v207_v31 = vadd.f32 %v573_v60, %v206_v29  ;;  %v247_v32 = vadd.f32 %v573_v60, %v246_v30  ;;  %v208_v33 = vpop.f32.mrb[9].mxu0  ;;  %v248_v34 = vpop.f32.mrb[9].mxu1 }
 0x10d   :  { %v269_v35 = vmax.f32 %v207_v31, 0.0  ;;  %v277_v36 = vmax.f32 %v247_v32, 0.0 }
 0x10e   :  { %v211_v37 = vpop.f32.mrb[10].mxu0  ;;  %v251_v38 = vpop.f32.mrb[10].mxu1 }
 0x10f   :  { %286 = vst.msk [vmem:[%s658_s3 + $0x20] sm:$0xff] %vm281_vm1, %v269_v35  ;;  %294 = vst.msk [vmem:[%s658_s3 + $0x60] sm:$0xff] %vm281_vm1, %v277_v36  ;;  %v212_v39 = vadd.f32 %v573_v60, %v211_v37  ;;  %v252_v40 = vadd.f32 %v573_v60, %v251_v38  ;;  %v213_v41 = vpop.f32.mrb[11].mxu0  ;;  %v253_v42 = vpop.f32.mrb[11].mxu1 }
 0x111   :  { %v270_v43 = vmax.f32 %v212_v39, 0.0  ;;  %v278_v44 = vmax.f32 %v252_v40, 0.0 }
 0x112   :  { %v216_v45 = vpop.f32.mrb[12].mxu0  ;;  %v256_v46 = vpop.f32.mrb[12].mxu1 }
 0x113   :  { %287 = vst.msk [vmem:[%s658_s3 + $0x28] sm:$0xff] %vm281_vm1, %v270_v43  ;;  %295 = vst.msk [vmem:[%s658_s3 + $0x68] sm:$0xff] %vm281_vm1, %v278_v44  ;;  %v217_v47 = vadd.f32 %v573_v60, %v216_v45  ;;  %v257_v48 = vadd.f32 %v573_v60, %v256_v46  ;;  %v218_v49 = vpop.f32.mrb[13].mxu0  ;;  %v258_v50 = vpop.f32.mrb[13].mxu1 }
 0x115   :  { %v271_v51 = vmax.f32 %v217_v47, 0.0  ;;  %v279_v52 = vmax.f32 %v257_v48, 0.0 }
 0x116   :  { %v221_v53 = vpop.f32.mrb[14].mxu0  ;;  %v261_v54 = vpop.f32.mrb[14].mxu1 }
 0x117   :  { %288 = vst.msk [vmem:[%s658_s3 + $0x30] sm:$0xff] %vm281_vm1, %v271_v51  ;;  %296 = vst.msk [vmem:[%s658_s3 + $0x70] sm:$0xff] %vm281_vm1, %v279_v52  ;;  %v222_v55 = vadd.f32 %v573_v60, %v221_v53  ;;  %v262_v56 = vadd.f32 %v573_v60, %v261_v54  ;;  %v223_v57 = vpop.f32.mrb[15].mxu0  ;;  %v263_v58 = vpop.f32.mrb[15].mxu1 }
 0x119   :  { %v272_v59 = vmax.f32 %v222_v55, 0.0  ;;  %v280_v61 = vmax.f32 %v262_v56, 0.0 }
 0x11b   :  { %289 = vst.msk [vmem:[%s658_s3 + $0x38] sm:$0xff] %vm281_vm1, %v272_v59  ;;  %297 = vst.msk [vmem:[%s658_s3 + $0x78] sm:$0xff] %vm281_vm1, %v280_v61 }

// kernel: resnet_forward.12
= control target key start
LH: loop header
LB: loop body
LE: loop exit
PB: predicated region body
PF: predicated region fallthrough
CT: control target
= control target key end

     0   :  { %vm108_vm0 = vcmask 261120   ;;  %s1158_s1 = inlined_call_operand.vmem [shape: f32[288,32], index: 1, kind: input, shape index: {}]   ;;  %s1159_s0 = inlined_call_operand.vmem [shape: f32[128,288], index: 0, kind: input, shape index: {}]   ;;  %s1160_s2 = inlined_call_operand.vmem [shape: f32[1,32], index: 2, kind: input, shape index: {}]   ;;  %s1161_s3 = inlined_call_operand.vmem [shape: f32[128,32], index: 3, kind: input, shape index: {}]   ;;  %s1162_s4 = inlined_call_operand.vmem [shape: f32[128,32], index: 4, kind: output, shape index: {}]  }
   0x1   :  { %v81_v0 = vld [vmem:[%s1158_s1 + $0x80] sm:$0xff]  ;;  %v82_v1 = vld [vmem:[%s1158_s1 + $0x88] sm:$0xff]  ;;  %v83_v5 = vld [vmem:[%s1158_s1 + $0x90] sm:$0xff] }
   0x2   :  { %v65_v2 = vld [vmem:[%s1158_s1] sm:$0xff]  ;;  %v664_v3 = vpack.c.bf16 %v82_v1, %v81_v0  ;;  %v66_v4 = vld [vmem:[%s1158_s1 + $0x8] sm:$0xff]  ;;  %v84_v6 = vld [vmem:[%s1158_s1 + $0x98] sm:$0xff] }
   0x3   :  { %v666_v7 = vpack.c.bf16 %v66_v4, %v65_v2  ;;  %v668_v8 = vpack.c.bf16 %v84_v6, %v83_v5  ;;  %v67_v9 = vld [vmem:[%s1158_s1 + $0x10] sm:$0xff]  ;;  %v68_v10 = vld [vmem:[%s1158_s1 + $0x18] sm:$0xff]  ;;  %v85_v11 = vld [vmem:[%s1158_s1 + $0xa0] sm:$0xff] }
   0x4   :  { %665 = vmatprep.subr.bf16.mxu0 %v664_v3  ;;  %704 = vmatprep.subr.bf16.mxu1 %v664_v3  ;;  %v86_v12 = vld [vmem:[%s1158_s1 + $0xa8] sm:$0xff]  ;;  %v670_v13 = vpack.c.bf16 %v68_v10, %v67_v9  ;;  %v69_v15 = vld [vmem:[%s1158_s1 + $0x20] sm:$0xff]  ;;  %v87_v17 = vld [vmem:[%s1158_s1 + $0xb0] sm:$0xff] }
   0x5   :  { %667 = vmatpush3.bf16.msra.mxu0 %v666_v7  ;;  %712 = vmatpush3.bf16.msra.mxu1 %v666_v7  ;;  %v672_v14 = vpack.c.bf16 %v86_v12, %v85_v11  ;;  %v70_v16 = vld [vmem:[%s1158_s1 + $0x28] sm:$0xff]  ;;  %v88_v18 = vld [vmem:[%s1158_s1 + $0xb8] sm:$0xff]  ;;  %v71_v21 = vld [vmem:[%s1158_s1 + $0x30] sm:$0xff] }
   0x6   :  { %669 = vmatprep.subr.bf16.mxu0 %v668_v8  ;;  %705 = vmatprep.subr.bf16.mxu1 %v668_v8  ;;  %v674_v19 = vpack.c.bf16 %v70_v16, %v69_v15  ;;  %v676_v20 = vpack.c.bf16 %v88_v18, %v87_v17  ;;  %v72_v22 = vld [vmem:[%s1158_s1 + $0x38] sm:$0xff]  ;;  %v89_v23 = vld [vmem:[%s1158_s1 + $0xc0] sm:$0xff]  ;;  %v90_v24 = vld [vmem:[%s1158_s1 + $0xc8] sm:$0xff] }
   0x7   :  { %v18_v25 = vld [vmem:[%s1159_s0 + $0x8] sm:$0xff]  ;;  %v678_v27 = vpack.c.bf16 %v72_v22, %v71_v21  ;;  %v680_v28 = vpack.c.bf16 %v90_v24, %v89_v23  ;;  %v73_v29 = vld [vmem:[%s1158_s1 + $0x40] sm:$0xff]  ;;  %v91_v31 = vld [vmem:[%s1158_s1 + $0xd0] sm:$0xff] }
   0x8   :  { %221 = vmatprep.mubr.f32.mxu0 %v18_v25  ;;  %v54_v26 = vld [vmem:[%s1159_s0 + $0x128] sm:$0xff]  ;;  %v92_v32 = vld [vmem:[%s1158_s1 + $0xd8] sm:$0xff]  ;;  %v75_v35 = vld [vmem:[%s1158_s1 + $0x50] sm:$0xff] }
   0x9   :  { %671 = vmatpush3.bf16.msra.mxu0 %v670_v13  ;;  %713 = vmatpush3.bf16.msra.mxu1 %v670_v13  ;;  %v74_v30 = vld [vmem:[%s1158_s1 + $0x48] sm:$0xff]  ;;  %v684_v34 = vpack.c.bf16 %v92_v32, %v91_v31  ;;  %v76_v36 = vld [vmem:[%s1158_s1 + $0x58] sm:$0xff]  ;;  %v93_v37 = vld [vmem:[%s1158_s1 + $0xe0] sm:$0xff] }
   0xa   :  { %673 = vmatprep.subr.bf16.mxu0 %v672_v14  ;;  %706 = vmatprep.subr.bf16.mxu1 %v672_v14  ;;  %v682_v33 = vpack.c.bf16 %v74_v30, %v73_v29  ;;  %v94_v38 = vld [vmem:[%s1158_s1 + $0xe8] sm:$0xff]  ;;  %v686_v39 = vpack.c.bf16 %v76_v36, %v75_v35  ;;  %v77_v41 = vld [vmem:[%s1158_s1 + $0x60] sm:$0xff]  ;;  %v95_v43 = vld [vmem:[%s1158_s1 + $0xf0] sm:$0xff] }
   0xb   :  { %281 = vmatprep.mubr.f32.mxu1 %v54_v26  ;;  %v688_v40 = vpack.c.bf16 %v94_v38, %v93_v37  ;;  %v78_v42 = vld [vmem:[%s1158_s1 + $0x68] sm:$0xff]  ;;  %v96_v44 = vld [vmem:[%s1158_s1 + $0xf8] sm:$0xff]  ;;  %v79_v47 = vld [vmem:[%s1158_s1 + $0x70] sm:$0xff] }
   0xc   :  { %v690_v45 = vpack.c.bf16 %v78_v42, %v77_v41  ;;  %v692_v46 = vpack.c.bf16 %v96_v44, %v95_v43  ;;  %v80_v48 = vld [vmem:[%s1158_s1 + $0x78] sm:$0xff]  ;;  %v97_v49 = vld [vmem:[%s1158_s1 + $0x100] sm:$0xff]  ;;  %v98_v50 = vld [vmem:[%s1158_s1 + $0x108] sm:$0xff] }
   0xd   :  { %675 = vmatpush3.bf16.msra.mxu0 %v674_v19  ;;  %714 = vmatpush3.bf16.msra.mxu1 %v674_v19  ;;  %v694_v51 = vpack.c.bf16 %v80_v48, %v79_v47  ;;  %v696_v52 = vpack.c.bf16 %v98_v50, %v97_v49  ;;  %v99_v53 = vld [vmem:[%s1158_s1 + $0x110] sm:$0xff]  ;;  %v100_v54 = vld [vmem:[%s1158_s1 + $0x118] sm:$0xff]  ;;  %v17_v55 = vld [vmem:[%s1159_s0] sm:$0xff] }
   0xe   :  { %677 = vmatprep.subr.bf16.mxu0 %v676_v20  ;;  %707 = vmatprep.subr.bf16.mxu1 %v676_v20  ;;  %v53_v56 = vld [vmem:[%s1159_s0 + $0x120] sm:$0xff]  ;;  %v700_v59 = vpack.c.bf16 %v100_v54, %v99_v53  ;;  %v20_v60 = vld [vmem:[%s1159_s0 + $0x18] sm:$0xff]  ;;  %v23_v0 = vld [vmem:[%s1159_s0 + $0x30] sm:$0xff] }
   0xf   :  { %v21_v57 = vld [vmem:[%s1159_s0 + $0x20] sm:$0xff]  ;;  %v56_v61 = vld [vmem:[%s1159_s0 + $0x138] sm:$0xff]  ;;  %v59_v1 = vld [vmem:[%s1159_s0 + $0x150] sm:$0xff] }
  0x10   :  { %v57_v58 = vld [vmem:[%s1159_s0 + $0x140] sm:$0xff]  ;;  %v24_v62 = vld [vmem:[%s1159_s0 + $0x38] sm:$0xff]  ;;  %v27_v2 = vld [vmem:[%s1159_s0 + $0x50] sm:$0xff] }
  0x11   :  { %679 = vmatpush3.bf16.msra.mxu0 %v678_v27  ;;  %715 = vmatpush3.bf16.msra.mxu1 %v678_v27  ;;  %v60_v63 = vld [vmem:[%s1159_s0 + $0x158] sm:$0xff]  ;;  %v63_v3 = vld [vmem:[%s1159_s0 + $0x170] sm:$0xff]  ;;  %v26_v4 = vld [vmem:[%s1159_s0 + $0x48] sm:$0xff] }
  0x12   :  { %681 = vmatprep.subr.bf16.mxu0 %v680_v28  ;;  %708 = vmatprep.subr.bf16.mxu1 %v680_v28  ;;  %v62_v5 = vld [vmem:[%s1159_s0 + $0x168] sm:$0xff]  ;;  %v19_v7 = vld [vmem:[%s1159_s0 + $0x10] sm:$0xff]  ;;  %v29_v8 = vld [vmem:[%s1159_s0 + $0x60] sm:$0xff] }
  0x13   :  { %v30_v6 = vld [vmem:[%s1159_s0 + $0x68] sm:$0xff]  ;;  %v33_v10 = vld [vmem:[%s1159_s0 + $0x80] sm:$0xff]  ;;  %v32_v12 = vld [vmem:[%s1159_s0 + $0x78] sm:$0xff] }
  0x14   :  { %v22_v9 = vld [vmem:[%s1159_s0 + $0x28] sm:$0xff]  ;;  %v25_v11 = vld [vmem:[%s1159_s0 + $0x40] sm:$0xff]  ;;  %v28_v13 = vld [vmem:[%s1159_s0 + $0x58] sm:$0xff] }
  0x15   :  { %683 = vmatpush3.bf16.msra.mxu0 %v682_v33  ;;  %716 = vmatpush3.bf16.msra.mxu1 %v682_v33  ;;  %v36_v14 = vld [vmem:[%s1159_s0 + $0x98] sm:$0xff]  ;;  %v31_v15 = vld [vmem:[%s1159_s0 + $0x70] sm:$0xff]  ;;  %v34_v17 = vld [vmem:[%s1159_s0 + $0x88] sm:$0xff] }
  0x16   :  { %685 = vmatprep.subr.bf16.mxu0 %v684_v34  ;;  %709 = vmatprep.subr.bf16.mxu1 %v684_v34  ;;  %v35_v16 = vld [vmem:[%s1159_s0 + $0x90] sm:$0xff]  ;;  %v37_v19 = vld [vmem:[%s1159_s0 + $0xa0] sm:$0xff]  ;;  %v38_v20 = vld [vmem:[%s1159_s0 + $0xa8] sm:$0xff] }
  0x17   :  { %v39_v18 = vld [vmem:[%s1159_s0 + $0xb0] sm:$0xff]  ;;  %v40_v21 = vld [vmem:[%s1159_s0 + $0xb8] sm:$0xff]  ;;  %v42_v22 = vld [vmem:[%s1159_s0 + $0xc8] sm:$0xff] }
  0x18   :  { %v43_v23 = vld [vmem:[%s1159_s0 + $0xd0] sm:$0xff]  ;;  %v41_v24 = vld [vmem:[%s1159_s0 + $0xc0] sm:$0xff]  ;;  %v46_v25 = vld [vmem:[%s1159_s0 + $0xe8] sm:$0xff] }
  0x19   :  { %687 = vmatpush3.bf16.msra.mxu0 %v686_v39  ;;  %717 = vmatpush3.bf16.msra.mxu1 %v686_v39  ;;  %v45_v26 = vld [vmem:[%s1159_s0 + $0xe0] sm:$0xff]  ;;  %v44_v28 = vld [vmem:[%s1159_s0 + $0xd8] sm:$0xff]  ;;  %v55_v31 = vld [vmem:[%s1159_s0 + $0x130] sm:$0xff] }
  0x1a   :  { %689 = vmatprep.subr.bf16.mxu0 %v688_v40  ;;  %710 = vmatprep.subr.bf16.mxu1 %v688_v40  ;;  %v49_v27 = vld [vmem:[%s1159_s0 + $0x100] sm:$0xff]  ;;  %v52_v29 = vld [vmem:[%s1159_s0 + $0x118] sm:$0xff]  ;;  %v47_v32 = vld [vmem:[%s1159_s0 + $0xf0] sm:$0xff] }
  0x1b   :  { %v48_v30 = vld [vmem:[%s1159_s0 + $0xf8] sm:$0xff]  ;;  %v58_v33 = vld [vmem:[%s1159_s0 + $0x148] sm:$0xff]  ;;  %v51_v34 = vld [vmem:[%s1159_s0 + $0x110] sm:$0xff] }
  0x1c   :  { %v61_v35 = vld [vmem:[%s1159_s0 + $0x160] sm:$0xff]  ;;  %v50_v36 = vld [vmem:[%s1159_s0 + $0x108] sm:$0xff]  ;;  %v64_v37 = vld [vmem:[%s1159_s0 + $0x178] sm:$0xff] }
  0x1d   :  { %691 = vmatpush3.bf16.msra.mxu0 %v690_v45  ;;  %718 = vmatpush3.bf16.msra.mxu1 %v690_v45 }
  0x1e   :  { %693 = vmatprep.subr.bf16.mxu0 %v692_v46  ;;  %711 = vmatprep.subr.bf16.mxu1 %v692_v46 }
  0x21   :  { %695 = vmatpush3.bf16.msra.mxu0 %v694_v51  ;;  %719 = vmatpush3.bf16.msra.mxu1 %v694_v51 }
  0x22   :  { %697 = vmatprep.subr.bf16.mxu1 %v696_v52 }
  0x24   :  { %222 = vmatmul.mubr.f32.vlgmr.msra.gmra.mrb[0].mxu0 %v17_v55  ;;  %282 = vmatmul.mubr.f32.vlgmr.msra.gmra.mrb[0].mxu1 %v53_v56 }
  0x25   :  { %226 = vmatprep.mubr.f32.mxu0 %v21_v57  ;;  %286 = vmatprep.mubr.f32.mxu1 %v57_v58 }
  0x26   :  { %699 = vmatpush3.bf16.msra.mxu1 %v696_v52 }
  0x27   :  { %701 = vmatprep.subr.bf16.mxu1 %v700_v59 }
  0x28   :  { %227 = vmatmul.mubr.f32.gmra.mrb[2].mxu0 %v20_v60  ;;  %287 = vmatmul.mubr.f32.gmra.mrb[2].mxu1 %v56_v61  ;;  %v1022_v60 = vld [vmem:[%s1160_s2] ss:$0 sm:$0xff] }
  0x29   :  { %231 = vmatprep.mubr.f32.mxu0 %v24_v62  ;;  %291 = vmatprep.mubr.f32.mxu1 %v60_v63 }
  0x2a   :  { %703 = vmatpush3.bf16.msra.mxu1 %v700_v59 }
  0x2c   :  { %232 = vmatmul.mubr.f32.gmra.mrb[4].mxu0 %v23_v0  ;;  %292 = vmatmul.mubr.f32.gmra.mrb[4].mxu1 %v59_v1 }
  0x2d   :  { %236 = vmatprep.mubr.f32.mxu0 %v27_v2  ;;  %296 = vmatprep.mubr.f32.mxu1 %v63_v3  ;;  %v448_v2 = vld [vmem:[%s1161_s3 + $0x8] sm:$0xff] }
  0x30   :  { %237 = vmatmul.mubr.f32.gmra.mrb[6].mxu0 %v26_v4  ;;  %297 = vmatmul.mubr.f32.gmra.mrb[6].mxu1 %v62_v5 }
  0x31   :  { %241 = vmatprep.mubr.f32.mxu0 %v30_v6  ;;  %640 = vmatprep.mubr.msk.f32.mxu1 %vm108_vm0, %v19_v7  ;;  %v447_v7 = vld [vmem:[%s1161_s3] sm:$0xff] }
  0x34   :  { %242 = vmatmul.mubr.f32.gmra.mrb[8].mxu0 %v29_v8  ;;  %641 = vmatmul.mubr.msk.f32.vlgmr.msra.gmra.mrb[8].mxu1 %vm108_vm0, %v22_v9 }
  0x35   :  { %246 = vmatprep.mubr.f32.mxu0 %v33_v10  ;;  %643 = vmatprep.mubr.msk.f32.mxu1 %vm108_vm0, %v25_v11 }
  0x38   :  { %247 = vmatmul.mubr.f32.gmra.mrb[10].mxu0 %v32_v12  ;;  %644 = vmatmul.mubr.msk.f32.gmra.mrb[10].mxu1 %vm108_vm0, %v28_v13 }
  0x39   :  { %251 = vmatprep.mubr.f32.mxu0 %v36_v14  ;;  %646 = vmatprep.mubr.msk.f32.mxu1 %vm108_vm0, %v31_v15  ;;  %v450_v15 = vld [vmem:[%s1161_s3 + $0x18] sm:$0xff] }
  0x3c   :  { %252 = vmatmul.mubr.f32.gmra.mrb[12].mxu0 %v35_v16  ;;  %647 = vmatmul.mubr.msk.f32.gmra.mrb[12].mxu1 %vm108_vm0, %v34_v17 }
  0x3d   :  { %256 = vmatprep.mubr.f32.mxu0 %v39_v18  ;;  %649 = vmatprep.mubr.msk.f32.mxu1 %vm108_vm0, %v37_v19 }
  0x40   :  { %257 = vmatmul.mubr.f32.gmra.mrb[14].mxu0 %v38_v20  ;;  %650 = vmatmul.mubr.msk.f32.gmra.mrb[14].mxu1 %vm108_vm0, %v40_v21  ;;  %v449_v21 = vld [vmem:[%s1161_s3 + $0x10] sm:$0xff] }
  0x41   :  { %261 = vmatprep.mubr.f32.mxu0 %v42_v22  ;;  %652 = vmatprep.mubr.msk.f32.mxu1 %vm108_vm0, %v43_v23 }
  0x44   :  { %262 = vmatmul.mubr.f32.gmra.mrb[16].mxu0 %v41_v24  ;;  %653 = vmatmul.mubr.msk.f32.gmra.mrb[16].mxu1 %vm108_vm0, %v46_v25 }
  0x45   :  { %266 = vmatprep.mubr.f32.mxu0 %v45_v26  ;;  %655 = vmatprep.mubr.msk.f32.mxu1 %vm108_vm0, %v49_v27 }
  0x48   :  { %267 = vmatmul.mubr.f32.gmra.mrb[18].mxu0 %v44_v28  ;;  %656 = vmatmul.mubr.msk.f32.gmra.mrb[18].mxu1 %vm108_vm0, %v52_v29 }
  0x49   :  { %271 = vmatprep.mubr.f32.mxu0 %v48_v30  ;;  %658 = vmatprep.mubr.msk.f32.mxu1 %vm108_vm0, %v55_v31 }
  0x4c   :  { %272 = vmatmul.mubr.f32.gmra.mrb[20].mxu0 %v47_v32  ;;  %659 = vmatmul.mubr.msk.f32.gmra.mrb[20].mxu1 %vm108_vm0, %v58_v33  ;;  %v452_v32 = vld [vmem:[%s1161_s3 + $0x28] sm:$0xff] }
  0x4d   :  { %276 = vmatprep.mubr.f32.mxu0 %v51_v34  ;;  %661 = vmatprep.mubr.msk.f32.mxu1 %vm108_vm0, %v61_v35  ;;  %v451_v35 = vld [vmem:[%s1161_s3 + $0x20] sm:$0xff] }
  0x50   :  { %277 = vmatmul.mubr.f32.gmra.mrb[22].mxu0 %v50_v36  ;;  %662 = vmatmul.mubr.msk.f32.gmra.mrb[22].mxu1 %vm108_vm0, %v64_v37 }
  0xf7   :  { %v564_v38 = vpop.f32.mrb[0].mxu0  ;;  %v600_v39 = vpop.f32.mrb[0].mxu1 }
  0xf8   :  { %v565_v40 = vpop.f32.mrb[1].mxu0  ;;  %v601_v41 = vpop.f32.mrb[1].mxu1 }
  0xf9   :  { %v566_v42 = vadd.f32 %v565_v40, %v564_v38  ;;  %v1013_v43 = vadd.f32 %v601_v41, %v600_v39 }
  0xfb   :  { %v567_v44 = vpop.f32.mrb[2].mxu0  ;;  %v603_v45 = vpop.f32.mrb[2].mxu1  ;;  %v224_v3 = vadd.f32 %v566_v42, %v1022_v60 }
  0xfc   :  { %v568_v46 = vpop.f32.mrb[3].mxu0  ;;  %v604_v47 = vpop.f32.mrb[3].mxu1 }
  0xfd   :  { %v569_v48 = vadd.f32 %v568_v46, %v567_v44  ;;  %v1015_v49 = vadd.f32 %v604_v47, %v603_v45 }
  0xff   :  { %v570_v50 = vpop.f32.mrb[4].mxu0  ;;  %v606_v51 = vpop.f32.mrb[4].mxu1  ;;  %v229_v63 = vadd.f32 %v569_v48, %v1022_v60  ;;  %v453_v48 = vld [vmem:[%s1161_s3 + $0x30] sm:$0xff] }
 0x100   :  { %v571_v52 = vpop.f32.mrb[5].mxu0  ;;  %v607_v53 = vpop.f32.mrb[5].mxu1 }
 0x101   :  { %v572_v54 = vadd.f32 %v571_v52, %v570_v50  ;;  %v1017_v55 = vadd.f32 %v607_v53, %v606_v51 }
 0x103   :  { %v573_v56 = vpop.f32.mrb[6].mxu0  ;;  %v609_v57 = vpop.f32.mrb[6].mxu1  ;;  %v234_v16 = vadd.f32 %v572_v54, %v1022_v60 }
 0x104   :  { %v574_v58 = vpop.f32.mrb[7].mxu0  ;;  %v610_v59 = vpop.f32.mrb[7].mxu1 }
 0x105   :  { %v575_v61 = vadd.f32 %v574_v58, %v573_v56  ;;  %v1024_v62 = vadd.f32 %v610_v59, %v609_v57  ;;  %v454_v59 = vld [vmem:[%s1161_s3 + $0x38] sm:$0xff] }
 0x107   :  { %v576_v0 = vpop.f32.mrb[8].mxu0  ;;  %v642_v1 = vpop.f32.mrb[8].mxu1  ;;  %v239_v11 = vadd.f32 %v575_v61, %v1022_v60 }
 0x108   :  { %v374_v4 = vadd.f32 %v642_v1, %v229_v63  ;;  %v577_v5 = vpop.f32.mrb[9].mxu0  ;;  %v368_v6 = vpop.f32.mrb[9].mxu1 }
 0x109   :  { %v578_v8 = vadd.f32 %v577_v5, %v576_v0  ;;  %v369_v9 = vadd.f32 %v368_v6, %v224_v3 }
 0x10a   :  { %v464_v10 = vadd.f32 %v448_v2, %v374_v4 }
 0x10b   :  { %v463_v12 = vadd.f32 %v447_v7, %v369_v9  ;;  %v579_v13 = vpop.f32.mrb[10].mxu0  ;;  %v645_v14 = vpop.f32.mrb[10].mxu1  ;;  %v244_v30 = vadd.f32 %v578_v8, %v1022_v60  ;;  %v455_v7 = vld [vmem:[%s1161_s3 + $0x40] sm:$0xff] }
 0x10c   :  { %v480_v17 = vmax.f32 %v464_v10, 0.0  ;;  %v384_v18 = vadd.f32 %v645_v14, %v239_v11  ;;  %v580_v19 = vpop.f32.mrb[11].mxu0  ;;  %v378_v20 = vpop.f32.mrb[11].mxu1 }
 0x10d   :  { %v479_v22 = vmax.f32 %v463_v12, 0.0  ;;  %v581_v23 = vadd.f32 %v580_v19, %v579_v13  ;;  %v379_v24 = vadd.f32 %v378_v20, %v234_v16  ;;  %v289_v13 = vadd.f32 %v1015_v49, %v1022_v60  ;;  %v456_v49 = vld [vmem:[%s1161_s3 + $0x48] sm:$0xff] }
 0x10e   :  { %496 = vst.msk [vmem:[%s1162_s4 + $0x8] sm:$0xff] %vm108_vm0, %v480_v17  ;;  %v466_v25 = vadd.f32 %v450_v15, %v384_v18  ;;  %v460_v18 = vld [vmem:[%s1161_s3 + $0x68] sm:$0xff]  ;;  %v284_v19 = vadd.f32 %v1013_v43, %v1022_v60 }
 0x10f   :  { %495 = vst.msk [vmem:[%s1162_s4] sm:$0xff] %vm108_vm0, %v479_v22  ;;  %v465_v26 = vadd.f32 %v449_v21, %v379_v24  ;;  %v582_v27 = vpop.f32.mrb[12].mxu0  ;;  %v249_v28 = vadd.f32 %v581_v23, %v1022_v60  ;;  %v648_v29 = vpop.f32.mrb[12].mxu1  ;;  %v459_v23 = vld [vmem:[%s1161_s3 + $0x60] sm:$0xff] }
 0x110   :  { %v482_v31 = vmax.f32 %v466_v25, 0.0  ;;  %v583_v33 = vpop.f32.mrb[13].mxu0  ;;  %v388_v34 = vpop.f32.mrb[13].mxu1 }
 0x111   :  { %v481_v36 = vmax.f32 %v465_v26, 0.0  ;;  %v394_v37 = vadd.f32 %v648_v29, %v249_v28  ;;  %v584_v38 = vadd.f32 %v583_v33, %v582_v27  ;;  %v389_v39 = vadd.f32 %v388_v34, %v244_v30  ;;  %v462_v34 = vld [vmem:[%s1161_s3 + $0x78] sm:$0xff] }
 0x112   :  { %498 = vst.msk [vmem:[%s1162_s4 + $0x18] sm:$0xff] %vm108_vm0, %v482_v31  ;;  %v299_v29 = vadd.f32 %v1024_v62, %v1022_v60  ;;  %v457_v62 = vld [vmem:[%s1161_s3 + $0x50] sm:$0xff] }
 0x113   :  { %497 = vst.msk [vmem:[%s1162_s4 + $0x10] sm:$0xff] %vm108_vm0, %v481_v36  ;;  %v468_v40 = vadd.f32 %v452_v32, %v394_v37  ;;  %v467_v41 = vadd.f32 %v451_v35, %v389_v39  ;;  %v585_v42 = vpop.f32.mrb[14].mxu0  ;;  %v651_v44 = vpop.f32.mrb[14].mxu1  ;;  %v254_v45 = vadd.f32 %v584_v38, %v1022_v60  ;;  %v294_v38 = vadd.f32 %v1017_v55, %v1022_v60 }
 0x114   :  { %v586_v46 = vpop.f32.mrb[15].mxu0  ;;  %v398_v47 = vpop.f32.mrb[15].mxu1 }
 0x115   :  { %v484_v50 = vmax.f32 %v468_v40, 0.0  ;;  %v483_v51 = vmax.f32 %v467_v41, 0.0  ;;  %v587_v52 = vadd.f32 %v586_v46, %v585_v42  ;;  %v399_v53 = vadd.f32 %v398_v47, %v254_v45  ;;  %v461_v45 = vld [vmem:[%s1161_s3 + $0x70] sm:$0xff] }
 0x117   :  { %500 = vst.msk [vmem:[%s1162_s4 + $0x28] sm:$0xff] %vm108_vm0, %v484_v50  ;;  %499 = vst.msk [vmem:[%s1162_s4 + $0x20] sm:$0xff] %vm108_vm0, %v483_v51  ;;  %v259_v54 = vadd.f32 %v587_v52, %v1022_v60  ;;  %v469_v56 = vadd.f32 %v453_v48, %v399_v53  ;;  %v588_v57 = vpop.f32.mrb[16].mxu0  ;;  %v654_v58 = vpop.f32.mrb[16].mxu1  ;;  %v458_v51 = vld [vmem:[%s1161_s3 + $0x58] sm:$0xff] }
 0x118   :  { %v589_v61 = vpop.f32.mrb[17].mxu0  ;;  %v408_v63 = vpop.f32.mrb[17].mxu1 }
 0x119   :  { %v404_v0 = vadd.f32 %v651_v44, %v259_v54  ;;  %v485_v1 = vmax.f32 %v469_v56, 0.0  ;;  %v590_v2 = vadd.f32 %v589_v61, %v588_v57 }
 0x11b   :  { %v470_v3 = vadd.f32 %v454_v59, %v404_v0  ;;  %501 = vst.msk [vmem:[%s1162_s4 + $0x30] sm:$0xff] %vm108_vm0, %v485_v1  ;;  %v591_v4 = vpop.f32.mrb[18].mxu0  ;;  %v264_v5 = vadd.f32 %v590_v2, %v1022_v60  ;;  %v657_v6 = vpop.f32.mrb[18].mxu1 }
 0x11c   :  { %v592_v8 = vpop.f32.mrb[19].mxu0  ;;  %v418_v9 = vpop.f32.mrb[19].mxu1 }
 0x11d   :  { %v486_v10 = vmax.f32 %v470_v3, 0.0  ;;  %v409_v11 = vadd.f32 %v408_v63, %v264_v5  ;;  %v593_v12 = vadd.f32 %v592_v8, %v591_v4 }
 0x11f   :  { %502 = vst.msk [vmem:[%s1162_s4 + $0x38] sm:$0xff] %vm108_vm0, %v486_v10  ;;  %v471_v14 = vadd.f32 %v455_v7, %v409_v11  ;;  %v269_v15 = vadd.f32 %v593_v12, %v1022_v60  ;;  %v594_v16 = vpop.f32.mrb[20].mxu0  ;;  %v660_v17 = vpop.f32.mrb[20].mxu1 }
 0x120   :  { %v434_v20 = vadd.f32 %v660_v17, %v289_v13  ;;  %v595_v21 = vpop.f32.mrb[21].mxu0  ;;  %v428_v22 = vpop.f32.mrb[21].mxu1 }
 0x121   :  { %v487_v24 = vmax.f32 %v471_v14, 0.0  ;;  %v414_v25 = vadd.f32 %v654_v58, %v269_v15  ;;  %v596_v26 = vadd.f32 %v595_v21, %v594_v16  ;;  %v429_v27 = vadd.f32 %v428_v22, %v284_v19 }
 0x122   :  { %v476_v28 = vadd.f32 %v460_v18, %v434_v20 }
 0x123   :  { %503 = vst.msk [vmem:[%s1162_s4 + $0x40] sm:$0xff] %vm108_vm0, %v487_v24  ;;  %v472_v43 = vadd.f32 %v456_v49, %v414_v25  ;;  %v274_v30 = vadd.f32 %v596_v26, %v1022_v60  ;;  %v475_v31 = vadd.f32 %v459_v23, %v429_v27  ;;  %v597_v32 = vpop.f32.mrb[22].mxu0  ;;  %v663_v33 = vpop.f32.mrb[22].mxu1 }
 0x124   :  { %v492_v35 = vmax.f32 %v476_v28, 0.0  ;;  %v444_v36 = vadd.f32 %v663_v33, %v299_v29  ;;  %v598_v37 = vpop.f32.mrb[23].mxu0  ;;  %v438_v39 = vpop.f32.mrb[23].mxu1 }
 0x125   :  { %v488_v40 = vmax.f32 %v472_v43, 0.0  ;;  %v419_v41 = vadd.f32 %v418_v9, %v274_v30  ;;  %v491_v42 = vmax.f32 %v475_v31, 0.0  ;;  %v599_v44 = vadd.f32 %v598_v37, %v597_v32 }
 0x126   :  { %508 = vst.msk [vmem:[%s1162_s4 + $0x68] sm:$0xff] %vm108_vm0, %v492_v35  ;;  %v478_v46 = vadd.f32 %v462_v34, %v444_v36  ;;  %v439_v47 = vadd.f32 %v438_v39, %v294_v38 }
 0x127   :  { %504 = vst.msk [vmem:[%s1162_s4 + $0x48] sm:$0xff] %vm108_vm0, %v488_v40  ;;  %v473_v55 = vadd.f32 %v457_v62, %v419_v41  ;;  %507 = vst.msk [vmem:[%s1162_s4 + $0x60] sm:$0xff] %vm108_vm0, %v491_v42  ;;  %v279_v48 = vadd.f32 %v599_v44, %v1022_v60 }
 0x128   :  { %v494_v50 = vmax.f32 %v478_v46, 0.0  ;;  %v477_v52 = vadd.f32 %v461_v45, %v439_v47 }
 0x129   :  { %v489_v53 = vmax.f32 %v473_v55, 0.0  ;;  %v424_v54 = vadd.f32 %v657_v6, %v279_v48 }
 0x12a   :  { %510 = vst.msk [vmem:[%s1162_s4 + $0x78] sm:$0xff] %vm108_vm0, %v494_v50  ;;  %v493_v56 = vmax.f32 %v477_v52, 0.0 }
 0x12b   :  { %505 = vst.msk [vmem:[%s1162_s4 + $0x50] sm:$0xff] %vm108_vm0, %v489_v53  ;;  %v474_v60 = vadd.f32 %v458_v51, %v424_v54 }
 0x12c   :  { %509 = vst.msk [vmem:[%s1162_s4 + $0x70] sm:$0xff] %vm108_vm0, %v493_v56 }
 0x12d   :  { %v490_v57 = vmax.f32 %v474_v60, 0.0 }
 0x12f   :  { %506 = vst.msk [vmem:[%s1162_s4 + $0x58] sm:$0xff] %vm108_vm0, %v490_v57 }

// kernel: resnet_forward.13
= control target key start
LH: loop header
LB: loop body
LE: loop exit
PB: predicated region body
PF: predicated region fallthrough
CT: control target
= control target key end

     0   :  { %vm69_vm0 = vcmask 261120   ;;  %vm256_vm1 = vcmask 523264   ;;  %s563_s1 = inlined_call_operand.vmem [shape: f32[288,64], index: 1, kind: input, shape index: {}]   ;;  %s564_s0 = inlined_call_operand.vmem [shape: f32[32,288], index: 0, kind: input, shape index: {}]   ;;  %s565_s2 = inlined_call_operand.vmem [shape: f32[1,64], index: 2, kind: input, shape index: {}]   ;;  %s566_s3 = inlined_call_operand.vmem [shape: f32[32,64], index: 3, kind: output, shape index: {}]  }
   0x1   :  { %v42_v0 = vld [vmem:[%s563_s1 + $0x80] sm:$0xff]  ;;  %v43_v1 = vld [vmem:[%s563_s1 + $0x88] sm:$0xff]  ;;  %v44_v5 = vld [vmem:[%s563_s1 + $0x90] sm:$0xff] }
   0x2   :  { %v26_v2 = vld [vmem:[%s563_s1] sm:$0xff]  ;;  %v336_v3 = vpack.c.bf16 %v43_v1, %v42_v0  ;;  %v27_v4 = vld [vmem:[%s563_s1 + $0x8] sm:$0xff]  ;;  %v45_v6 = vld [vmem:[%s563_s1 + $0x98] sm:$0xff] }
   0x3   :  { %v338_v7 = vpack.c.bf16 %v27_v4, %v26_v2  ;;  %v340_v8 = vpack.c.bf16 %v45_v6, %v44_v5  ;;  %v28_v9 = vld [vmem:[%s563_s1 + $0x10] sm:$0xff]  ;;  %v29_v10 = vld [vmem:[%s563_s1 + $0x18] sm:$0xff]  ;;  %v46_v11 = vld [vmem:[%s563_s1 + $0xa0] sm:$0xff] }
   0x4   :  { %337 = vmatprep.subr.bf16.mxu0 %v336_v3  ;;  %v47_v12 = vld [vmem:[%s563_s1 + $0xa8] sm:$0xff]  ;;  %v342_v13 = vpack.c.bf16 %v29_v10, %v28_v9  ;;  %v30_v15 = vld [vmem:[%s563_s1 + $0x20] sm:$0xff]  ;;  %v48_v17 = vld [vmem:[%s563_s1 + $0xb0] sm:$0xff] }
   0x5   :  { %339 = vmatpush3.bf16.msra.mxu0 %v338_v7  ;;  %v344_v14 = vpack.c.bf16 %v47_v12, %v46_v11  ;;  %v31_v16 = vld [vmem:[%s563_s1 + $0x28] sm:$0xff]  ;;  %v49_v18 = vld [vmem:[%s563_s1 + $0xb8] sm:$0xff]  ;;  %v32_v21 = vld [vmem:[%s563_s1 + $0x30] sm:$0xff] }
   0x6   :  { %341 = vmatprep.subr.bf16.mxu0 %v340_v8  ;;  %v346_v19 = vpack.c.bf16 %v31_v16, %v30_v15  ;;  %v348_v20 = vpack.c.bf16 %v49_v18, %v48_v17  ;;  %v33_v22 = vld [vmem:[%s563_s1 + $0x38] sm:$0xff]  ;;  %v50_v23 = vld [vmem:[%s563_s1 + $0xc0] sm:$0xff]  ;;  %v51_v24 = vld [vmem:[%s563_s1 + $0xc8] sm:$0xff] }
   0x7   :  { %v58_v25 = vld [vmem:[%s563_s1 + $0x100] sm:$0xff]  ;;  %v59_v26 = vld [vmem:[%s563_s1 + $0x108] sm:$0xff]  ;;  %v350_v29 = vpack.c.bf16 %v33_v22, %v32_v21  ;;  %v60_v30 = vld [vmem:[%s563_s1 + $0x110] sm:$0xff]  ;;  %v352_v32 = vpack.c.bf16 %v51_v24, %v50_v23 }
   0x8   :  { %v368_v27 = vpack.c.bf16 %v59_v26, %v58_v25  ;;  %v15_v28 = vld [vmem:[%s564_s0 + $0x8] sm:$0xff]  ;;  %v61_v31 = vld [vmem:[%s563_s1 + $0x118] sm:$0xff]  ;;  %v34_v33 = vld [vmem:[%s563_s1 + $0x40] sm:$0xff] }
   0x9   :  { %343 = vmatpush3.bf16.msra.mxu0 %v342_v13  ;;  %146 = vmatprep.mubr.f32.mxu0 %v15_v28  ;;  %v35_v34 = vld [vmem:[%s563_s1 + $0x48] sm:$0xff]  ;;  %v372_v35 = vpack.c.bf16 %v61_v31, %v60_v30  ;;  %v16_v36 = vld [vmem:[%s564_s0 + $0x10] sm:$0xff]  ;;  %v53_v38 = vld [vmem:[%s563_s1 + $0xd8] sm:$0xff] }
   0xa   :  { %345 = vmatprep.subr.bf16.mxu0 %v344_v14  ;;  %369 = vmatprep.subr.bf16.mxu1 %v368_v27  ;;  %v52_v37 = vld [vmem:[%s563_s1 + $0xd0] sm:$0xff]  ;;  %v354_v39 = vpack.c.bf16 %v35_v34, %v34_v33  ;;  %v37_v42 = vld [vmem:[%s563_s1 + $0x58] sm:$0xff]  ;;  %v54_v43 = vld [vmem:[%s563_s1 + $0xe0] sm:$0xff] }
   0xb   :  { %371 = vmatpush3.bf16.msra.mxu1 %v368_v27  ;;  %330 = vmatprep.mubr.msk.f32.mxu1 %vm69_vm0, %v16_v36  ;;  %v356_v40 = vpack.c.bf16 %v53_v38, %v52_v37  ;;  %v36_v41 = vld [vmem:[%s563_s1 + $0x50] sm:$0xff]  ;;  %v55_v44 = vld [vmem:[%s563_s1 + $0xe8] sm:$0xff]  ;;  %v22_v46 = vld [vmem:[%s564_s0 + $0x40] sm:$0xff] }
   0xc   :  { %373 = vmatprep.subr.bf16.mxu1 %v372_v35  ;;  %v19_v45 = vld [vmem:[%s564_s0 + $0x28] sm:$0xff]  ;;  %v358_v47 = vpack.c.bf16 %v37_v42, %v36_v41  ;;  %v360_v48 = vpack.c.bf16 %v55_v44, %v54_v43  ;;  %v38_v49 = vld [vmem:[%s563_s1 + $0x60] sm:$0xff]  ;;  %v56_v51 = vld [vmem:[%s563_s1 + $0xf0] sm:$0xff] }
   0xd   :  { %347 = vmatpush3.bf16.msra.mxu0 %v346_v19  ;;  %v39_v50 = vld [vmem:[%s563_s1 + $0x68] sm:$0xff]  ;;  %v57_v52 = vld [vmem:[%s563_s1 + $0xf8] sm:$0xff]  ;;  %v40_v56 = vld [vmem:[%s563_s1 + $0x70] sm:$0xff] }
   0xe   :  { %349 = vmatprep.subr.bf16.mxu0 %v348_v20  ;;  %v25_v53 = vld [vmem:[%s564_s0 + $0x58] sm:$0xff]  ;;  %v362_v54 = vpack.c.bf16 %v39_v50, %v38_v49  ;;  %v364_v55 = vpack.c.bf16 %v57_v52, %v56_v51  ;;  %v14_v59 = vld [vmem:[%s564_s0] sm:$0xff]  ;;  %v20_v63 = vld [vmem:[%s564_s0 + $0x30] sm:$0xff] }
   0xf   :  { %375 = vmatpush3.bf16.msra.mxu1 %v372_v35  ;;  %v41_v57 = vld [vmem:[%s563_s1 + $0x78] sm:$0xff]  ;;  %v18_v60 = vld [vmem:[%s564_s0 + $0x20] sm:$0xff]  ;;  %v24_v0 = vld [vmem:[%s564_s0 + $0x50] sm:$0xff] }
  0x10   :  { %v366_v58 = vpack.c.bf16 %v41_v57, %v40_v56  ;;  %v17_v61 = vld [vmem:[%s564_s0 + $0x18] sm:$0xff]  ;;  %v23_v1 = vld [vmem:[%s564_s0 + $0x48] sm:$0xff]  ;;  %v265_v8 = vld [vmem:[%s565_s2] ss:$0 sm:$0xff] }
  0x11   :  { %351 = vmatpush3.bf16.msra.mxu0 %v350_v29  ;;  %v21_v62 = vld [vmem:[%s564_s0 + $0x38] sm:$0xff] }
  0x12   :  { %353 = vmatprep.subr.bf16.mxu0 %v352_v32  ;;  %331 = vmatmul.mubr.msk.f32.vlgmr.msra.gmra.mrb[0].mxu1 %vm69_vm0, %v19_v45 }
  0x13   :  { %333 = vmatprep.mubr.msk.f32.mxu1 %vm69_vm0, %v22_v46 }
  0x15   :  { %355 = vmatpush3.bf16.msra.mxu0 %v354_v39 }
  0x16   :  { %357 = vmatprep.subr.bf16.mxu0 %v356_v40  ;;  %334 = vmatmul.mubr.msk.f32.gmra.mrb[2].mxu1 %vm69_vm0, %v25_v53 }
  0x19   :  { %359 = vmatpush3.bf16.msra.mxu0 %v358_v47 }
  0x1a   :  { %361 = vmatprep.subr.bf16.mxu0 %v360_v48 }
  0x1d   :  { %363 = vmatpush3.bf16.msra.mxu0 %v362_v54 }
  0x1e   :  { %365 = vmatprep.subr.bf16.mxu0 %v364_v55 }
  0x21   :  { %367 = vmatpush3.bf16.msra.mxu0 %v366_v58 }
  0x24   :  { %147 = vmatmul.mubr.f32.vlgmr.msra.gmra.mrb[0].mxu0 %v14_v59 }
  0x25   :  { %151 = vmatprep.mubr.f32.mxu0 %v18_v60 }
  0x28   :  { %152 = vmatmul.mubr.f32.gmra.mrb[2].mxu0 %v17_v61 }
  0x29   :  { %156 = vmatprep.mubr.f32.mxu0 %v21_v62 }
  0x2c   :  { %157 = vmatmul.mubr.f32.gmra.mrb[4].mxu0 %v20_v63 }
  0x2d   :  { %161 = vmatprep.mubr.f32.mxu0 %v24_v0 }
  0x30   :  { %162 = vmatmul.mubr.f32.gmra.mrb[6].mxu0 %v23_v1 }
  0xe5   :  { %v332_v2 = vpop.f32.mrb[0].mxu1 }
  0xe6   :  { %v233_v3 = vpop.f32.mrb[1].mxu1 }
  0xe9   :  { %v335_v4 = vpop.f32.mrb[2].mxu1 }
  0xea   :  { %v243_v5 = vpop.f32.mrb[3].mxu1 }
  0xf7   :  { %v302_v6 = vpop.f32.mrb[0].mxu0 }
  0xf8   :  { %v303_v7 = vpop.f32.mrb[1].mxu0 }
  0xf9   :  { %v304_v9 = vadd.f32 %v303_v7, %v302_v6 }
  0xfb   :  { %v305_v10 = vpop.f32.mrb[2].mxu0  ;;  %v149_v11 = vadd.f32 %v304_v9, %v265_v8 }
  0xfc   :  { %v306_v12 = vpop.f32.mrb[3].mxu0 }
  0xfd   :  { %v307_v13 = vadd.f32 %v306_v12, %v305_v10  ;;  %v234_v14 = vadd.f32 %v233_v3, %v149_v11 }
  0xff   :  { %v154_v15 = vadd.f32 %v307_v13, %v265_v8  ;;  %v252_v16 = vmax.f32 %v234_v14, 0.0  ;;  %v308_v17 = vpop.f32.mrb[4].mxu0 }
 0x100   :  { %v309_v18 = vpop.f32.mrb[5].mxu0 }
 0x101   :  { %v239_v19 = vadd.f32 %v332_v2, %v154_v15  ;;  %257 = vst.msk [vmem:[%s566_s3] sm:$0xff] %vm256_vm1, %v252_v16  ;;  %v310_v20 = vadd.f32 %v309_v18, %v308_v17 }
 0x103   :  { %v253_v21 = vmax.f32 %v239_v19, 0.0  ;;  %v311_v22 = vpop.f32.mrb[6].mxu0  ;;  %v159_v23 = vadd.f32 %v310_v20, %v265_v8 }
 0x104   :  { %v312_v24 = vpop.f32.mrb[7].mxu0 }
 0x105   :  { %258 = vst.msk [vmem:[%s566_s3 + $0x8] sm:$0xff] %vm256_vm1, %v253_v21  ;;  %v313_v25 = vadd.f32 %v312_v24, %v311_v22  ;;  %v244_v26 = vadd.f32 %v243_v5, %v159_v23 }
 0x107   :  { %v164_v27 = vadd.f32 %v313_v25, %v265_v8  ;;  %v254_v28 = vmax.f32 %v244_v26, 0.0 }
 0x109   :  { %v249_v29 = vadd.f32 %v335_v4, %v164_v27  ;;  %259 = vst.msk [vmem:[%s566_s3 + $0x10] sm:$0xff] %vm256_vm1, %v254_v28 }
 0x10b   :  { %v255_v30 = vmax.f32 %v249_v29, 0.0 }
 0x10d   :  { %260 = vst.msk [vmem:[%s566_s3 + $0x18] sm:$0xff] %vm256_vm1, %v255_v30 }

// kernel: resnet_forward.15
= control target key start
LH: loop header
LB: loop body
LE: loop exit
PB: predicated region body
PF: predicated region fallthrough
CT: control target
= control target key end

     0   :  { %v217_v3 = vmov 0.0|0.0   ;;  %vm218_vm0 = vmmov 0   ;;  %v219_v6 = vmov 0.0   ;;  %vm19_vm1 = vcmask 523264   ;;  %s297_s0 = inlined_call_operand.vmem [shape: f32[32,64], index: 0, kind: input, shape index: {}]   ;;  %s298_s1 = inlined_call_operand.vmem [shape: f32[64,10], index: 1, kind: input, shape index: {}]   ;;  %s299_s2 = inlined_call_operand.vmem [shape: f32[1,10], index: 2, kind: input, shape index: {}]   ;;  %s300_s3 = inlined_call_operand.hbm [shape: f32[2,10], index: 3, kind: output, shape index: {}]  }
   0x1   :  { %v43_v0 = vld [vmem:[%s298_s1] sm:$0xff]  ;;  %v44_v1 = vld [vmem:[%s298_s1 + $0x8] sm:$0xff]  ;;  %v45_v2 = vld [vmem:[%s298_s1 + $0x10] sm:$0xff]  ;;  %177 = vmatprep.subr.bf16.mxu0 %v217_v3  ;;  %174 = vmatprep.mubr.msk.f32.mxu0 %vm218_vm0, %v219_v6 }
   0x2   :  { %v178_v4 = vpack.c.bf16 %v44_v1, %v43_v0  ;;  %v46_v5 = vld [vmem:[%s298_s1 + $0x18] sm:$0xff]  ;;  %v15_v7 = vld [vmem:[%s297_s0] sm:$0xff]  ;;  %v16_v9 = vld [vmem:[%s297_s0 + $0x8] sm:$0xff] }
   0x3   :  { %v181_v8 = vpack.c.bf16 %v46_v5, %v45_v2  ;;  %v17_v10 = vld [vmem:[%s297_s0 + $0x10] sm:$0xff]  ;;  %v18_v11 = vld [vmem:[%s297_s0 + $0x18] sm:$0xff]  ;;  %v20_v12 = vsel %vm19_vm1, %v15_v7, 0.0  ;;  %v47_v13 = vld [vmem:[%s298_s1 + $0x20] sm:$0xff]  ;;  %v21_v15 = vsel %vm19_vm1, %v16_v9, 0.0 }
   0x4   :  { %179 = vmatpush3.bf16.msra.mxu0 %v178_v4  ;;  %v48_v14 = vld [vmem:[%s298_s1 + $0x28] sm:$0xff]  ;;  %v31_v16 = vsel %vm19_vm1, %v17_v10, 0.0  ;;  %v32_v17 = vsel %vm19_vm1, %v18_v11, 0.0  ;;  %v22_v18 = vadd.f32 %v21_v15, %v20_v12 }
   0x5   :  { %180 = vmatprep.subr.bf16.mxu0 %v217_v3  ;;  %v33_v19 = vadd.f32 %v32_v17, %v31_v16 }
   0x6   :  { %8 = vsyncpa [#allocation3], 0  ;;  %v184_v20 = vpack.c.bf16 %v48_v14, %v47_v13  ;;  %v23_v21 = vrot.slane %v22_v18, 4  ;;  %v49_v23 = vld [vmem:[%s298_s1 + $0x30] sm:$0xff]  ;;  %v50_v24 = vld [vmem:[%s298_s1 + $0x38] sm:$0xff]  ;;  %vm41_vm2 = vcmask 1040384  }
   0x7   :  { %v34_v22 = vrot.slane %v33_v19, 4  ;;  %v187_v27 = vpack.c.bf16 %v50_v24, %v49_v23  ;;  %v147_v39 = vld [vmem:[%s299_s2] ss:$0 sm:$0xff]  ;;  %s220_s9 = smov [#allocation2]   ;;  %vm131_vm3 = vcmask 74752  }
   0x8   :  { %182 = vmatpush3.bf16.msra.mxu0 %v181_v8  ;;  %v24_v25 = vadd.f32 %v23_v21, %v22_v18  ;;  %s139_s10 = sshll.u32 %s220_s9, 4  ;;  %s140_s10 = int_to_ptr.vmem [resolvable:$true] %s139_s10 }
   0x9   :  { %183 = vmatprep.subr.bf16.mxu0 %v217_v3  ;;  %v35_v26 = vadd.f32 %v34_v22, %v33_v19  ;;  %s193_s11 = scalar_lea.vmem %s140_s10, 32  ;;  %p198_p1 = scmp.lt.s32.totalorder %s140_s10, %s140_s10 }
   0xa   :  { %v25_v28 = vrot.slane %v24_v25, 2  ;;  %p194_p0 = scmp.ne.s32.totalorder %s140_s10, %s193_s11  ;;  %p199_p2 = scmp.lt.s32.totalorder %s193_s11, %s193_s11 }
   0xb   :  { %v36_v29 = vrot.slane %v35_v26, 2 }
   0xc   :  { %185 = vmatpush3.bf16.msra.mxu0 %v184_v20  ;;  %v26_v30 = vadd.f32 %v25_v28, %v24_v25  ;;  %p200_p3 = por %p199_p2, %p198_p1 }
   0xd   :  { %186 = vmatprep.subr.bf16.mxu0 %v217_v3  ;;  %v37_v31 = vadd.f32 %v36_v29, %v35_v26 }
   0xe   :  { %v27_v32 = vrot.slane %v26_v30, 1  ;;  %p201_p4 = pnand %p200_p3, %p194_p0 }
   0xf   :  { %v38_v33 = vrot.slane %v37_v31, 1 }
  0x10   :  { %188 = vmatpush3.bf16.msra.mxu0 %v187_v27  ;;  %v28_v34 = vadd.f32 %v27_v32, %v26_v30 }
  0x11   :  { %v39_v35 = vadd.f32 %v38_v33, %v37_v31 }
  0x12   :  { %v30_v36 = vmul.f32 0.0625, %v28_v34 }
  0x13   :  { %v40_v37 = vmul.f32 0.0625, %v39_v35 }
  0x15   :  { %v42_v38 = vsel %vm41_vm2, %v30_v36, %v40_v37 }
  0x16   :  { %175 = vmatmul.mubr.msk.f32.vlgmr.msra.gmra.mrb[0].mxu0 %vm19_vm1, %v42_v38 }
  0xe9   :  { %v127_v40 = vpop.f32.mrb[0].mxu0 }
  0xea   :  { %v128_v41 = vadd.f32 %v147_v39, %v127_v40  ;;  %v176_v42 = vpop.f32.mrb[1].mxu0 }
  0xec   :  { %132 = vst.msk [vmem:[#allocation2] sm:$0x3] %vm131_vm3, %v128_v41 }
  0xed   :  { %204 = shalt.err (!%p201_p4)
}
  0xee   :  { %s205_s14 = scalar_lea.hbm %s300_s3, 32 }
  0xef   :  { %p206_p5 = scmp.ne.s32.totalorder %s300_s3, %s205_s14  ;;  %p209_p6 = scmp.lt.u32.totalorder %s205_s14, %s300_s3 }
  0xf1   :  { %p211_p7 = pnand %p209_p6, %p206_p5 }
  0xf3   :  { %214 = shalt.err (!%p211_p7)
}
  0xf4   :  { %142 = dma.vmem_to_hbm [thread:$0]  %s140_s10, 32, %s300_s3, [#allocation3]  }
  0xf5   :  { %215 = dma.done.wait [#allocation3], 32  }
  0xf6   :  { %216 = vsyncadd [#allocation3], 4294967264 }
  0xf7   :  { %146 = vsyncpa [#allocation3], 1 }

// kernel: resnet_forward.14
= control target key start
LH: loop header
LB: loop body
LE: loop exit
PB: predicated region body
PF: predicated region fallthrough
CT: control target
= control target key end

     0   :  { %vm116_vm0 = vcmask 523264   ;;  %s955_s1 = inlined_call_operand.vmem [shape: f32[576,64], index: 1, kind: input, shape index: {}]   ;;  %s956_s0 = inlined_call_operand.vmem [shape: f32[32,576], index: 0, kind: input, shape index: {}]   ;;  %s957_s2 = inlined_call_operand.vmem [shape: f32[1,64], index: 2, kind: input, shape index: {}]   ;;  %s958_s3 = inlined_call_operand.vmem [shape: f32[32,64], index: 3, kind: input, shape index: {}]   ;;  %s959_s4 = inlined_call_operand.vmem [shape: f32[32,64], index: 4, kind: output, shape index: {}]  }
   0x1   :  { %v53_v0 = vld [vmem:[%s955_s1 + $0x80] sm:$0xff]  ;;  %v54_v1 = vld [vmem:[%s955_s1 + $0x88] sm:$0xff]  ;;  %v55_v11 = vld [vmem:[%s955_s1 + $0x90] sm:$0xff] }
   0x2   :  { %v85_v2 = vld [vmem:[%s955_s1 + $0x180] sm:$0xff]  ;;  %v531_v3 = vpack.c.bf16 %v54_v1, %v53_v0  ;;  %v86_v4 = vld [vmem:[%s955_s1 + $0x188] sm:$0xff]  ;;  %v56_v13 = vld [vmem:[%s955_s1 + $0x98] sm:$0xff] }
   0x3   :  { %v37_v5 = vld [vmem:[%s955_s1] sm:$0xff]  ;;  %v38_v6 = vld [vmem:[%s955_s1 + $0x8] sm:$0xff]  ;;  %v563_v7 = vpack.c.bf16 %v86_v4, %v85_v2  ;;  %v87_v14 = vld [vmem:[%s955_s1 + $0x190] sm:$0xff]  ;;  %v535_v16 = vpack.c.bf16 %v56_v13, %v55_v11 }
   0x4   :  { %v533_v8 = vpack.c.bf16 %v38_v6, %v37_v5  ;;  %v69_v9 = vld [vmem:[%s955_s1 + $0x100] sm:$0xff]  ;;  %v70_v10 = vld [vmem:[%s955_s1 + $0x108] sm:$0xff]  ;;  %532 = vmatprep.subr.bf16.mxu0 %v531_v3  ;;  %v88_v15 = vld [vmem:[%s955_s1 + $0x198] sm:$0xff] }
   0x5   :  { %v565_v12 = vpack.c.bf16 %v70_v10, %v69_v9  ;;  %564 = vmatprep.subr.bf16.mxu1 %v563_v7  ;;  %v567_v17 = vpack.c.bf16 %v88_v15, %v87_v14  ;;  %v39_v18 = vld [vmem:[%s955_s1 + $0x10] sm:$0xff]  ;;  %v40_v19 = vld [vmem:[%s955_s1 + $0x18] sm:$0xff]  ;;  %v57_v23 = vld [vmem:[%s955_s1 + $0xa0] sm:$0xff] }
   0x6   :  { %534 = vmatpush3.bf16.msra.mxu0 %v533_v8  ;;  %v71_v20 = vld [vmem:[%s955_s1 + $0x110] sm:$0xff]  ;;  %v537_v21 = vpack.c.bf16 %v40_v19, %v39_v18  ;;  %v72_v22 = vld [vmem:[%s955_s1 + $0x118] sm:$0xff]  ;;  %v58_v24 = vld [vmem:[%s955_s1 + $0xa8] sm:$0xff] }
   0x7   :  { %566 = vmatpush3.bf16.msra.mxu1 %v565_v12  ;;  %536 = vmatprep.subr.bf16.mxu0 %v535_v16  ;;  %v569_v25 = vpack.c.bf16 %v72_v22, %v71_v20  ;;  %v539_v26 = vpack.c.bf16 %v58_v24, %v57_v23  ;;  %v89_v27 = vld [vmem:[%s955_s1 + $0x1a0] sm:$0xff]  ;;  %v90_v28 = vld [vmem:[%s955_s1 + $0x1a8] sm:$0xff]  ;;  %v59_v35 = vld [vmem:[%s955_s1 + $0xb0] sm:$0xff] }
   0x8   :  { %568 = vmatprep.subr.bf16.mxu1 %v567_v17  ;;  %v41_v29 = vld [vmem:[%s955_s1 + $0x20] sm:$0xff]  ;;  %v571_v30 = vpack.c.bf16 %v90_v28, %v89_v27  ;;  %v42_v31 = vld [vmem:[%s955_s1 + $0x28] sm:$0xff]  ;;  %v60_v36 = vld [vmem:[%s955_s1 + $0xb8] sm:$0xff] }
   0x9   :  { %v73_v32 = vld [vmem:[%s955_s1 + $0x120] sm:$0xff]  ;;  %v74_v33 = vld [vmem:[%s955_s1 + $0x128] sm:$0xff]  ;;  %v541_v34 = vpack.c.bf16 %v42_v31, %v41_v29  ;;  %v91_v37 = vld [vmem:[%s955_s1 + $0x1b0] sm:$0xff]  ;;  %v543_v39 = vpack.c.bf16 %v60_v36, %v59_v35 }
   0xa   :  { %538 = vmatpush3.bf16.msra.mxu0 %v537_v21  ;;  %v573_v38 = vpack.c.bf16 %v74_v33, %v73_v32  ;;  %v92_v40 = vld [vmem:[%s955_s1 + $0x1b8] sm:$0xff]  ;;  %v43_v41 = vld [vmem:[%s955_s1 + $0x30] sm:$0xff]  ;;  %v61_v46 = vld [vmem:[%s955_s1 + $0xc0] sm:$0xff] }
   0xb   :  { %570 = vmatpush3.bf16.msra.mxu1 %v569_v25  ;;  %540 = vmatprep.subr.bf16.mxu0 %v539_v26  ;;  %v44_v42 = vld [vmem:[%s955_s1 + $0x38] sm:$0xff]  ;;  %v575_v43 = vpack.c.bf16 %v92_v40, %v91_v37  ;;  %v75_v44 = vld [vmem:[%s955_s1 + $0x130] sm:$0xff]  ;;  %v62_v47 = vld [vmem:[%s955_s1 + $0xc8] sm:$0xff] }
   0xc   :  { %572 = vmatprep.subr.bf16.mxu1 %v571_v30  ;;  %v76_v45 = vld [vmem:[%s955_s1 + $0x138] sm:$0xff]  ;;  %v93_v48 = vld [vmem:[%s955_s1 + $0x1c0] sm:$0xff]  ;;  %v94_v49 = vld [vmem:[%s955_s1 + $0x1c8] sm:$0xff]  ;;  %v545_v50 = vpack.c.bf16 %v44_v42, %v43_v41  ;;  %v547_v52 = vpack.c.bf16 %v62_v47, %v61_v46 }
   0xd   :  { %v577_v51 = vpack.c.bf16 %v76_v45, %v75_v44  ;;  %v45_v53 = vld [vmem:[%s955_s1 + $0x40] sm:$0xff]  ;;  %v46_v54 = vld [vmem:[%s955_s1 + $0x48] sm:$0xff]  ;;  %v579_v56 = vpack.c.bf16 %v94_v49, %v93_v48  ;;  %v63_v58 = vld [vmem:[%s955_s1 + $0xd0] sm:$0xff] }
   0xe   :  { %542 = vmatpush3.bf16.msra.mxu0 %v541_v34  ;;  %v77_v55 = vld [vmem:[%s955_s1 + $0x140] sm:$0xff]  ;;  %v78_v57 = vld [vmem:[%s955_s1 + $0x148] sm:$0xff]  ;;  %v64_v59 = vld [vmem:[%s955_s1 + $0xd8] sm:$0xff]  ;;  %v549_v62 = vpack.c.bf16 %v46_v54, %v45_v53 }
   0xf   :  { %574 = vmatpush3.bf16.msra.mxu1 %v573_v38  ;;  %544 = vmatprep.subr.bf16.mxu0 %v543_v39  ;;  %v95_v60 = vld [vmem:[%s955_s1 + $0x1d0] sm:$0xff]  ;;  %v96_v61 = vld [vmem:[%s955_s1 + $0x1d8] sm:$0xff]  ;;  %v581_v63 = vpack.c.bf16 %v78_v57, %v77_v55  ;;  %v551_v0 = vpack.c.bf16 %v64_v59, %v63_v58  ;;  %v65_v6 = vld [vmem:[%s955_s1 + $0xe0] sm:$0xff] }
  0x10   :  { %576 = vmatprep.subr.bf16.mxu1 %v575_v43  ;;  %v47_v1 = vld [vmem:[%s955_s1 + $0x50] sm:$0xff]  ;;  %v48_v2 = vld [vmem:[%s955_s1 + $0x58] sm:$0xff]  ;;  %v583_v4 = vpack.c.bf16 %v96_v61, %v95_v60  ;;  %v66_v7 = vld [vmem:[%s955_s1 + $0xe8] sm:$0xff] }
  0x11   :  { %v79_v3 = vld [vmem:[%s955_s1 + $0x150] sm:$0xff]  ;;  %v80_v5 = vld [vmem:[%s955_s1 + $0x158] sm:$0xff]  ;;  %v97_v8 = vld [vmem:[%s955_s1 + $0x1e0] sm:$0xff]  ;;  %v553_v10 = vpack.c.bf16 %v48_v2, %v47_v1  ;;  %v555_v14 = vpack.c.bf16 %v66_v7, %v65_v6 }
  0x12   :  { %546 = vmatpush3.bf16.msra.mxu0 %v545_v50  ;;  %v98_v9 = vld [vmem:[%s955_s1 + $0x1e8] sm:$0xff]  ;;  %v49_v11 = vld [vmem:[%s955_s1 + $0x60] sm:$0xff]  ;;  %v585_v13 = vpack.c.bf16 %v80_v5, %v79_v3  ;;  %v20_v17 = vld [vmem:[%s956_s0 + $0x18] sm:$0xff] }
  0x13   :  { %578 = vmatpush3.bf16.msra.mxu1 %v577_v51  ;;  %548 = vmatprep.subr.bf16.mxu0 %v547_v52  ;;  %v50_v12 = vld [vmem:[%s955_s1 + $0x68] sm:$0xff]  ;;  %v81_v15 = vld [vmem:[%s955_s1 + $0x160] sm:$0xff]  ;;  %v587_v18 = vpack.c.bf16 %v98_v9, %v97_v8  ;;  %v67_v20 = vld [vmem:[%s955_s1 + $0xf0] sm:$0xff] }
  0x14   :  { %580 = vmatprep.subr.bf16.mxu1 %v579_v56  ;;  %v18_v16 = vld [vmem:[%s956_s0 + $0x8] sm:$0xff]  ;;  %v68_v21 = vld [vmem:[%s955_s1 + $0xf8] sm:$0xff]  ;;  %v99_v22 = vld [vmem:[%s955_s1 + $0x1f0] sm:$0xff]  ;;  %278 = vmatprep.mubr.f32.mxu1 %v20_v17  ;;  %v557_v24 = vpack.c.bf16 %v50_v12, %v49_v11 }
  0x15   :  { %v82_v19 = vld [vmem:[%s955_s1 + $0x168] sm:$0xff]  ;;  %193 = vmatprep.mubr.f32.mxu0 %v18_v16  ;;  %v100_v23 = vld [vmem:[%s955_s1 + $0x1f8] sm:$0xff]  ;;  %v559_v26 = vpack.c.bf16 %v68_v21, %v67_v20  ;;  %v51_v27 = vld [vmem:[%s955_s1 + $0x70] sm:$0xff] }
  0x16   :  { %550 = vmatpush3.bf16.msra.mxu0 %v549_v62  ;;  %v589_v25 = vpack.c.bf16 %v82_v19, %v81_v15  ;;  %v52_v28 = vld [vmem:[%s955_s1 + $0x78] sm:$0xff]  ;;  %v83_v29 = vld [vmem:[%s955_s1 + $0x170] sm:$0xff]  ;;  %v591_v30 = vpack.c.bf16 %v100_v23, %v99_v22  ;;  %v101_v32 = vld [vmem:[%s955_s1 + $0x200] sm:$0xff] }
  0x17   :  { %582 = vmatpush3.bf16.msra.mxu1 %v581_v63  ;;  %552 = vmatprep.subr.bf16.mxu0 %v551_v0  ;;  %v84_v31 = vld [vmem:[%s955_s1 + $0x178] sm:$0xff]  ;;  %v102_v33 = vld [vmem:[%s955_s1 + $0x208] sm:$0xff]  ;;  %v561_v34 = vpack.c.bf16 %v52_v28, %v51_v27  ;;  %v103_v37 = vld [vmem:[%s955_s1 + $0x210] sm:$0xff] }
  0x18   :  { %584 = vmatprep.subr.bf16.mxu1 %v583_v4  ;;  %v593_v35 = vpack.c.bf16 %v84_v31, %v83_v29  ;;  %v595_v36 = vpack.c.bf16 %v102_v33, %v101_v32  ;;  %v104_v38 = vld [vmem:[%s955_s1 + $0x218] sm:$0xff]  ;;  %v17_v39 = vld [vmem:[%s956_s0] sm:$0xff]  ;;  %v19_v40 = vld [vmem:[%s956_s0 + $0x10] sm:$0xff] }
  0x19   :  { %v23_v41 = vld [vmem:[%s956_s0 + $0x30] sm:$0xff]  ;;  %v599_v42 = vpack.c.bf16 %v104_v38, %v103_v37  ;;  %v25_v43 = vld [vmem:[%s956_s0 + $0x40] sm:$0xff]  ;;  %v106_v45 = vld [vmem:[%s955_s1 + $0x228] sm:$0xff] }
  0x1a   :  { %554 = vmatpush3.bf16.msra.mxu0 %v553_v10  ;;  %v105_v44 = vld [vmem:[%s955_s1 + $0x220] sm:$0xff]  ;;  %v22_v46 = vld [vmem:[%s956_s0 + $0x28] sm:$0xff]  ;;  %v24_v47 = vld [vmem:[%s956_s0 + $0x38] sm:$0xff] }
  0x1b   :  { %586 = vmatpush3.bf16.msra.mxu1 %v585_v13  ;;  %556 = vmatprep.subr.bf16.mxu0 %v555_v14  ;;  %v28_v48 = vld [vmem:[%s956_s0 + $0x58] sm:$0xff]  ;;  %v603_v49 = vpack.c.bf16 %v106_v45, %v105_v44  ;;  %v30_v50 = vld [vmem:[%s956_s0 + $0x68] sm:$0xff]  ;;  %v107_v51 = vld [vmem:[%s955_s1 + $0x230] sm:$0xff] }
  0x1c   :  { %588 = vmatprep.subr.bf16.mxu1 %v587_v18  ;;  %v108_v52 = vld [vmem:[%s955_s1 + $0x238] sm:$0xff]  ;;  %v27_v53 = vld [vmem:[%s956_s0 + $0x50] sm:$0xff]  ;;  %v29_v54 = vld [vmem:[%s956_s0 + $0x60] sm:$0xff] }
  0x1d   :  { %v33_v55 = vld [vmem:[%s956_s0 + $0x80] sm:$0xff]  ;;  %v607_v56 = vpack.c.bf16 %v108_v52, %v107_v51  ;;  %v35_v57 = vld [vmem:[%s956_s0 + $0x90] sm:$0xff]  ;;  %v32_v58 = vld [vmem:[%s956_s0 + $0x78] sm:$0xff] }
  0x1e   :  { %558 = vmatpush3.bf16.msra.mxu0 %v557_v24  ;;  %v34_v59 = vld [vmem:[%s956_s0 + $0x88] sm:$0xff]  ;;  %v21_v60 = vld [vmem:[%s956_s0 + $0x20] sm:$0xff]  ;;  %v31_v61 = vld [vmem:[%s956_s0 + $0x70] sm:$0xff] }
  0x1f   :  { %590 = vmatpush3.bf16.msra.mxu1 %v589_v25  ;;  %560 = vmatprep.subr.bf16.mxu0 %v559_v26  ;;  %v26_v62 = vld [vmem:[%s956_s0 + $0x48] sm:$0xff]  ;;  %v36_v63 = vld [vmem:[%s956_s0 + $0x98] sm:$0xff]  ;;  %v404_v1 = vld [vmem:[%s957_s2] ss:$0 sm:$0xff] }
  0x20   :  { %592 = vmatprep.subr.bf16.mxu1 %v591_v30  ;;  %v385_v33 = vld [vmem:[%s958_s3 + $0x8] sm:$0xff]  ;;  %v384_v37 = vld [vmem:[%s958_s3] sm:$0xff] }
  0x22   :  { %562 = vmatpush3.bf16.msra.mxu0 %v561_v34 }
  0x23   :  { %594 = vmatpush3.bf16.msra.mxu1 %v593_v35  ;;  %596 = vmatprep.subr.bf16.mxu0 %v595_v36 }
  0x24   :  { %611 = vmatprep.subr.bf16.mxu1 %v595_v36 }
  0x25   :  { %194 = vmatmul.mubr.f32.vlgmr.msra.gmra.mrb[0].mxu0 %v17_v39 }
  0x26   :  { %279 = vmatmul.mubr.f32.vlgmr.msra.gmra.mrb[0].mxu1 %v19_v40  ;;  %598 = vmatpush3.bf16.msra.mxu0 %v595_v36 }
  0x27   :  { %615 = vmatpush3.bf16.msra.mxu1 %v595_v36  ;;  %198 = vmatprep.mubr.f32.mxu0 %v23_v41  ;;  %v386_v41 = vld [vmem:[%s958_s3 + $0x10] sm:$0xff] }
  0x28   :  { %283 = vmatprep.mubr.f32.mxu1 %v25_v43  ;;  %600 = vmatprep.subr.bf16.mxu0 %v599_v42  ;;  %v387_v43 = vld [vmem:[%s958_s3 + $0x18] sm:$0xff] }
  0x29   :  { %199 = vmatmul.mubr.f32.gmra.mrb[2].mxu0 %v22_v46  ;;  %612 = vmatprep.subr.bf16.mxu1 %v599_v42 }
  0x2a   :  { %284 = vmatmul.mubr.f32.gmra.mrb[2].mxu1 %v24_v47  ;;  %602 = vmatpush3.bf16.msra.mxu0 %v599_v42 }
  0x2b   :  { %616 = vmatpush3.bf16.msra.mxu1 %v599_v42  ;;  %203 = vmatprep.mubr.f32.mxu0 %v28_v48 }
  0x2c   :  { %288 = vmatprep.mubr.f32.mxu1 %v30_v50  ;;  %604 = vmatprep.subr.bf16.mxu0 %v603_v49 }
  0x2d   :  { %204 = vmatmul.mubr.f32.gmra.mrb[4].mxu0 %v27_v53  ;;  %613 = vmatprep.subr.bf16.mxu1 %v603_v49 }
  0x2e   :  { %289 = vmatmul.mubr.f32.gmra.mrb[4].mxu1 %v29_v54  ;;  %606 = vmatpush3.bf16.msra.mxu0 %v603_v49 }
  0x2f   :  { %617 = vmatpush3.bf16.msra.mxu1 %v603_v49  ;;  %208 = vmatprep.mubr.f32.mxu0 %v33_v55 }
  0x30   :  { %293 = vmatprep.mubr.f32.mxu1 %v35_v57  ;;  %608 = vmatprep.subr.bf16.mxu0 %v607_v56 }
  0x31   :  { %209 = vmatmul.mubr.f32.gmra.mrb[6].mxu0 %v32_v58  ;;  %614 = vmatprep.subr.bf16.mxu1 %v607_v56 }
  0x32   :  { %294 = vmatmul.mubr.f32.gmra.mrb[6].mxu1 %v34_v59  ;;  %610 = vmatpush3.bf16.msra.mxu0 %v607_v56 }
  0x33   :  { %618 = vmatpush3.bf16.msra.mxu1 %v607_v56  ;;  %525 = vmatprep.mubr.msk.f32.mxu0 %vm116_vm0, %v21_v60 }
  0x34   :  { %528 = vmatprep.mubr.msk.f32.mxu1 %vm116_vm0, %v31_v61 }
  0x35   :  { %526 = vmatmul.mubr.msk.f32.vlgmr.msra.gmra.mrb[8].mxu0 %vm116_vm0, %v26_v62 }
  0x36   :  { %529 = vmatmul.mubr.msk.f32.vlgmr.msra.gmra.mrb[8].mxu1 %vm116_vm0, %v36_v63 }
  0xf8   :  { %v441_v0 = vpop.f32.mrb[0].mxu0 }
  0xf9   :  { %v442_v2 = vpop.f32.mrb[1].mxu0  ;;  %v485_v3 = vpop.f32.mrb[0].mxu1 }
  0xfa   :  { %v443_v4 = vadd.f32 %v442_v2, %v441_v0  ;;  %v486_v5 = vpop.f32.mrb[1].mxu1 }
  0xfb   :  { %v487_v6 = vadd.f32 %v486_v5, %v485_v3 }
  0xfc   :  { %v196_v7 = vadd.f32 %v443_v4, %v404_v1  ;;  %v444_v8 = vpop.f32.mrb[2].mxu0 }
  0xfd   :  { %v445_v9 = vpop.f32.mrb[3].mxu0  ;;  %v488_v10 = vpop.f32.mrb[2].mxu1 }
  0xfe   :  { %v446_v11 = vadd.f32 %v445_v9, %v444_v8  ;;  %v489_v12 = vpop.f32.mrb[3].mxu1  ;;  %v281_v13 = vadd.f32 %v487_v6, %v196_v7 }
  0xff   :  { %v490_v14 = vadd.f32 %v489_v12, %v488_v10 }
 0x100   :  { %v201_v15 = vadd.f32 %v446_v11, %v404_v1  ;;  %v447_v16 = vpop.f32.mrb[4].mxu0 }
 0x101   :  { %v448_v17 = vpop.f32.mrb[5].mxu0  ;;  %v491_v18 = vpop.f32.mrb[4].mxu1 }
 0x102   :  { %v449_v19 = vadd.f32 %v448_v17, %v447_v16  ;;  %v492_v20 = vpop.f32.mrb[5].mxu1  ;;  %v286_v21 = vadd.f32 %v490_v14, %v201_v15 }
 0x103   :  { %v493_v22 = vadd.f32 %v492_v20, %v491_v18 }
 0x104   :  { %v206_v23 = vadd.f32 %v449_v19, %v404_v1  ;;  %v450_v24 = vpop.f32.mrb[6].mxu0 }
 0x105   :  { %v451_v25 = vpop.f32.mrb[7].mxu0  ;;  %v494_v26 = vpop.f32.mrb[6].mxu1 }
 0x106   :  { %v452_v27 = vadd.f32 %v451_v25, %v450_v24  ;;  %v495_v28 = vpop.f32.mrb[7].mxu1  ;;  %v291_v29 = vadd.f32 %v493_v22, %v206_v23 }
 0x107   :  { %v496_v30 = vadd.f32 %v495_v28, %v494_v26 }
 0x108   :  { %v211_v31 = vadd.f32 %v452_v27, %v404_v1  ;;  %v527_v32 = vpop.f32.mrb[8].mxu0 }
 0x109   :  { %v371_v34 = vadd.f32 %v527_v32, %v286_v21  ;;  %v530_v35 = vpop.f32.mrb[8].mxu1  ;;  %v365_v36 = vpop.f32.mrb[9].mxu0 }
 0x10a   :  { %v296_v38 = vadd.f32 %v496_v30, %v211_v31  ;;  %v366_v39 = vadd.f32 %v365_v36, %v281_v13  ;;  %v375_v40 = vpop.f32.mrb[9].mxu1 }
 0x10b   :  { %v389_v42 = vadd.f32 %v385_v33, %v371_v34  ;;  %v376_v44 = vadd.f32 %v375_v40, %v291_v29 }
 0x10c   :  { %v381_v45 = vadd.f32 %v530_v35, %v296_v38  ;;  %v388_v46 = vadd.f32 %v384_v37, %v366_v39 }
 0x10d   :  { %v393_v47 = vmax.f32 %v389_v42, 0.0  ;;  %v390_v48 = vadd.f32 %v386_v41, %v376_v44 }
 0x10e   :  { %v391_v49 = vadd.f32 %v387_v43, %v381_v45  ;;  %v392_v50 = vmax.f32 %v388_v46, 0.0 }
 0x10f   :  { %397 = vst.msk [vmem:[%s959_s4 + $0x8] sm:$0xff] %vm116_vm0, %v393_v47  ;;  %v394_v51 = vmax.f32 %v390_v48, 0.0 }
 0x110   :  { %v395_v52 = vmax.f32 %v391_v49, 0.0  ;;  %396 = vst.msk [vmem:[%s959_s4] sm:$0xff] %vm116_vm0, %v392_v50 }
 0x111   :  { %398 = vst.msk [vmem:[%s959_s4 + $0x10] sm:$0xff] %vm116_vm0, %v394_v51 }
 0x112   :  { %399 = vst.msk [vmem:[%s959_s4 + $0x18] sm:$0xff] %vm116_vm0, %v395_v52 }

</bundles_post_ra>
